<compile_context>
chip_gen: v5e
topology: v5e:2x2
jax: 0.10.0
libtpu: 0.0.40
codegen_flags: <defaults>
</compile_context>

<pallas_src>
import functools
import numpy as np

import jax
import jax.numpy as jnp
from jax import lax
from jax.experimental import pallas as pl
from jax.experimental.pallas import tpu as pltpu


LN_EPS = 1e-6     # attention-is-all-you-need repo / spec's explicit eps=1e-06
NEG_INF = -1e9    # masked_fill value used by ScaledDotProductAttention


def _layer_norm(x, g, b):
    mu = jnp.mean(x, axis=-1, keepdims=True)
    var = jnp.mean((x - mu) ** 2, axis=-1, keepdims=True)
    return (x - mu) * lax.rsqrt(var + LN_EPS) * g + b


# ----------------------------------------------------------------------------
# One fused Pallas kernel for the entire forward pass
# ----------------------------------------------------------------------------

def _fused_forward_kernel(
    emb_ref, noise_ref, mask_ref,
    melody_w_ref, melody_b_ref, enc_ln_g_ref, enc_ln_b_ref,
    noise_w_ref, noise_b_ref,
    wqkv_ref, wo_ref,
    ln1_g_ref, ln1_b_ref,
    w1_ref, b1_ref, w2_ref, b2_ref,
    ln2_g_ref, ln2_b_ref,
    prj_w_ref,
    out_ref,
    *, B, L, n_head, d_k, d_v, n_enc_layers, n_dec_layers,
):
    H = n_head
    scale = 1.0 / float(np.sqrt(d_k))
    q_end = H * d_k          # end of Q columns in fused QKV
    k_end = 2 * H * d_k      # end of K columns in fused QKV

    def encoder_layer(x2d, l):
        # ---- multi-head self-attention: one fused QKV matmul for the whole slab ----
        qkv = jnp.dot(x2d, wqkv_ref[l],
                      preferred_element_type=jnp.float32)      # (B*L, 2*H*dk + H*dv)
        per_batch = []
        for b in range(B):                                      # static, B is tiny
            rows = qkv[b * L:(b + 1) * L, :]                    # (L, ...)
            mask_b = mask_ref[b]                                # (1, L)
            heads = []
            for h in range(H):                                  # static
                q = rows[:, h * d_k:(h + 1) * d_k] * scale
                k = rows[:, q_end + h * d_k:q_end + (h + 1) * d_k]
                v = rows[:, k_end + h * d_v:k_end + (h + 1) * d_v]
                s = lax.dot_general(q, k, (((1,), (1,)), ((), ())),
                                    preferred_element_type=jnp.float32)   # (L, L)
                s = jnp.where(mask_b > 0, s, jnp.float32(NEG_INF))
                s = s - jnp.max(s, axis=-1, keepdims=True)
                e = jnp.exp(s)
                p = e * pl.reciprocal(jnp.sum(e, axis=-1, keepdims=True), approx=True)
                heads.append(jnp.dot(p, v, preferred_element_type=jnp.float32))
            per_batch.append(jnp.concatenate(heads, axis=-1))   # (L, H*dv)
        attn = jnp.concatenate(per_batch, axis=0)               # (B*L, H*dv)
        # single full-width output projection (fc has no bias) + residual, post-LN
        y = jnp.dot(attn, wo_ref[l], preferred_element_type=jnp.float32) + x2d
        y = _layer_norm(y, ln1_g_ref[l], ln1_b_ref[l])
        # ---- position-wise feed forward, post-LN ----
        h1 = jnp.maximum(
            jnp.dot(y, w1_ref[l], preferred_element_type=jnp.float32) + b1_ref[l], 0.0)
        h2 = jnp.dot(h1, w2_ref[l], preferred_element_type=jnp.float32) + b2_ref[l]
        return _layer_norm(h2 + y, ln2_g_ref[l], ln2_b_ref[l])

    # --- MelodyEncoder: melody_emb linear -> (dropout = id) -> LayerNorm -> layers ---
    x = jnp.dot(emb_ref[...], melody_w_ref[...],
                preferred_element_type=jnp.float32) + melody_b_ref[...]
    x = _layer_norm(x, enc_ln_g_ref[...], enc_ln_b_ref[...])
    for l in range(n_enc_layers):
        x = encoder_layer(x, l)

    # --- z = enc_output + noise_emb(noise) ---
    z = x + (jnp.dot(noise_ref[...], noise_w_ref[...],
                     preferred_element_type=jnp.float32) + noise_b_ref[...])

    # --- LyricsDecoder (enc_dec_attn=False): self-attn EncoderLayers on z, src_mask ---
    for l in range(n_enc_layers, n_enc_layers + n_dec_layers):
        z = encoder_layer(z, l)

    # --- fused, lane-padded (128-wide) output projection: [syll | word | 0-pad] ---
    out_ref[...] = jnp.dot(z, prj_w_ref[...], preferred_element_type=jnp.float32)


# ----------------------------------------------------------------------------
# Parameter init (deterministic, xavier-uniform-style) and positional table
# ----------------------------------------------------------------------------

def sinusoid_table(n_position, d_hid):
    def angle_vec(pos):
        return [pos / np.power(10000, 2 * (j // 2) / d_hid) for j in range(d_hid)]
    tab = np.array([angle_vec(p) for p in range(n_position)], dtype=np.float64)
    tab[:, 0::2] = np.sin(tab[:, 0::2])
    tab[:, 1::2] = np.cos(tab[:, 1::2])
    return jnp.asarray(tab, dtype=jnp.float32)[None]   # (1, n_position, d_hid)


def init_params(key, cfg):
    d = cfg["d_model"]
    dq = d // 4
    H, dk, dv, d_inner = cfg["n_head"], cfg["d_k"], cfg["d_v"], cfg["d_inner"]
    n_total = 2 * cfg["n_layers"]          # encoder layers then decoder layers
    keys = iter(jax.random.split(key, 256))

    def xav(shape):
        fi, fo = shape[-2], shape[-1]
        lim = float(np.sqrt(6.0 / (fi + fo)))
        return jax.random.uniform(next(keys), shape, jnp.float32, -lim, lim)

    def make_layer():
        wq, wk, wv = xav((d, H * dk)), xav((d, H * dk)), xav((d, H * dv))
        return dict(
            wqkv=jnp.concatenate([wq, wk, wv], axis=1),      # (d, 2*H*dk + H*dv)
            wo=xav((H * dv, d)),
            ln1_g=jnp.ones((1, d), jnp.float32), ln1_b=jnp.zeros((1, d), jnp.float32),
            w1=xav((d, d_inner)), b1=jnp.zeros((1, d_inner), jnp.float32),
            w2=xav((d_inner, d)), b2=jnp.zeros((1, d), jnp.float32),
            ln2_g=jnp.ones((1, d), jnp.float32), ln2_b=jnp.zeros((1, d), jnp.float32),
        )

    layers = [make_layer() for _ in range(n_total)]
    stacked = {k: jnp.stack([lp[k] for lp in layers], axis=0) for k in layers[0]}

    v0, v1 = cfg["n_trg_vocab"]
    v_pad = max(128, ((v0 + v1 + 127) // 128) * 128)         # lane-dense output width
    prj = jnp.concatenate([xav((d, v0)), xav((d, v1))], axis=1)
    prj_pad = jnp.pad(prj, ((0, 0), (0, v_pad - (v0 + v1))))

    return dict(
        emb_pitch=xav((cfg["n_src_vocab"][0], dq)),
        emb_dur=xav((cfg["n_src_vocab"][1], dq)),
        emb_rest=xav((cfg["n_src_vocab"][2], dq)),
        pos_table=sinusoid_table(cfg["n_position"], dq),
        melody_w=xav((d, d)), melody_b=jnp.zeros((1, d), jnp.float32),
        enc_ln_g=jnp.ones((1, d), jnp.float32), enc_ln_b=jnp.zeros((1, d), jnp.float32),
        noise_w=xav((d, d)), noise_b=jnp.zeros((1, d), jnp.float32),
        prj_w=prj_pad,
        layers=stacked,
    )


# ----------------------------------------------------------------------------
# Forward pass: embedding gathers + mask in plain JAX, everything else in the kernel
# ----------------------------------------------------------------------------

def transformer_forward(params, src_pitch, src_dur, src_rest, trg_seq, noise, cfg):
    # trg_mask is only needed when enc_dec_attn=True (default False) -> dead work dropped.
    del trg_seq
    B, L = src_pitch.shape
    d = cfg["d_model"]
    v0, v1 = cfg["n_trg_vocab"]

    # get_pad_mask(src_seq_pitch, src_pad_idx[0]) -> (B, 1, L)
    src_mask = (src_pitch != cfg["src_pad_idx"][0]).astype(jnp.float32)[:, None, :]

    # MelodyEncoder embeddings.
    # TODO(synk): tiny-vocab embedding gathers stay in XLA — no clean Pallas gather win here.
    emb_pitch = params["emb_pitch"][src_pitch]
    emb_dur = params["emb_dur"][src_dur]
    emb_rest = params["emb_rest"][src_rest]
    assert params["pos_table"].shape[1] == L, \
        "n_position must equal seq length (PositionalEncodingReturn + expand_as)"
    emb_pos = jnp.broadcast_to(params["pos_table"], emb_pitch.shape)
    emb_melody = jnp.concatenate([emb_pitch, emb_dur, emb_rest, emb_pos], axis=2)  # (B,L,d)

    lay = params["layers"]
    args = (
        emb_melody.reshape(B * L, d),
        noise.reshape(B * L, d),
        src_mask,
        params["melody_w"], params["melody_b"],
        params["enc_ln_g"], params["enc_ln_b"],
        params["noise_w"], params["noise_b"],
        lay["wqkv"], lay["wo"],
        lay["ln1_g"], lay["ln1_b"],
        lay["w1"], lay["b1"], lay["w2"], lay["b2"],
        lay["ln2_g"], lay["ln2_b"],
        params["prj_w"],
    )
    v_pad = params["prj_w"].shape[1]

    kernel = functools.partial(
        _fused_forward_kernel,
        B=B, L=L, n_head=cfg["n_head"], d_k=cfg["d_k"], d_v=cfg["d_v"],
        n_enc_layers=cfg["n_layers"], n_dec_layers=cfg["n_layers"],
    )

    def full_spec(a):
        nd = a.ndim
        return pl.BlockSpec(a.shape, lambda i, nd=nd: (0,) * nd)

    logits = pl.pallas_call(
        kernel,
        out_shape=jax.ShapeDtypeStruct((B * L, v_pad), jnp.float32),
        grid=(1,),
        in_specs=[full_spec(a) for a in args],
        out_specs=pl.BlockSpec((B * L, v_pad), lambda i: (0, 0)),
        compiler_params=pltpu.CompilerParams(
            dimension_semantics=("arbitrary",),
            vmem_limit_bytes=64 * 1024 * 1024,
        ),
    )(*args)

    # scale_prj=False, no projection biases; slice padded lane dim back to vocab sizes.
    logit_syll = logits[:, :v0].reshape(B, L, v0)
    logit_word = logits[:, v0:v0 + v1].reshape(B, L, v1)
    return logit_syll, logit_word


# ----------------------------------------------------------------------------
# Main
# ----------------------------------------------------------------------------

if __name__ == "__main__":
    cfg = dict(
        n_src_vocab=(20, 12, 10),
        n_trg_vocab=(30, 25),
        src_pad_idx=(0, 0, 0),
        trg_pad_idx=(0,),
        d_model=32,
        d_inner=64,
        n_layers=2,
        n_head=4,
        d_k=8,
        d_v=8,
        n_position=8,    # must equal seq length (PositionalEncodingReturn + expand_as)
    )
    B, L = 2, 8

    root = jax.random.PRNGKey(0)
    kp, kd, kr, kt, kn, kw = jax.random.split(root, 6)
    src_pitch = jax.random.randint(kp, (B, L), 0, cfg["n_src_vocab"][0], dtype=jnp.int32)
    src_dur = jax.random.randint(kd, (B, L), 0, cfg["n_src_vocab"][1], dtype=jnp.int32)
    src_rest = jax.random.randint(kr, (B, L), 0, cfg["n_src_vocab"][2], dtype=jnp.int32)
    trg_seq = jax.random.randint(kt, (B, L), 0, cfg["n_trg_vocab"][0], dtype=jnp.int32)
    noise = jax.random.normal(kn, (B, L, cfg["d_model"]), jnp.float32)

    params = init_params(kw, cfg)

    @jax.jit
    def run(params, src_pitch, src_dur, src_rest, trg_seq, noise):
        return transformer_forward(params, src_pitch, src_dur, src_rest,
                                   trg_seq, noise, cfg)

    logit_syll, logit_word = run(params, src_pitch, src_dur, src_rest, trg_seq, noise)
    jax.block_until_ready((logit_syll, logit_word))

    assert logit_syll.shape == (B, L, cfg["n_trg_vocab"][0])
    assert logit_word.shape == (B, L, cfg["n_trg_vocab"][1])
    assert jnp.all(jnp.isfinite(logit_syll)) and jnp.all(jnp.isfinite(logit_word))
    print("KERNEL_OK")
</pallas_src>

<mosaic_0001>
module attributes {stable_mosaic.version = 11 : i64} {
  func.func @_fused_forward_kernel(%arg0: i32, %arg1: memref<16x32xf32, #tpu.memory_space<vmem>>, %arg2: memref<16x32xf32, #tpu.memory_space<vmem>>, %arg3: memref<2x1x8xf32, #tpu.memory_space<vmem>>, %arg4: memref<32x32xf32, #tpu.memory_space<vmem>>, %arg5: memref<1x32xf32, #tpu.memory_space<vmem>>, %arg6: memref<1x32xf32, #tpu.memory_space<vmem>>, %arg7: memref<1x32xf32, #tpu.memory_space<vmem>>, %arg8: memref<32x32xf32, #tpu.memory_space<vmem>>, %arg9: memref<1x32xf32, #tpu.memory_space<vmem>>, %arg10: memref<4x32x96xf32, #tpu.memory_space<vmem>>, %arg11: memref<4x32x32xf32, #tpu.memory_space<vmem>>, %arg12: memref<4x1x32xf32, #tpu.memory_space<vmem>>, %arg13: memref<4x1x32xf32, #tpu.memory_space<vmem>>, %arg14: memref<4x32x64xf32, #tpu.memory_space<vmem>>, %arg15: memref<4x1x64xf32, #tpu.memory_space<vmem>>, %arg16: memref<4x64x32xf32, #tpu.memory_space<vmem>>, %arg17: memref<4x1x32xf32, #tpu.memory_space<vmem>>, %arg18: memref<4x1x32xf32, #tpu.memory_space<vmem>>, %arg19: memref<4x1x32xf32, #tpu.memory_space<vmem>>, %arg20: memref<32x128xf32, #tpu.memory_space<vmem>>, %arg21: memref<16x128xf32, #tpu.memory_space<vmem>>) attributes {dimension_semantics = [#tpu.dimension_semantics<arbitrary>], iteration_bounds = array<i64: 1>, scalar_prefetch = 0 : i64, scratch_operands = 0 : i64, tpu.core_type = #tpu.core_type<tc>, window_params = [{pipeline_mode = #tpu.pipeline_mode<synchronous>, transform_indices = @transform_0, window_bounds = array<i64: 16, 32>}, {pipeline_mode = #tpu.pipeline_mode<synchronous>, transform_indices = @transform_1, window_bounds = array<i64: 16, 32>}, {pipeline_mode = #tpu.pipeline_mode<synchronous>, transform_indices = @transform_2, window_bounds = array<i64: 2, 1, 8>}, {pipeline_mode = #tpu.pipeline_mode<synchronous>, transform_indices = @transform_3, window_bounds = array<i64: 32, 32>}, {pipeline_mode = #tpu.pipeline_mode<synchronous>, transform_indices = @transform_4, window_bounds = array<i64: 1, 32>}, {pipeline_mode = #tpu.pipeline_mode<synchronous>, transform_indices = @transform_5, window_bounds = array<i64: 1, 32>}, {pipeline_mode = #tpu.pipeline_mode<synchronous>, transform_indices = @transform_6, window_bounds = array<i64: 1, 32>}, {pipeline_mode = #tpu.pipeline_mode<synchronous>, transform_indices = @transform_7, window_bounds = array<i64: 32, 32>}, {pipeline_mode = #tpu.pipeline_mode<synchronous>, transform_indices = @transform_8, window_bounds = array<i64: 1, 32>}, {pipeline_mode = #tpu.pipeline_mode<synchronous>, transform_indices = @transform_9, window_bounds = array<i64: 4, 32, 96>}, {pipeline_mode = #tpu.pipeline_mode<synchronous>, transform_indices = @transform_10, window_bounds = array<i64: 4, 32, 32>}, {pipeline_mode = #tpu.pipeline_mode<synchronous>, transform_indices = @transform_11, window_bounds = array<i64: 4, 1, 32>}, {pipeline_mode = #tpu.pipeline_mode<synchronous>, transform_indices = @transform_12, window_bounds = array<i64: 4, 1, 32>}, {pipeline_mode = #tpu.pipeline_mode<synchronous>, transform_indices = @transform_13, window_bounds = array<i64: 4, 32, 64>}, {pipeline_mode = #tpu.pipeline_mode<synchronous>, transform_indices = @transform_14, window_bounds = array<i64: 4, 1, 64>}, {pipeline_mode = #tpu.pipeline_mode<synchronous>, transform_indices = @transform_15, window_bounds = array<i64: 4, 64, 32>}, {pipeline_mode = #tpu.pipeline_mode<synchronous>, transform_indices = @transform_16, window_bounds = array<i64: 4, 1, 32>}, {pipeline_mode = #tpu.pipeline_mode<synchronous>, transform_indices = @transform_17, window_bounds = array<i64: 4, 1, 32>}, {pipeline_mode = #tpu.pipeline_mode<synchronous>, transform_indices = @transform_18, window_bounds = array<i64: 4, 1, 32>}, {pipeline_mode = #tpu.pipeline_mode<synchronous>, transform_indices = @transform_19, window_bounds = array<i64: 32, 128>}, {pipeline_mode = #tpu.pipeline_mode<synchronous>, transform_indices = @transform_20, window_bounds = array<i64: 16, 128>}]} {
    %c0 = arith.constant 0 : index
    %c0_0 = arith.constant 0 : index
    %0 = vector.load %arg1[%c0, %c0_0] : memref<16x32xf32, #tpu.memory_space<vmem>>, vector<16x32xf32>
    %c0_1 = arith.constant 0 : index
    %c0_2 = arith.constant 0 : index
    %1 = vector.load %arg4[%c0_1, %c0_2] : memref<32x32xf32, #tpu.memory_space<vmem>>, vector<32x32xf32>
    %cst = arith.constant dense<0.000000e+00> : vector<16x32xf32>
    %2 = tpu.matmul %0, %1, %cst {dimension_numbers = #tpu.dot_dimension_numbers<[1], [0], [0], [1], [0, 0, 1, 1], [], []>} : vector<16x32xf32>, vector<32x32xf32>, vector<16x32xf32> -> vector<16x32xf32>
    %c0_3 = arith.constant 0 : index
    %c0_4 = arith.constant 0 : index
    %3 = vector.load %arg5[%c0_3, %c0_4] : memref<1x32xf32, #tpu.memory_space<vmem>>, vector<1x32xf32>
    %4 = vector.broadcast %3 : vector<1x32xf32> to vector<16x32xf32>
    %5 = arith.addf %2, %4 : vector<16x32xf32>
    %c0_5 = arith.constant 0 : index
    %c0_6 = arith.constant 0 : index
    %6 = vector.load %arg6[%c0_5, %c0_6] : memref<1x32xf32, #tpu.memory_space<vmem>>, vector<1x32xf32>
    %c0_7 = arith.constant 0 : index
    %c0_8 = arith.constant 0 : index
    %7 = vector.load %arg7[%c0_7, %c0_8] : memref<1x32xf32, #tpu.memory_space<vmem>>, vector<1x32xf32>
    %cst_9 = arith.constant dense<0.000000e+00> : vector<16xf32>
    %8 = vector.multi_reduction <add>, %5, %cst_9 [1] : vector<16x32xf32> to vector<16xf32>
    %9 = vector.shape_cast %8 : vector<16xf32> to vector<16x1xf32>
    %cst_10 = arith.constant 3.200000e+01 : f32
    %10 = vector.broadcast %cst_10 : f32 to vector<16x1xf32>
    %11 = arith.divf %9, %10 : vector<16x1xf32>
    %12 = vector.broadcast %11 : vector<16x1xf32> to vector<16x32xf32>
    %13 = arith.subf %5, %12 : vector<16x32xf32>
    %14 = arith.mulf %13, %13 : vector<16x32xf32>
    %cst_11 = arith.constant dense<0.000000e+00> : vector<16xf32>
    %15 = vector.multi_reduction <add>, %14, %cst_11 [1] : vector<16x32xf32> to vector<16xf32>
    %16 = vector.shape_cast %15 : vector<16xf32> to vector<16x1xf32>
    %cst_12 = arith.constant 3.200000e+01 : f32
    %17 = vector.broadcast %cst_12 : f32 to vector<16x1xf32>
    %18 = arith.divf %16, %17 : vector<16x1xf32>
    %19 = vector.broadcast %11 : vector<16x1xf32> to vector<16x32xf32>
    %20 = arith.subf %5, %19 : vector<16x32xf32>
    %cst_13 = arith.constant 9.99999997E-7 : f32
    %21 = vector.broadcast %cst_13 : f32 to vector<16x1xf32>
    %22 = arith.addf %18, %21 : vector<16x1xf32>
    %23 = math.rsqrt %22 : vector<16x1xf32>
    %24 = vector.broadcast %23 : vector<16x1xf32> to vector<16x32xf32>
    %25 = arith.mulf %20, %24 : vector<16x32xf32>
    %26 = vector.broadcast %6 : vector<1x32xf32> to vector<16x32xf32>
    %27 = arith.mulf %25, %26 : vector<16x32xf32>
    %28 = vector.broadcast %7 : vector<1x32xf32> to vector<16x32xf32>
    %29 = arith.addf %27, %28 : vector<16x32xf32>
    %c0_14 = arith.constant 0 : index
    %c0_15 = arith.constant 0 : index
    %c0_16 = arith.constant 0 : index
    %30 = vector.load %arg10[%c0_14, %c0_15, %c0_16] : memref<4x32x96xf32, #tpu.memory_space<vmem>>, vector<1x32x96xf32>
    %31 = vector.shape_cast %30 : vector<1x32x96xf32> to vector<32x96xf32>
    %cst_17 = arith.constant dense<0.000000e+00> : vector<16x96xf32>
    %32 = tpu.matmul %29, %31, %cst_17 {dimension_numbers = #tpu.dot_dimension_numbers<[1], [0], [0], [1], [0, 0, 1, 1], [], []>} : vector<16x32xf32>, vector<32x96xf32>, vector<16x96xf32> -> vector<16x96xf32>
    %33 = vector.extract_strided_slice %32 {offsets = [0, 0], sizes = [8, 96], strides = [1, 1]} : vector<16x96xf32> to vector<8x96xf32>
    %c0_18 = arith.constant 0 : index
    %c0_19 = arith.constant 0 : index
    %c0_20 = arith.constant 0 : index
    %34 = vector.load %arg3[%c0_18, %c0_19, %c0_20] : memref<2x1x8xf32, #tpu.memory_space<vmem>>, vector<1x1x8xf32>
    %35 = vector.shape_cast %34 : vector<1x1x8xf32> to vector<1x8xf32>
    %36 = vector.extract_strided_slice %33 {offsets = [0, 0], sizes = [8, 8], strides = [1, 1]} : vector<8x96xf32> to vector<8x8xf32>
    %cst_21 = arith.constant 0.353553385 : f32
    %37 = vector.broadcast %cst_21 : f32 to vector<8x8xf32>
    %38 = arith.mulf %36, %37 : vector<8x8xf32>
    %39 = vector.extract_strided_slice %33 {offsets = [0, 32], sizes = [8, 8], strides = [1, 1]} : vector<8x96xf32> to vector<8x8xf32>
    %40 = vector.extract_strided_slice %33 {offsets = [0, 64], sizes = [8, 8], strides = [1, 1]} : vector<8x96xf32> to vector<8x8xf32>
    %cst_22 = arith.constant dense<0.000000e+00> : vector<8x8xf32>
    %41 = tpu.matmul %38, %39, %cst_22 {dimension_numbers = #tpu.dot_dimension_numbers<[1], [1], [0], [0], [0, 0, 1, 0], [], []>} : vector<8x8xf32>, vector<8x8xf32>, vector<8x8xf32> -> vector<8x8xf32>
    %cst_23 = arith.constant 0.000000e+00 : f32
    %42 = vector.broadcast %cst_23 : f32 to vector<1x8xf32>
    %43 = arith.cmpf ogt, %35, %42 : vector<1x8xf32>
    %cst_24 = arith.constant -1.000000e+09 : f32
    %44 = vector.shape_cast %43 : vector<1x8xi1> to vector<1x8xi1>
    %45 = vector.broadcast %44 : vector<1x8xi1> to vector<8x8xi1>
    %46 = vector.broadcast %cst_24 : f32 to vector<8x8xf32>
    %47 = arith.select %45, %41, %46 : vector<8x8xi1>, vector<8x8xf32>
    %cst_25 = arith.constant dense<0xFF800000> : vector<8xf32>
    %48 = vector.multi_reduction <maximumf>, %47, %cst_25 [1] : vector<8x8xf32> to vector<8xf32>
    %49 = vector.shape_cast %48 : vector<8xf32> to vector<8x1xf32>
    %50 = vector.broadcast %49 : vector<8x1xf32> to vector<8x8xf32>
    %51 = arith.subf %47, %50 : vector<8x8xf32>
    %52 = math.exp %51 : vector<8x8xf32>
    %cst_26 = arith.constant dense<0.000000e+00> : vector<8xf32>
    %53 = vector.multi_reduction <add>, %52, %cst_26 [1] : vector<8x8xf32> to vector<8xf32>
    %54 = vector.shape_cast %53 : vector<8xf32> to vector<8x1xf32>
    %55 = tpu.reciprocal %54 {approx = true} : vector<8x1xf32> -> vector<8x1xf32>
    %56 = vector.broadcast %55 : vector<8x1xf32> to vector<8x8xf32>
    %57 = arith.mulf %52, %56 : vector<8x8xf32>
    %cst_27 = arith.constant dense<0.000000e+00> : vector<8x8xf32>
    %58 = tpu.matmul %57, %40, %cst_27 {dimension_numbers = #tpu.dot_dimension_numbers<[1], [0], [0], [1], [0, 0, 1, 1], [], []>} : vector<8x8xf32>, vector<8x8xf32>, vector<8x8xf32> -> vector<8x8xf32>
    %59 = vector.extract_strided_slice %33 {offsets = [0, 8], sizes = [8, 8], strides = [1, 1]} : vector<8x96xf32> to vector<8x8xf32>
    %cst_28 = arith.constant 0.353553385 : f32
    %60 = vector.broadcast %cst_28 : f32 to vector<8x8xf32>
    %61 = arith.mulf %59, %60 : vector<8x8xf32>
    %62 = vector.extract_strided_slice %33 {offsets = [0, 40], sizes = [8, 8], strides = [1, 1]} : vector<8x96xf32> to vector<8x8xf32>
    %63 = vector.extract_strided_slice %33 {offsets = [0, 72], sizes = [8, 8], strides = [1, 1]} : vector<8x96xf32> to vector<8x8xf32>
    %cst_29 = arith.constant dense<0.000000e+00> : vector<8x8xf32>
    %64 = tpu.matmul %61, %62, %cst_29 {dimension_numbers = #tpu.dot_dimension_numbers<[1], [1], [0], [0], [0, 0, 1, 0], [], []>} : vector<8x8xf32>, vector<8x8xf32>, vector<8x8xf32> -> vector<8x8xf32>
    %cst_30 = arith.constant 0.000000e+00 : f32
    %65 = vector.broadcast %cst_30 : f32 to vector<1x8xf32>
    %66 = arith.cmpf ogt, %35, %65 : vector<1x8xf32>
    %cst_31 = arith.constant -1.000000e+09 : f32
    %67 = vector.shape_cast %66 : vector<1x8xi1> to vector<1x8xi1>
    %68 = vector.broadcast %67 : vector<1x8xi1> to vector<8x8xi1>
    %69 = vector.broadcast %cst_31 : f32 to vector<8x8xf32>
    %70 = arith.select %68, %64, %69 : vector<8x8xi1>, vector<8x8xf32>
    %cst_32 = arith.constant dense<0xFF800000> : vector<8xf32>
    %71 = vector.multi_reduction <maximumf>, %70, %cst_32 [1] : vector<8x8xf32> to vector<8xf32>
    %72 = vector.shape_cast %71 : vector<8xf32> to vector<8x1xf32>
    %73 = vector.broadcast %72 : vector<8x1xf32> to vector<8x8xf32>
    %74 = arith.subf %70, %73 : vector<8x8xf32>
    %75 = math.exp %74 : vector<8x8xf32>
    %cst_33 = arith.constant dense<0.000000e+00> : vector<8xf32>
    %76 = vector.multi_reduction <add>, %75, %cst_33 [1] : vector<8x8xf32> to vector<8xf32>
    %77 = vector.shape_cast %76 : vector<8xf32> to vector<8x1xf32>
    %78 = tpu.reciprocal %77 {approx = true} : vector<8x1xf32> -> vector<8x1xf32>
    %79 = vector.broadcast %78 : vector<8x1xf32> to vector<8x8xf32>
    %80 = arith.mulf %75, %79 : vector<8x8xf32>
    %cst_34 = arith.constant dense<0.000000e+00> : vector<8x8xf32>
    %81 = tpu.matmul %80, %63, %cst_34 {dimension_numbers = #tpu.dot_dimension_numbers<[1], [0], [0], [1], [0, 0, 1, 1], [], []>} : vector<8x8xf32>, vector<8x8xf32>, vector<8x8xf32> -> vector<8x8xf32>
    %82 = vector.extract_strided_slice %33 {offsets = [0, 16], sizes = [8, 8], strides = [1, 1]} : vector<8x96xf32> to vector<8x8xf32>
    %cst_35 = arith.constant 0.353553385 : f32
    %83 = vector.broadcast %cst_35 : f32 to vector<8x8xf32>
    %84 = arith.mulf %82, %83 : vector<8x8xf32>
    %85 = vector.extract_strided_slice %33 {offsets = [0, 48], sizes = [8, 8], strides = [1, 1]} : vector<8x96xf32> to vector<8x8xf32>
    %86 = vector.extract_strided_slice %33 {offsets = [0, 80], sizes = [8, 8], strides = [1, 1]} : vector<8x96xf32> to vector<8x8xf32>
    %cst_36 = arith.constant dense<0.000000e+00> : vector<8x8xf32>
    %87 = tpu.matmul %84, %85, %cst_36 {dimension_numbers = #tpu.dot_dimension_numbers<[1], [1], [0], [0], [0, 0, 1, 0], [], []>} : vector<8x8xf32>, vector<8x8xf32>, vector<8x8xf32> -> vector<8x8xf32>
    %cst_37 = arith.constant 0.000000e+00 : f32
    %88 = vector.broadcast %cst_37 : f32 to vector<1x8xf32>
    %89 = arith.cmpf ogt, %35, %88 : vector<1x8xf32>
    %cst_38 = arith.constant -1.000000e+09 : f32
    %90 = vector.shape_cast %89 : vector<1x8xi1> to vector<1x8xi1>
    %91 = vector.broadcast %90 : vector<1x8xi1> to vector<8x8xi1>
    %92 = vector.broadcast %cst_38 : f32 to vector<8x8xf32>
    %93 = arith.select %91, %87, %92 : vector<8x8xi1>, vector<8x8xf32>
    %cst_39 = arith.constant dense<0xFF800000> : vector<8xf32>
    %94 = vector.multi_reduction <maximumf>, %93, %cst_39 [1] : vector<8x8xf32> to vector<8xf32>
    %95 = vector.shape_cast %94 : vector<8xf32> to vector<8x1xf32>
    %96 = vector.broadcast %95 : vector<8x1xf32> to vector<8x8xf32>
    %97 = arith.subf %93, %96 : vector<8x8xf32>
    %98 = math.exp %97 : vector<8x8xf32>
    %cst_40 = arith.constant dense<0.000000e+00> : vector<8xf32>
    %99 = vector.multi_reduction <add>, %98, %cst_40 [1] : vector<8x8xf32> to vector<8xf32>
    %100 = vector.shape_cast %99 : vector<8xf32> to vector<8x1xf32>
    %101 = tpu.reciprocal %100 {approx = true} : vector<8x1xf32> -> vector<8x1xf32>
    %102 = vector.broadcast %101 : vector<8x1xf32> to vector<8x8xf32>
    %103 = arith.mulf %98, %102 : vector<8x8xf32>
    %cst_41 = arith.constant dense<0.000000e+00> : vector<8x8xf32>
    %104 = tpu.matmul %103, %86, %cst_41 {dimension_numbers = #tpu.dot_dimension_numbers<[1], [0], [0], [1], [0, 0, 1, 1], [], []>} : vector<8x8xf32>, vector<8x8xf32>, vector<8x8xf32> -> vector<8x8xf32>
    %105 = vector.extract_strided_slice %33 {offsets = [0, 24], sizes = [8, 8], strides = [1, 1]} : vector<8x96xf32> to vector<8x8xf32>
    %cst_42 = arith.constant 0.353553385 : f32
    %106 = vector.broadcast %cst_42 : f32 to vector<8x8xf32>
    %107 = arith.mulf %105, %106 : vector<8x8xf32>
    %108 = vector.extract_strided_slice %33 {offsets = [0, 56], sizes = [8, 8], strides = [1, 1]} : vector<8x96xf32> to vector<8x8xf32>
    %109 = vector.extract_strided_slice %33 {offsets = [0, 88], sizes = [8, 8], strides = [1, 1]} : vector<8x96xf32> to vector<8x8xf32>
    %cst_43 = arith.constant dense<0.000000e+00> : vector<8x8xf32>
    %110 = tpu.matmul %107, %108, %cst_43 {dimension_numbers = #tpu.dot_dimension_numbers<[1], [1], [0], [0], [0, 0, 1, 0], [], []>} : vector<8x8xf32>, vector<8x8xf32>, vector<8x8xf32> -> vector<8x8xf32>
    %cst_44 = arith.constant 0.000000e+00 : f32
    %111 = vector.broadcast %cst_44 : f32 to vector<1x8xf32>
    %112 = arith.cmpf ogt, %35, %111 : vector<1x8xf32>
    %cst_45 = arith.constant -1.000000e+09 : f32
    %113 = vector.shape_cast %112 : vector<1x8xi1> to vector<1x8xi1>
    %114 = vector.broadcast %113 : vector<1x8xi1> to vector<8x8xi1>
    %115 = vector.broadcast %cst_45 : f32 to vector<8x8xf32>
    %116 = arith.select %114, %110, %115 : vector<8x8xi1>, vector<8x8xf32>
    %cst_46 = arith.constant dense<0xFF800000> : vector<8xf32>
    %117 = vector.multi_reduction <maximumf>, %116, %cst_46 [1] : vector<8x8xf32> to vector<8xf32>
    %118 = vector.shape_cast %117 : vector<8xf32> to vector<8x1xf32>
    %119 = vector.broadcast %118 : vector<8x1xf32> to vector<8x8xf32>
    %120 = arith.subf %116, %119 : vector<8x8xf32>
    %121 = math.exp %120 : vector<8x8xf32>
    %cst_47 = arith.constant dense<0.000000e+00> : vector<8xf32>
    %122 = vector.multi_reduction <add>, %121, %cst_47 [1] : vector<8x8xf32> to vector<8xf32>
    %123 = vector.shape_cast %122 : vector<8xf32> to vector<8x1xf32>
    %124 = tpu.reciprocal %123 {approx = true} : vector<8x1xf32> -> vector<8x1xf32>
    %125 = vector.broadcast %124 : vector<8x1xf32> to vector<8x8xf32>
    %126 = arith.mulf %121, %125 : vector<8x8xf32>
    %cst_48 = arith.constant dense<0.000000e+00> : vector<8x8xf32>
    %127 = tpu.matmul %126, %109, %cst_48 {dimension_numbers = #tpu.dot_dimension_numbers<[1], [0], [0], [1], [0, 0, 1, 1], [], []>} : vector<8x8xf32>, vector<8x8xf32>, vector<8x8xf32> -> vector<8x8xf32>
    %128 = tpu.concatenate %58, %81, %104, %127 in 1 : vector<8x8xf32>, vector<8x8xf32>, vector<8x8xf32>, vector<8x8xf32> -> vector<8x32xf32>
    %129 = vector.extract_strided_slice %32 {offsets = [8, 0], sizes = [8, 96], strides = [1, 1]} : vector<16x96xf32> to vector<8x96xf32>
    %c1 = arith.constant 1 : index
    %c0_49 = arith.constant 0 : index
    %c0_50 = arith.constant 0 : index
    %130 = vector.load %arg3[%c1, %c0_49, %c0_50] : memref<2x1x8xf32, #tpu.memory_space<vmem>>, vector<1x1x8xf32>
    %131 = vector.shape_cast %130 : vector<1x1x8xf32> to vector<1x8xf32>
    %132 = vector.extract_strided_slice %129 {offsets = [0, 0], sizes = [8, 8], strides = [1, 1]} : vector<8x96xf32> to vector<8x8xf32>
    %cst_51 = arith.constant 0.353553385 : f32
    %133 = vector.broadcast %cst_51 : f32 to vector<8x8xf32>
    %134 = arith.mulf %132, %133 : vector<8x8xf32>
    %135 = vector.extract_strided_slice %129 {offsets = [0, 32], sizes = [8, 8], strides = [1, 1]} : vector<8x96xf32> to vector<8x8xf32>
    %136 = vector.extract_strided_slice %129 {offsets = [0, 64], sizes = [8, 8], strides = [1, 1]} : vector<8x96xf32> to vector<8x8xf32>
    %cst_52 = arith.constant dense<0.000000e+00> : vector<8x8xf32>
    %137 = tpu.matmul %134, %135, %cst_52 {dimension_numbers = #tpu.dot_dimension_numbers<[1], [1], [0], [0], [0, 0, 1, 0], [], []>} : vector<8x8xf32>, vector<8x8xf32>, vector<8x8xf32> -> vector<8x8xf32>
    %cst_53 = arith.constant 0.000000e+00 : f32
    %138 = vector.broadcast %cst_53 : f32 to vector<1x8xf32>
    %139 = arith.cmpf ogt, %131, %138 : vector<1x8xf32>
    %cst_54 = arith.constant -1.000000e+09 : f32
    %140 = vector.shape_cast %139 : vector<1x8xi1> to vector<1x8xi1>
    %141 = vector.broadcast %140 : vector<1x8xi1> to vector<8x8xi1>
    %142 = vector.broadcast %cst_54 : f32 to vector<8x8xf32>
    %143 = arith.select %141, %137, %142 : vector<8x8xi1>, vector<8x8xf32>
    %cst_55 = arith.constant dense<0xFF800000> : vector<8xf32>
    %144 = vector.multi_reduction <maximumf>, %143, %cst_55 [1] : vector<8x8xf32> to vector<8xf32>
    %145 = vector.shape_cast %144 : vector<8xf32> to vector<8x1xf32>
    %146 = vector.broadcast %145 : vector<8x1xf32> to vector<8x8xf32>
    %147 = arith.subf %143, %146 : vector<8x8xf32>
    %148 = math.exp %147 : vector<8x8xf32>
    %cst_56 = arith.constant dense<0.000000e+00> : vector<8xf32>
    %149 = vector.multi_reduction <add>, %148, %cst_56 [1] : vector<8x8xf32> to vector<8xf32>
    %150 = vector.shape_cast %149 : vector<8xf32> to vector<8x1xf32>
    %151 = tpu.reciprocal %150 {approx = true} : vector<8x1xf32> -> vector<8x1xf32>
    %152 = vector.broadcast %151 : vector<8x1xf32> to vector<8x8xf32>
    %153 = arith.mulf %148, %152 : vector<8x8xf32>
    %cst_57 = arith.constant dense<0.000000e+00> : vector<8x8xf32>
    %154 = tpu.matmul %153, %136, %cst_57 {dimension_numbers = #tpu.dot_dimension_numbers<[1], [0], [0], [1], [0, 0, 1, 1], [], []>} : vector<8x8xf32>, vector<8x8xf32>, vector<8x8xf32> -> vector<8x8xf32>
    %155 = vector.extract_strided_slice %129 {offsets = [0, 8], sizes = [8, 8], strides = [1, 1]} : vector<8x96xf32> to vector<8x8xf32>
    %cst_58 = arith.constant 0.353553385 : f32
    %156 = vector.broadcast %cst_58 : f32 to vector<8x8xf32>
    %157 = arith.mulf %155, %156 : vector<8x8xf32>
    %158 = vector.extract_strided_slice %129 {offsets = [0, 40], sizes = [8, 8], strides = [1, 1]} : vector<8x96xf32> to vector<8x8xf32>
    %159 = vector.extract_strided_slice %129 {offsets = [0, 72], sizes = [8, 8], strides = [1, 1]} : vector<8x96xf32> to vector<8x8xf32>
    %cst_59 = arith.constant dense<0.000000e+00> : vector<8x8xf32>
    %160 = tpu.matmul %157, %158, %cst_59 {dimension_numbers = #tpu.dot_dimension_numbers<[1], [1], [0], [0], [0, 0, 1, 0], [], []>} : vector<8x8xf32>, vector<8x8xf32>, vector<8x8xf32> -> vector<8x8xf32>
    %cst_60 = arith.constant 0.000000e+00 : f32
    %161 = vector.broadcast %cst_60 : f32 to vector<1x8xf32>
    %162 = arith.cmpf ogt, %131, %161 : vector<1x8xf32>
    %cst_61 = arith.constant -1.000000e+09 : f32
    %163 = vector.shape_cast %162 : vector<1x8xi1> to vector<1x8xi1>
    %164 = vector.broadcast %163 : vector<1x8xi1> to vector<8x8xi1>
    %165 = vector.broadcast %cst_61 : f32 to vector<8x8xf32>
    %166 = arith.select %164, %160, %165 : vector<8x8xi1>, vector<8x8xf32>
    %cst_62 = arith.constant dense<0xFF800000> : vector<8xf32>
    %167 = vector.multi_reduction <maximumf>, %166, %cst_62 [1] : vector<8x8xf32> to vector<8xf32>
    %168 = vector.shape_cast %167 : vector<8xf32> to vector<8x1xf32>
    %169 = vector.broadcast %168 : vector<8x1xf32> to vector<8x8xf32>
    %170 = arith.subf %166, %169 : vector<8x8xf32>
    %171 = math.exp %170 : vector<8x8xf32>
    %cst_63 = arith.constant dense<0.000000e+00> : vector<8xf32>
    %172 = vector.multi_reduction <add>, %171, %cst_63 [1] : vector<8x8xf32> to vector<8xf32>
    %173 = vector.shape_cast %172 : vector<8xf32> to vector<8x1xf32>
    %174 = tpu.reciprocal %173 {approx = true} : vector<8x1xf32> -> vector<8x1xf32>
    %175 = vector.broadcast %174 : vector<8x1xf32> to vector<8x8xf32>
    %176 = arith.mulf %171, %175 : vector<8x8xf32>
    %cst_64 = arith.constant dense<0.000000e+00> : vector<8x8xf32>
    %177 = tpu.matmul %176, %159, %cst_64 {dimension_numbers = #tpu.dot_dimension_numbers<[1], [0], [0], [1], [0, 0, 1, 1], [], []>} : vector<8x8xf32>, vector<8x8xf32>, vector<8x8xf32> -> vector<8x8xf32>
    %178 = vector.extract_strided_slice %129 {offsets = [0, 16], sizes = [8, 8], strides = [1, 1]} : vector<8x96xf32> to vector<8x8xf32>
    %cst_65 = arith.constant 0.353553385 : f32
    %179 = vector.broadcast %cst_65 : f32 to vector<8x8xf32>
    %180 = arith.mulf %178, %179 : vector<8x8xf32>
    %181 = vector.extract_strided_slice %129 {offsets = [0, 48], sizes = [8, 8], strides = [1, 1]} : vector<8x96xf32> to vector<8x8xf32>
    %182 = vector.extract_strided_slice %129 {offsets = [0, 80], sizes = [8, 8], strides = [1, 1]} : vector<8x96xf32> to vector<8x8xf32>
    %cst_66 = arith.constant dense<0.000000e+00> : vector<8x8xf32>
    %183 = tpu.matmul %180, %181, %cst_66 {dimension_numbers = #tpu.dot_dimension_numbers<[1], [1], [0], [0], [0, 0, 1, 0], [], []>} : vector<8x8xf32>, vector<8x8xf32>, vector<8x8xf32> -> vector<8x8xf32>
    %cst_67 = arith.constant 0.000000e+00 : f32
    %184 = vector.broadcast %cst_67 : f32 to vector<1x8xf32>
    %185 = arith.cmpf ogt, %131, %184 : vector<1x8xf32>
    %cst_68 = arith.constant -1.000000e+09 : f32
    %186 = vector.shape_cast %185 : vector<1x8xi1> to vector<1x8xi1>
    %187 = vector.broadcast %186 : vector<1x8xi1> to vector<8x8xi1>
    %188 = vector.broadcast %cst_68 : f32 to vector<8x8xf32>
    %189 = arith.select %187, %183, %188 : vector<8x8xi1>, vector<8x8xf32>
    %cst_69 = arith.constant dense<0xFF800000> : vector<8xf32>
    %190 = vector.multi_reduction <maximumf>, %189, %cst_69 [1] : vector<8x8xf32> to vector<8xf32>
    %191 = vector.shape_cast %190 : vector<8xf32> to vector<8x1xf32>
    %192 = vector.broadcast %191 : vector<8x1xf32> to vector<8x8xf32>
    %193 = arith.subf %189, %192 : vector<8x8xf32>
    %194 = math.exp %193 : vector<8x8xf32>
    %cst_70 = arith.constant dense<0.000000e+00> : vector<8xf32>
    %195 = vector.multi_reduction <add>, %194, %cst_70 [1] : vector<8x8xf32> to vector<8xf32>
    %196 = vector.shape_cast %195 : vector<8xf32> to vector<8x1xf32>
    %197 = tpu.reciprocal %196 {approx = true} : vector<8x1xf32> -> vector<8x1xf32>
    %198 = vector.broadcast %197 : vector<8x1xf32> to vector<8x8xf32>
    %199 = arith.mulf %194, %198 : vector<8x8xf32>
    %cst_71 = arith.constant dense<0.000000e+00> : vector<8x8xf32>
    %200 = tpu.matmul %199, %182, %cst_71 {dimension_numbers = #tpu.dot_dimension_numbers<[1], [0], [0], [1], [0, 0, 1, 1], [], []>} : vector<8x8xf32>, vector<8x8xf32>, vector<8x8xf32> -> vector<8x8xf32>
    %201 = vector.extract_strided_slice %129 {offsets = [0, 24], sizes = [8, 8], strides = [1, 1]} : vector<8x96xf32> to vector<8x8xf32>
    %cst_72 = arith.constant 0.353553385 : f32
    %202 = vector.broadcast %cst_72 : f32 to vector<8x8xf32>
    %203 = arith.mulf %201, %202 : vector<8x8xf32>
    %204 = vector.extract_strided_slice %129 {offsets = [0, 56], sizes = [8, 8], strides = [1, 1]} : vector<8x96xf32> to vector<8x8xf32>
    %205 = vector.extract_strided_slice %129 {offsets = [0, 88], sizes = [8, 8], strides = [1, 1]} : vector<8x96xf32> to vector<8x8xf32>
    %cst_73 = arith.constant dense<0.000000e+00> : vector<8x8xf32>
    %206 = tpu.matmul %203, %204, %cst_73 {dimension_numbers = #tpu.dot_dimension_numbers<[1], [1], [0], [0], [0, 0, 1, 0], [], []>} : vector<8x8xf32>, vector<8x8xf32>, vector<8x8xf32> -> vector<8x8xf32>
    %cst_74 = arith.constant 0.000000e+00 : f32
    %207 = vector.broadcast %cst_74 : f32 to vector<1x8xf32>
    %208 = arith.cmpf ogt, %131, %207 : vector<1x8xf32>
    %cst_75 = arith.constant -1.000000e+09 : f32
    %209 = vector.shape_cast %208 : vector<1x8xi1> to vector<1x8xi1>
    %210 = vector.broadcast %209 : vector<1x8xi1> to vector<8x8xi1>
    %211 = vector.broadcast %cst_75 : f32 to vector<8x8xf32>
    %212 = arith.select %210, %206, %211 : vector<8x8xi1>, vector<8x8xf32>
    %cst_76 = arith.constant dense<0xFF800000> : vector<8xf32>
    %213 = vector.multi_reduction <maximumf>, %212, %cst_76 [1] : vector<8x8xf32> to vector<8xf32>
    %214 = vector.shape_cast %213 : vector<8xf32> to vector<8x1xf32>
    %215 = vector.broadcast %214 : vector<8x1xf32> to vector<8x8xf32>
    %216 = arith.subf %212, %215 : vector<8x8xf32>
    %217 = math.exp %216 : vector<8x8xf32>
    %cst_77 = arith.constant dense<0.000000e+00> : vector<8xf32>
    %218 = vector.multi_reduction <add>, %217, %cst_77 [1] : vector<8x8xf32> to vector<8xf32>
    %219 = vector.shape_cast %218 : vector<8xf32> to vector<8x1xf32>
    %220 = tpu.reciprocal %219 {approx = true} : vector<8x1xf32> -> vector<8x1xf32>
    %221 = vector.broadcast %220 : vector<8x1xf32> to vector<8x8xf32>
    %222 = arith.mulf %217, %221 : vector<8x8xf32>
    %cst_78 = arith.constant dense<0.000000e+00> : vector<8x8xf32>
    %223 = tpu.matmul %222, %205, %cst_78 {dimension_numbers = #tpu.dot_dimension_numbers<[1], [0], [0], [1], [0, 0, 1, 1], [], []>} : vector<8x8xf32>, vector<8x8xf32>, vector<8x8xf32> -> vector<8x8xf32>
    %224 = tpu.concatenate %154, %177, %200, %223 in 1 : vector<8x8xf32>, vector<8x8xf32>, vector<8x8xf32>, vector<8x8xf32> -> vector<8x32xf32>
    %225 = tpu.concatenate %128, %224 in 0 : vector<8x32xf32>, vector<8x32xf32> -> vector<16x32xf32>
    %c0_79 = arith.constant 0 : index
    %c0_80 = arith.constant 0 : index
    %c0_81 = arith.constant 0 : index
    %226 = vector.load %arg11[%c0_79, %c0_80, %c0_81] : memref<4x32x32xf32, #tpu.memory_space<vmem>>, vector<1x32x32xf32>
    %227 = vector.shape_cast %226 : vector<1x32x32xf32> to vector<32x32xf32>
    %cst_82 = arith.constant dense<0.000000e+00> : vector<16x32xf32>
    %228 = tpu.matmul %225, %227, %cst_82 {dimension_numbers = #tpu.dot_dimension_numbers<[1], [0], [0], [1], [0, 0, 1, 1], [], []>} : vector<16x32xf32>, vector<32x32xf32>, vector<16x32xf32> -> vector<16x32xf32>
    %229 = arith.addf %228, %29 : vector<16x32xf32>
    %c0_83 = arith.constant 0 : index
    %c0_84 = arith.constant 0 : index
    %c0_85 = arith.constant 0 : index
    %230 = vector.load %arg12[%c0_83, %c0_84, %c0_85] : memref<4x1x32xf32, #tpu.memory_space<vmem>>, vector<1x1x32xf32>
    %231 = vector.shape_cast %230 : vector<1x1x32xf32> to vector<1x32xf32>
    %c0_86 = arith.constant 0 : index
    %c0_87 = arith.constant 0 : index
    %c0_88 = arith.constant 0 : index
    %232 = vector.load %arg13[%c0_86, %c0_87, %c0_88] : memref<4x1x32xf32, #tpu.memory_space<vmem>>, vector<1x1x32xf32>
    %233 = vector.shape_cast %232 : vector<1x1x32xf32> to vector<1x32xf32>
    %cst_89 = arith.constant dense<0.000000e+00> : vector<16xf32>
    %234 = vector.multi_reduction <add>, %229, %cst_89 [1] : vector<16x32xf32> to vector<16xf32>
    %235 = vector.shape_cast %234 : vector<16xf32> to vector<16x1xf32>
    %cst_90 = arith.constant 3.200000e+01 : f32
    %236 = vector.broadcast %cst_90 : f32 to vector<16x1xf32>
    %237 = arith.divf %235, %236 : vector<16x1xf32>
    %238 = vector.broadcast %237 : vector<16x1xf32> to vector<16x32xf32>
    %239 = arith.subf %229, %238 : vector<16x32xf32>
    %240 = arith.mulf %239, %239 : vector<16x32xf32>
    %cst_91 = arith.constant dense<0.000000e+00> : vector<16xf32>
    %241 = vector.multi_reduction <add>, %240, %cst_91 [1] : vector<16x32xf32> to vector<16xf32>
    %242 = vector.shape_cast %241 : vector<16xf32> to vector<16x1xf32>
    %cst_92 = arith.constant 3.200000e+01 : f32
    %243 = vector.broadcast %cst_92 : f32 to vector<16x1xf32>
    %244 = arith.divf %242, %243 : vector<16x1xf32>
    %245 = vector.broadcast %237 : vector<16x1xf32> to vector<16x32xf32>
    %246 = arith.subf %229, %245 : vector<16x32xf32>
    %cst_93 = arith.constant 9.99999997E-7 : f32
    %247 = vector.broadcast %cst_93 : f32 to vector<16x1xf32>
    %248 = arith.addf %244, %247 : vector<16x1xf32>
    %249 = math.rsqrt %248 : vector<16x1xf32>
    %250 = vector.broadcast %249 : vector<16x1xf32> to vector<16x32xf32>
    %251 = arith.mulf %246, %250 : vector<16x32xf32>
    %252 = vector.broadcast %231 : vector<1x32xf32> to vector<16x32xf32>
    %253 = arith.mulf %251, %252 : vector<16x32xf32>
    %254 = vector.broadcast %233 : vector<1x32xf32> to vector<16x32xf32>
    %255 = arith.addf %253, %254 : vector<16x32xf32>
    %c0_94 = arith.constant 0 : index
    %c0_95 = arith.constant 0 : index
    %c0_96 = arith.constant 0 : index
    %256 = vector.load %arg14[%c0_94, %c0_95, %c0_96] : memref<4x32x64xf32, #tpu.memory_space<vmem>>, vector<1x32x64xf32>
    %257 = vector.shape_cast %256 : vector<1x32x64xf32> to vector<32x64xf32>
    %cst_97 = arith.constant dense<0.000000e+00> : vector<16x64xf32>
    %258 = tpu.matmul %255, %257, %cst_97 {dimension_numbers = #tpu.dot_dimension_numbers<[1], [0], [0], [1], [0, 0, 1, 1], [], []>} : vector<16x32xf32>, vector<32x64xf32>, vector<16x64xf32> -> vector<16x64xf32>
    %c0_98 = arith.constant 0 : index
    %c0_99 = arith.constant 0 : index
    %c0_100 = arith.constant 0 : index
    %259 = vector.load %arg15[%c0_98, %c0_99, %c0_100] : memref<4x1x64xf32, #tpu.memory_space<vmem>>, vector<1x1x64xf32>
    %260 = vector.shape_cast %259 : vector<1x1x64xf32> to vector<1x64xf32>
    %261 = vector.broadcast %260 : vector<1x64xf32> to vector<16x64xf32>
    %262 = arith.addf %258, %261 : vector<16x64xf32>
    %cst_101 = arith.constant 0.000000e+00 : f32
    %263 = vector.broadcast %cst_101 : f32 to vector<16x64xf32>
    %264 = arith.maximumf %262, %263 : vector<16x64xf32>
    %c0_102 = arith.constant 0 : index
    %c0_103 = arith.constant 0 : index
    %c0_104 = arith.constant 0 : index
    %265 = vector.load %arg16[%c0_102, %c0_103, %c0_104] : memref<4x64x32xf32, #tpu.memory_space<vmem>>, vector<1x64x32xf32>
    %266 = vector.shape_cast %265 : vector<1x64x32xf32> to vector<64x32xf32>
    %cst_105 = arith.constant dense<0.000000e+00> : vector<16x32xf32>
    %267 = tpu.matmul %264, %266, %cst_105 {dimension_numbers = #tpu.dot_dimension_numbers<[1], [0], [0], [1], [0, 0, 1, 1], [], []>} : vector<16x64xf32>, vector<64x32xf32>, vector<16x32xf32> -> vector<16x32xf32>
    %c0_106 = arith.constant 0 : index
    %c0_107 = arith.constant 0 : index
    %c0_108 = arith.constant 0 : index
    %268 = vector.load %arg17[%c0_106, %c0_107, %c0_108] : memref<4x1x32xf32, #tpu.memory_space<vmem>>, vector<1x1x32xf32>
    %269 = vector.shape_cast %268 : vector<1x1x32xf32> to vector<1x32xf32>
    %270 = vector.broadcast %269 : vector<1x32xf32> to vector<16x32xf32>
    %271 = arith.addf %267, %270 : vector<16x32xf32>
    %272 = arith.addf %271, %255 : vector<16x32xf32>
    %c0_109 = arith.constant 0 : index
    %c0_110 = arith.constant 0 : index
    %c0_111 = arith.constant 0 : index
    %273 = vector.load %arg18[%c0_109, %c0_110, %c0_111] : memref<4x1x32xf32, #tpu.memory_space<vmem>>, vector<1x1x32xf32>
    %274 = vector.shape_cast %273 : vector<1x1x32xf32> to vector<1x32xf32>
    %c0_112 = arith.constant 0 : index
    %c0_113 = arith.constant 0 : index
    %c0_114 = arith.constant 0 : index
    %275 = vector.load %arg19[%c0_112, %c0_113, %c0_114] : memref<4x1x32xf32, #tpu.memory_space<vmem>>, vector<1x1x32xf32>
    %276 = vector.shape_cast %275 : vector<1x1x32xf32> to vector<1x32xf32>
    %cst_115 = arith.constant dense<0.000000e+00> : vector<16xf32>
    %277 = vector.multi_reduction <add>, %272, %cst_115 [1] : vector<16x32xf32> to vector<16xf32>
    %278 = vector.shape_cast %277 : vector<16xf32> to vector<16x1xf32>
    %cst_116 = arith.constant 3.200000e+01 : f32
    %279 = vector.broadcast %cst_116 : f32 to vector<16x1xf32>
    %280 = arith.divf %278, %279 : vector<16x1xf32>
    %281 = vector.broadcast %280 : vector<16x1xf32> to vector<16x32xf32>
    %282 = arith.subf %272, %281 : vector<16x32xf32>
    %283 = arith.mulf %282, %282 : vector<16x32xf32>
    %cst_117 = arith.constant dense<0.000000e+00> : vector<16xf32>
    %284 = vector.multi_reduction <add>, %283, %cst_117 [1] : vector<16x32xf32> to vector<16xf32>
    %285 = vector.shape_cast %284 : vector<16xf32> to vector<16x1xf32>
    %cst_118 = arith.constant 3.200000e+01 : f32
    %286 = vector.broadcast %cst_118 : f32 to vector<16x1xf32>
    %287 = arith.divf %285, %286 : vector<16x1xf32>
    %288 = vector.broadcast %280 : vector<16x1xf32> to vector<16x32xf32>
    %289 = arith.subf %272, %288 : vector<16x32xf32>
    %cst_119 = arith.constant 9.99999997E-7 : f32
    %290 = vector.broadcast %cst_119 : f32 to vector<16x1xf32>
    %291 = arith.addf %287, %290 : vector<16x1xf32>
    %292 = math.rsqrt %291 : vector<16x1xf32>
    %293 = vector.broadcast %292 : vector<16x1xf32> to vector<16x32xf32>
    %294 = arith.mulf %289, %293 : vector<16x32xf32>
    %295 = vector.broadcast %274 : vector<1x32xf32> to vector<16x32xf32>
    %296 = arith.mulf %294, %295 : vector<16x32xf32>
    %297 = vector.broadcast %276 : vector<1x32xf32> to vector<16x32xf32>
    %298 = arith.addf %296, %297 : vector<16x32xf32>
    %c1_120 = arith.constant 1 : index
    %c0_121 = arith.constant 0 : index
    %c0_122 = arith.constant 0 : index
    %299 = vector.load %arg10[%c1_120, %c0_121, %c0_122] : memref<4x32x96xf32, #tpu.memory_space<vmem>>, vector<1x32x96xf32>
    %300 = vector.shape_cast %299 : vector<1x32x96xf32> to vector<32x96xf32>
    %cst_123 = arith.constant dense<0.000000e+00> : vector<16x96xf32>
    %301 = tpu.matmul %298, %300, %cst_123 {dimension_numbers = #tpu.dot_dimension_numbers<[1], [0], [0], [1], [0, 0, 1, 1], [], []>} : vector<16x32xf32>, vector<32x96xf32>, vector<16x96xf32> -> vector<16x96xf32>
    %302 = vector.extract_strided_slice %301 {offsets = [0, 0], sizes = [8, 96], strides = [1, 1]} : vector<16x96xf32> to vector<8x96xf32>
    %c0_124 = arith.constant 0 : index
    %c0_125 = arith.constant 0 : index
    %c0_126 = arith.constant 0 : index
    %303 = vector.load %arg3[%c0_124, %c0_125, %c0_126] : memref<2x1x8xf32, #tpu.memory_space<vmem>>, vector<1x1x8xf32>
    %304 = vector.shape_cast %303 : vector<1x1x8xf32> to vector<1x8xf32>
    %305 = vector.extract_strided_slice %302 {offsets = [0, 0], sizes = [8, 8], strides = [1, 1]} : vector<8x96xf32> to vector<8x8xf32>
    %cst_127 = arith.constant 0.353553385 : f32
    %306 = vector.broadcast %cst_127 : f32 to vector<8x8xf32>
    %307 = arith.mulf %305, %306 : vector<8x8xf32>
    %308 = vector.extract_strided_slice %302 {offsets = [0, 32], sizes = [8, 8], strides = [1, 1]} : vector<8x96xf32> to vector<8x8xf32>
    %309 = vector.extract_strided_slice %302 {offsets = [0, 64], sizes = [8, 8], strides = [1, 1]} : vector<8x96xf32> to vector<8x8xf32>
    %cst_128 = arith.constant dense<0.000000e+00> : vector<8x8xf32>
    %310 = tpu.matmul %307, %308, %cst_128 {dimension_numbers = #tpu.dot_dimension_numbers<[1], [1], [0], [0], [0, 0, 1, 0], [], []>} : vector<8x8xf32>, vector<8x8xf32>, vector<8x8xf32> -> vector<8x8xf32>
    %cst_129 = arith.constant 0.000000e+00 : f32
    %311 = vector.broadcast %cst_129 : f32 to vector<1x8xf32>
    %312 = arith.cmpf ogt, %304, %311 : vector<1x8xf32>
    %cst_130 = arith.constant -1.000000e+09 : f32
    %313 = vector.shape_cast %312 : vector<1x8xi1> to vector<1x8xi1>
    %314 = vector.broadcast %313 : vector<1x8xi1> to vector<8x8xi1>
    %315 = vector.broadcast %cst_130 : f32 to vector<8x8xf32>
    %316 = arith.select %314, %310, %315 : vector<8x8xi1>, vector<8x8xf32>
    %cst_131 = arith.constant dense<0xFF800000> : vector<8xf32>
    %317 = vector.multi_reduction <maximumf>, %316, %cst_131 [1] : vector<8x8xf32> to vector<8xf32>
    %318 = vector.shape_cast %317 : vector<8xf32> to vector<8x1xf32>
    %319 = vector.broadcast %318 : vector<8x1xf32> to vector<8x8xf32>
    %320 = arith.subf %316, %319 : vector<8x8xf32>
    %321 = math.exp %320 : vector<8x8xf32>
    %cst_132 = arith.constant dense<0.000000e+00> : vector<8xf32>
    %322 = vector.multi_reduction <add>, %321, %cst_132 [1] : vector<8x8xf32> to vector<8xf32>
    %323 = vector.shape_cast %322 : vector<8xf32> to vector<8x1xf32>
    %324 = tpu.reciprocal %323 {approx = true} : vector<8x1xf32> -> vector<8x1xf32>
    %325 = vector.broadcast %324 : vector<8x1xf32> to vector<8x8xf32>
    %326 = arith.mulf %321, %325 : vector<8x8xf32>
    %cst_133 = arith.constant dense<0.000000e+00> : vector<8x8xf32>
    %327 = tpu.matmul %326, %309, %cst_133 {dimension_numbers = #tpu.dot_dimension_numbers<[1], [0], [0], [1], [0, 0, 1, 1], [], []>} : vector<8x8xf32>, vector<8x8xf32>, vector<8x8xf32> -> vector<8x8xf32>
    %328 = vector.extract_strided_slice %302 {offsets = [0, 8], sizes = [8, 8], strides = [1, 1]} : vector<8x96xf32> to vector<8x8xf32>
    %cst_134 = arith.constant 0.353553385 : f32
    %329 = vector.broadcast %cst_134 : f32 to vector<8x8xf32>
    %330 = arith.mulf %328, %329 : vector<8x8xf32>
    %331 = vector.extract_strided_slice %302 {offsets = [0, 40], sizes = [8, 8], strides = [1, 1]} : vector<8x96xf32> to vector<8x8xf32>
    %332 = vector.extract_strided_slice %302 {offsets = [0, 72], sizes = [8, 8], strides = [1, 1]} : vector<8x96xf32> to vector<8x8xf32>
    %cst_135 = arith.constant dense<0.000000e+00> : vector<8x8xf32>
    %333 = tpu.matmul %330, %331, %cst_135 {dimension_numbers = #tpu.dot_dimension_numbers<[1], [1], [0], [0], [0, 0, 1, 0], [], []>} : vector<8x8xf32>, vector<8x8xf32>, vector<8x8xf32> -> vector<8x8xf32>
    %cst_136 = arith.constant 0.000000e+00 : f32
    %334 = vector.broadcast %cst_136 : f32 to vector<1x8xf32>
    %335 = arith.cmpf ogt, %304, %334 : vector<1x8xf32>
    %cst_137 = arith.constant -1.000000e+09 : f32
    %336 = vector.shape_cast %335 : vector<1x8xi1> to vector<1x8xi1>
    %337 = vector.broadcast %336 : vector<1x8xi1> to vector<8x8xi1>
    %338 = vector.broadcast %cst_137 : f32 to vector<8x8xf32>
    %339 = arith.select %337, %333, %338 : vector<8x8xi1>, vector<8x8xf32>
    %cst_138 = arith.constant dense<0xFF800000> : vector<8xf32>
    %340 = vector.multi_reduction <maximumf>, %339, %cst_138 [1] : vector<8x8xf32> to vector<8xf32>
    %341 = vector.shape_cast %340 : vector<8xf32> to vector<8x1xf32>
    %342 = vector.broadcast %341 : vector<8x1xf32> to vector<8x8xf32>
    %343 = arith.subf %339, %342 : vector<8x8xf32>
    %344 = math.exp %343 : vector<8x8xf32>
    %cst_139 = arith.constant dense<0.000000e+00> : vector<8xf32>
    %345 = vector.multi_reduction <add>, %344, %cst_139 [1] : vector<8x8xf32> to vector<8xf32>
    %346 = vector.shape_cast %345 : vector<8xf32> to vector<8x1xf32>
    %347 = tpu.reciprocal %346 {approx = true} : vector<8x1xf32> -> vector<8x1xf32>
    %348 = vector.broadcast %347 : vector<8x1xf32> to vector<8x8xf32>
    %349 = arith.mulf %344, %348 : vector<8x8xf32>
    %cst_140 = arith.constant dense<0.000000e+00> : vector<8x8xf32>
    %350 = tpu.matmul %349, %332, %cst_140 {dimension_numbers = #tpu.dot_dimension_numbers<[1], [0], [0], [1], [0, 0, 1, 1], [], []>} : vector<8x8xf32>, vector<8x8xf32>, vector<8x8xf32> -> vector<8x8xf32>
    %351 = vector.extract_strided_slice %302 {offsets = [0, 16], sizes = [8, 8], strides = [1, 1]} : vector<8x96xf32> to vector<8x8xf32>
    %cst_141 = arith.constant 0.353553385 : f32
    %352 = vector.broadcast %cst_141 : f32 to vector<8x8xf32>
    %353 = arith.mulf %351, %352 : vector<8x8xf32>
    %354 = vector.extract_strided_slice %302 {offsets = [0, 48], sizes = [8, 8], strides = [1, 1]} : vector<8x96xf32> to vector<8x8xf32>
    %355 = vector.extract_strided_slice %302 {offsets = [0, 80], sizes = [8, 8], strides = [1, 1]} : vector<8x96xf32> to vector<8x8xf32>
    %cst_142 = arith.constant dense<0.000000e+00> : vector<8x8xf32>
    %356 = tpu.matmul %353, %354, %cst_142 {dimension_numbers = #tpu.dot_dimension_numbers<[1], [1], [0], [0], [0, 0, 1, 0], [], []>} : vector<8x8xf32>, vector<8x8xf32>, vector<8x8xf32> -> vector<8x8xf32>
    %cst_143 = arith.constant 0.000000e+00 : f32
    %357 = vector.broadcast %cst_143 : f32 to vector<1x8xf32>
    %358 = arith.cmpf ogt, %304, %357 : vector<1x8xf32>
    %cst_144 = arith.constant -1.000000e+09 : f32
    %359 = vector.shape_cast %358 : vector<1x8xi1> to vector<1x8xi1>
    %360 = vector.broadcast %359 : vector<1x8xi1> to vector<8x8xi1>
    %361 = vector.broadcast %cst_144 : f32 to vector<8x8xf32>
    %362 = arith.select %360, %356, %361 : vector<8x8xi1>, vector<8x8xf32>
    %cst_145 = arith.constant dense<0xFF800000> : vector<8xf32>
    %363 = vector.multi_reduction <maximumf>, %362, %cst_145 [1] : vector<8x8xf32> to vector<8xf32>
    %364 = vector.shape_cast %363 : vector<8xf32> to vector<8x1xf32>
    %365 = vector.broadcast %364 : vector<8x1xf32> to vector<8x8xf32>
    %366 = arith.subf %362, %365 : vector<8x8xf32>
    %367 = math.exp %366 : vector<8x8xf32>
    %cst_146 = arith.constant dense<0.000000e+00> : vector<8xf32>
    %368 = vector.multi_reduction <add>, %367, %cst_146 [1] : vector<8x8xf32> to vector<8xf32>
    %369 = vector.shape_cast %368 : vector<8xf32> to vector<8x1xf32>
    %370 = tpu.reciprocal %369 {approx = true} : vector<8x1xf32> -> vector<8x1xf32>
    %371 = vector.broadcast %370 : vector<8x1xf32> to vector<8x8xf32>
    %372 = arith.mulf %367, %371 : vector<8x8xf32>
    %cst_147 = arith.constant dense<0.000000e+00> : vector<8x8xf32>
    %373 = tpu.matmul %372, %355, %cst_147 {dimension_numbers = #tpu.dot_dimension_numbers<[1], [0], [0], [1], [0, 0, 1, 1], [], []>} : vector<8x8xf32>, vector<8x8xf32>, vector<8x8xf32> -> vector<8x8xf32>
    %374 = vector.extract_strided_slice %302 {offsets = [0, 24], sizes = [8, 8], strides = [1, 1]} : vector<8x96xf32> to vector<8x8xf32>
    %cst_148 = arith.constant 0.353553385 : f32
    %375 = vector.broadcast %cst_148 : f32 to vector<8x8xf32>
    %376 = arith.mulf %374, %375 : vector<8x8xf32>
    %377 = vector.extract_strided_slice %302 {offsets = [0, 56], sizes = [8, 8], strides = [1, 1]} : vector<8x96xf32> to vector<8x8xf32>
    %378 = vector.extract_strided_slice %302 {offsets = [0, 88], sizes = [8, 8], strides = [1, 1]} : vector<8x96xf32> to vector<8x8xf32>
    %cst_149 = arith.constant dense<0.000000e+00> : vector<8x8xf32>
    %379 = tpu.matmul %376, %377, %cst_149 {dimension_numbers = #tpu.dot_dimension_numbers<[1], [1], [0], [0], [0, 0, 1, 0], [], []>} : vector<8x8xf32>, vector<8x8xf32>, vector<8x8xf32> -> vector<8x8xf32>
    %cst_150 = arith.constant 0.000000e+00 : f32
    %380 = vector.broadcast %cst_150 : f32 to vector<1x8xf32>
    %381 = arith.cmpf ogt, %304, %380 : vector<1x8xf32>
    %cst_151 = arith.constant -1.000000e+09 : f32
    %382 = vector.shape_cast %381 : vector<1x8xi1> to vector<1x8xi1>
    %383 = vector.broadcast %382 : vector<1x8xi1> to vector<8x8xi1>
    %384 = vector.broadcast %cst_151 : f32 to vector<8x8xf32>
    %385 = arith.select %383, %379, %384 : vector<8x8xi1>, vector<8x8xf32>
    %cst_152 = arith.constant dense<0xFF800000> : vector<8xf32>
    %386 = vector.multi_reduction <maximumf>, %385, %cst_152 [1] : vector<8x8xf32> to vector<8xf32>
    %387 = vector.shape_cast %386 : vector<8xf32> to vector<8x1xf32>
    %388 = vector.broadcast %387 : vector<8x1xf32> to vector<8x8xf32>
    %389 = arith.subf %385, %388 : vector<8x8xf32>
    %390 = math.exp %389 : vector<8x8xf32>
    %cst_153 = arith.constant dense<0.000000e+00> : vector<8xf32>
    %391 = vector.multi_reduction <add>, %390, %cst_153 [1] : vector<8x8xf32> to vector<8xf32>
    %392 = vector.shape_cast %391 : vector<8xf32> to vector<8x1xf32>
    %393 = tpu.reciprocal %392 {approx = true} : vector<8x1xf32> -> vector<8x1xf32>
    %394 = vector.broadcast %393 : vector<8x1xf32> to vector<8x8xf32>
    %395 = arith.mulf %390, %394 : vector<8x8xf32>
    %cst_154 = arith.constant dense<0.000000e+00> : vector<8x8xf32>
    %396 = tpu.matmul %395, %378, %cst_154 {dimension_numbers = #tpu.dot_dimension_numbers<[1], [0], [0], [1], [0, 0, 1, 1], [], []>} : vector<8x8xf32>, vector<8x8xf32>, vector<8x8xf32> -> vector<8x8xf32>
    %397 = tpu.concatenate %327, %350, %373, %396 in 1 : vector<8x8xf32>, vector<8x8xf32>, vector<8x8xf32>, vector<8x8xf32> -> vector<8x32xf32>
    %398 = vector.extract_strided_slice %301 {offsets = [8, 0], sizes = [8, 96], strides = [1, 1]} : vector<16x96xf32> to vector<8x96xf32>
    %c1_155 = arith.constant 1 : index
    %c0_156 = arith.constant 0 : index
    %c0_157 = arith.constant 0 : index
    %399 = vector.load %arg3[%c1_155, %c0_156, %c0_157] : memref<2x1x8xf32, #tpu.memory_space<vmem>>, vector<1x1x8xf32>
    %400 = vector.shape_cast %399 : vector<1x1x8xf32> to vector<1x8xf32>
    %401 = vector.extract_strided_slice %398 {offsets = [0, 0], sizes = [8, 8], strides = [1, 1]} : vector<8x96xf32> to vector<8x8xf32>
    %cst_158 = arith.constant 0.353553385 : f32
    %402 = vector.broadcast %cst_158 : f32 to vector<8x8xf32>
    %403 = arith.mulf %401, %402 : vector<8x8xf32>
    %404 = vector.extract_strided_slice %398 {offsets = [0, 32], sizes = [8, 8], strides = [1, 1]} : vector<8x96xf32> to vector<8x8xf32>
    %405 = vector.extract_strided_slice %398 {offsets = [0, 64], sizes = [8, 8], strides = [1, 1]} : vector<8x96xf32> to vector<8x8xf32>
    %cst_159 = arith.constant dense<0.000000e+00> : vector<8x8xf32>
    %406 = tpu.matmul %403, %404, %cst_159 {dimension_numbers = #tpu.dot_dimension_numbers<[1], [1], [0], [0], [0, 0, 1, 0], [], []>} : vector<8x8xf32>, vector<8x8xf32>, vector<8x8xf32> -> vector<8x8xf32>
    %cst_160 = arith.constant 0.000000e+00 : f32
    %407 = vector.broadcast %cst_160 : f32 to vector<1x8xf32>
    %408 = arith.cmpf ogt, %400, %407 : vector<1x8xf32>
    %cst_161 = arith.constant -1.000000e+09 : f32
    %409 = vector.shape_cast %408 : vector<1x8xi1> to vector<1x8xi1>
    %410 = vector.broadcast %409 : vector<1x8xi1> to vector<8x8xi1>
    %411 = vector.broadcast %cst_161 : f32 to vector<8x8xf32>
    %412 = arith.select %410, %406, %411 : vector<8x8xi1>, vector<8x8xf32>
    %cst_162 = arith.constant dense<0xFF800000> : vector<8xf32>
    %413 = vector.multi_reduction <maximumf>, %412, %cst_162 [1] : vector<8x8xf32> to vector<8xf32>
    %414 = vector.shape_cast %413 : vector<8xf32> to vector<8x1xf32>
    %415 = vector.broadcast %414 : vector<8x1xf32> to vector<8x8xf32>
    %416 = arith.subf %412, %415 : vector<8x8xf32>
    %417 = math.exp %416 : vector<8x8xf32>
    %cst_163 = arith.constant dense<0.000000e+00> : vector<8xf32>
    %418 = vector.multi_reduction <add>, %417, %cst_163 [1] : vector<8x8xf32> to vector<8xf32>
    %419 = vector.shape_cast %418 : vector<8xf32> to vector<8x1xf32>
    %420 = tpu.reciprocal %419 {approx = true} : vector<8x1xf32> -> vector<8x1xf32>
    %421 = vector.broadcast %420 : vector<8x1xf32> to vector<8x8xf32>
    %422 = arith.mulf %417, %421 : vector<8x8xf32>
    %cst_164 = arith.constant dense<0.000000e+00> : vector<8x8xf32>
    %423 = tpu.matmul %422, %405, %cst_164 {dimension_numbers = #tpu.dot_dimension_numbers<[1], [0], [0], [1], [0, 0, 1, 1], [], []>} : vector<8x8xf32>, vector<8x8xf32>, vector<8x8xf32> -> vector<8x8xf32>
    %424 = vector.extract_strided_slice %398 {offsets = [0, 8], sizes = [8, 8], strides = [1, 1]} : vector<8x96xf32> to vector<8x8xf32>
    %cst_165 = arith.constant 0.353553385 : f32
    %425 = vector.broadcast %cst_165 : f32 to vector<8x8xf32>
    %426 = arith.mulf %424, %425 : vector<8x8xf32>
    %427 = vector.extract_strided_slice %398 {offsets = [0, 40], sizes = [8, 8], strides = [1, 1]} : vector<8x96xf32> to vector<8x8xf32>
    %428 = vector.extract_strided_slice %398 {offsets = [0, 72], sizes = [8, 8], strides = [1, 1]} : vector<8x96xf32> to vector<8x8xf32>
    %cst_166 = arith.constant dense<0.000000e+00> : vector<8x8xf32>
    %429 = tpu.matmul %426, %427, %cst_166 {dimension_numbers = #tpu.dot_dimension_numbers<[1], [1], [0], [0], [0, 0, 1, 0], [], []>} : vector<8x8xf32>, vector<8x8xf32>, vector<8x8xf32> -> vector<8x8xf32>
    %cst_167 = arith.constant 0.000000e+00 : f32
    %430 = vector.broadcast %cst_167 : f32 to vector<1x8xf32>
    %431 = arith.cmpf ogt, %400, %430 : vector<1x8xf32>
    %cst_168 = arith.constant -1.000000e+09 : f32
    %432 = vector.shape_cast %431 : vector<1x8xi1> to vector<1x8xi1>
    %433 = vector.broadcast %432 : vector<1x8xi1> to vector<8x8xi1>
    %434 = vector.broadcast %cst_168 : f32 to vector<8x8xf32>
    %435 = arith.select %433, %429, %434 : vector<8x8xi1>, vector<8x8xf32>
    %cst_169 = arith.constant dense<0xFF800000> : vector<8xf32>
    %436 = vector.multi_reduction <maximumf>, %435, %cst_169 [1] : vector<8x8xf32> to vector<8xf32>
    %437 = vector.shape_cast %436 : vector<8xf32> to vector<8x1xf32>
    %438 = vector.broadcast %437 : vector<8x1xf32> to vector<8x8xf32>
    %439 = arith.subf %435, %438 : vector<8x8xf32>
    %440 = math.exp %439 : vector<8x8xf32>
    %cst_170 = arith.constant dense<0.000000e+00> : vector<8xf32>
    %441 = vector.multi_reduction <add>, %440, %cst_170 [1] : vector<8x8xf32> to vector<8xf32>
    %442 = vector.shape_cast %441 : vector<8xf32> to vector<8x1xf32>
    %443 = tpu.reciprocal %442 {approx = true} : vector<8x1xf32> -> vector<8x1xf32>
    %444 = vector.broadcast %443 : vector<8x1xf32> to vector<8x8xf32>
    %445 = arith.mulf %440, %444 : vector<8x8xf32>
    %cst_171 = arith.constant dense<0.000000e+00> : vector<8x8xf32>
    %446 = tpu.matmul %445, %428, %cst_171 {dimension_numbers = #tpu.dot_dimension_numbers<[1], [0], [0], [1], [0, 0, 1, 1], [], []>} : vector<8x8xf32>, vector<8x8xf32>, vector<8x8xf32> -> vector<8x8xf32>
    %447 = vector.extract_strided_slice %398 {offsets = [0, 16], sizes = [8, 8], strides = [1, 1]} : vector<8x96xf32> to vector<8x8xf32>
    %cst_172 = arith.constant 0.353553385 : f32
    %448 = vector.broadcast %cst_172 : f32 to vector<8x8xf32>
    %449 = arith.mulf %447, %448 : vector<8x8xf32>
    %450 = vector.extract_strided_slice %398 {offsets = [0, 48], sizes = [8, 8], strides = [1, 1]} : vector<8x96xf32> to vector<8x8xf32>
    %451 = vector.extract_strided_slice %398 {offsets = [0, 80], sizes = [8, 8], strides = [1, 1]} : vector<8x96xf32> to vector<8x8xf32>
    %cst_173 = arith.constant dense<0.000000e+00> : vector<8x8xf32>
    %452 = tpu.matmul %449, %450, %cst_173 {dimension_numbers = #tpu.dot_dimension_numbers<[1], [1], [0], [0], [0, 0, 1, 0], [], []>} : vector<8x8xf32>, vector<8x8xf32>, vector<8x8xf32> -> vector<8x8xf32>
    %cst_174 = arith.constant 0.000000e+00 : f32
    %453 = vector.broadcast %cst_174 : f32 to vector<1x8xf32>
    %454 = arith.cmpf ogt, %400, %453 : vector<1x8xf32>
    %cst_175 = arith.constant -1.000000e+09 : f32
    %455 = vector.shape_cast %454 : vector<1x8xi1> to vector<1x8xi1>
    %456 = vector.broadcast %455 : vector<1x8xi1> to vector<8x8xi1>
    %457 = vector.broadcast %cst_175 : f32 to vector<8x8xf32>
    %458 = arith.select %456, %452, %457 : vector<8x8xi1>, vector<8x8xf32>
    %cst_176 = arith.constant dense<0xFF800000> : vector<8xf32>
    %459 = vector.multi_reduction <maximumf>, %458, %cst_176 [1] : vector<8x8xf32> to vector<8xf32>
    %460 = vector.shape_cast %459 : vector<8xf32> to vector<8x1xf32>
    %461 = vector.broadcast %460 : vector<8x1xf32> to vector<8x8xf32>
    %462 = arith.subf %458, %461 : vector<8x8xf32>
    %463 = math.exp %462 : vector<8x8xf32>
    %cst_177 = arith.constant dense<0.000000e+00> : vector<8xf32>
    %464 = vector.multi_reduction <add>, %463, %cst_177 [1] : vector<8x8xf32> to vector<8xf32>
    %465 = vector.shape_cast %464 : vector<8xf32> to vector<8x1xf32>
    %466 = tpu.reciprocal %465 {approx = true} : vector<8x1xf32> -> vector<8x1xf32>
    %467 = vector.broadcast %466 : vector<8x1xf32> to vector<8x8xf32>
    %468 = arith.mulf %463, %467 : vector<8x8xf32>
    %cst_178 = arith.constant dense<0.000000e+00> : vector<8x8xf32>
    %469 = tpu.matmul %468, %451, %cst_178 {dimension_numbers = #tpu.dot_dimension_numbers<[1], [0], [0], [1], [0, 0, 1, 1], [], []>} : vector<8x8xf32>, vector<8x8xf32>, vector<8x8xf32> -> vector<8x8xf32>
    %470 = vector.extract_strided_slice %398 {offsets = [0, 24], sizes = [8, 8], strides = [1, 1]} : vector<8x96xf32> to vector<8x8xf32>
    %cst_179 = arith.constant 0.353553385 : f32
    %471 = vector.broadcast %cst_179 : f32 to vector<8x8xf32>
    %472 = arith.mulf %470, %471 : vector<8x8xf32>
    %473 = vector.extract_strided_slice %398 {offsets = [0, 56], sizes = [8, 8], strides = [1, 1]} : vector<8x96xf32> to vector<8x8xf32>
    %474 = vector.extract_strided_slice %398 {offsets = [0, 88], sizes = [8, 8], strides = [1, 1]} : vector<8x96xf32> to vector<8x8xf32>
    %cst_180 = arith.constant dense<0.000000e+00> : vector<8x8xf32>
    %475 = tpu.matmul %472, %473, %cst_180 {dimension_numbers = #tpu.dot_dimension_numbers<[1], [1], [0], [0], [0, 0, 1, 0], [], []>} : vector<8x8xf32>, vector<8x8xf32>, vector<8x8xf32> -> vector<8x8xf32>
    %cst_181 = arith.constant 0.000000e+00 : f32
    %476 = vector.broadcast %cst_181 : f32 to vector<1x8xf32>
    %477 = arith.cmpf ogt, %400, %476 : vector<1x8xf32>
    %cst_182 = arith.constant -1.000000e+09 : f32
    %478 = vector.shape_cast %477 : vector<1x8xi1> to vector<1x8xi1>
    %479 = vector.broadcast %478 : vector<1x8xi1> to vector<8x8xi1>
    %480 = vector.broadcast %cst_182 : f32 to vector<8x8xf32>
    %481 = arith.select %479, %475, %480 : vector<8x8xi1>, vector<8x8xf32>
    %cst_183 = arith.constant dense<0xFF800000> : vector<8xf32>
    %482 = vector.multi_reduction <maximumf>, %481, %cst_183 [1] : vector<8x8xf32> to vector<8xf32>
    %483 = vector.shape_cast %482 : vector<8xf32> to vector<8x1xf32>
    %484 = vector.broadcast %483 : vector<8x1xf32> to vector<8x8xf32>
    %485 = arith.subf %481, %484 : vector<8x8xf32>
    %486 = math.exp %485 : vector<8x8xf32>
    %cst_184 = arith.constant dense<0.000000e+00> : vector<8xf32>
    %487 = vector.multi_reduction <add>, %486, %cst_184 [1] : vector<8x8xf32> to vector<8xf32>
    %488 = vector.shape_cast %487 : vector<8xf32> to vector<8x1xf32>
    %489 = tpu.reciprocal %488 {approx = true} : vector<8x1xf32> -> vector<8x1xf32>
    %490 = vector.broadcast %489 : vector<8x1xf32> to vector<8x8xf32>
    %491 = arith.mulf %486, %490 : vector<8x8xf32>
    %cst_185 = arith.constant dense<0.000000e+00> : vector<8x8xf32>
    %492 = tpu.matmul %491, %474, %cst_185 {dimension_numbers = #tpu.dot_dimension_numbers<[1], [0], [0], [1], [0, 0, 1, 1], [], []>} : vector<8x8xf32>, vector<8x8xf32>, vector<8x8xf32> -> vector<8x8xf32>
    %493 = tpu.concatenate %423, %446, %469, %492 in 1 : vector<8x8xf32>, vector<8x8xf32>, vector<8x8xf32>, vector<8x8xf32> -> vector<8x32xf32>
    %494 = tpu.concatenate %397, %493 in 0 : vector<8x32xf32>, vector<8x32xf32> -> vector<16x32xf32>
    %c1_186 = arith.constant 1 : index
    %c0_187 = arith.constant 0 : index
    %c0_188 = arith.constant 0 : index
    %495 = vector.load %arg11[%c1_186, %c0_187, %c0_188] : memref<4x32x32xf32, #tpu.memory_space<vmem>>, vector<1x32x32xf32>
    %496 = vector.shape_cast %495 : vector<1x32x32xf32> to vector<32x32xf32>
    %cst_189 = arith.constant dense<0.000000e+00> : vector<16x32xf32>
    %497 = tpu.matmul %494, %496, %cst_189 {dimension_numbers = #tpu.dot_dimension_numbers<[1], [0], [0], [1], [0, 0, 1, 1], [], []>} : vector<16x32xf32>, vector<32x32xf32>, vector<16x32xf32> -> vector<16x32xf32>
    %498 = arith.addf %497, %298 : vector<16x32xf32>
    %c1_190 = arith.constant 1 : index
    %c0_191 = arith.constant 0 : index
    %c0_192 = arith.constant 0 : index
    %499 = vector.load %arg12[%c1_190, %c0_191, %c0_192] : memref<4x1x32xf32, #tpu.memory_space<vmem>>, vector<1x1x32xf32>
    %500 = vector.shape_cast %499 : vector<1x1x32xf32> to vector<1x32xf32>
    %c1_193 = arith.constant 1 : index
    %c0_194 = arith.constant 0 : index
    %c0_195 = arith.constant 0 : index
    %501 = vector.load %arg13[%c1_193, %c0_194, %c0_195] : memref<4x1x32xf32, #tpu.memory_space<vmem>>, vector<1x1x32xf32>
    %502 = vector.shape_cast %501 : vector<1x1x32xf32> to vector<1x32xf32>
    %cst_196 = arith.constant dense<0.000000e+00> : vector<16xf32>
    %503 = vector.multi_reduction <add>, %498, %cst_196 [1] : vector<16x32xf32> to vector<16xf32>
    %504 = vector.shape_cast %503 : vector<16xf32> to vector<16x1xf32>
    %cst_197 = arith.constant 3.200000e+01 : f32
    %505 = vector.broadcast %cst_197 : f32 to vector<16x1xf32>
    %506 = arith.divf %504, %505 : vector<16x1xf32>
    %507 = vector.broadcast %506 : vector<16x1xf32> to vector<16x32xf32>
    %508 = arith.subf %498, %507 : vector<16x32xf32>
    %509 = arith.mulf %508, %508 : vector<16x32xf32>
    %cst_198 = arith.constant dense<0.000000e+00> : vector<16xf32>
    %510 = vector.multi_reduction <add>, %509, %cst_198 [1] : vector<16x32xf32> to vector<16xf32>
    %511 = vector.shape_cast %510 : vector<16xf32> to vector<16x1xf32>
    %cst_199 = arith.constant 3.200000e+01 : f32
    %512 = vector.broadcast %cst_199 : f32 to vector<16x1xf32>
    %513 = arith.divf %511, %512 : vector<16x1xf32>
    %514 = vector.broadcast %506 : vector<16x1xf32> to vector<16x32xf32>
    %515 = arith.subf %498, %514 : vector<16x32xf32>
    %cst_200 = arith.constant 9.99999997E-7 : f32
    %516 = vector.broadcast %cst_200 : f32 to vector<16x1xf32>
    %517 = arith.addf %513, %516 : vector<16x1xf32>
    %518 = math.rsqrt %517 : vector<16x1xf32>
    %519 = vector.broadcast %518 : vector<16x1xf32> to vector<16x32xf32>
    %520 = arith.mulf %515, %519 : vector<16x32xf32>
    %521 = vector.broadcast %500 : vector<1x32xf32> to vector<16x32xf32>
    %522 = arith.mulf %520, %521 : vector<16x32xf32>
    %523 = vector.broadcast %502 : vector<1x32xf32> to vector<16x32xf32>
    %524 = arith.addf %522, %523 : vector<16x32xf32>
    %c1_201 = arith.constant 1 : index
    %c0_202 = arith.constant 0 : index
    %c0_203 = arith.constant 0 : index
    %525 = vector.load %arg14[%c1_201, %c0_202, %c0_203] : memref<4x32x64xf32, #tpu.memory_space<vmem>>, vector<1x32x64xf32>
    %526 = vector.shape_cast %525 : vector<1x32x64xf32> to vector<32x64xf32>
    %cst_204 = arith.constant dense<0.000000e+00> : vector<16x64xf32>
    %527 = tpu.matmul %524, %526, %cst_204 {dimension_numbers = #tpu.dot_dimension_numbers<[1], [0], [0], [1], [0, 0, 1, 1], [], []>} : vector<16x32xf32>, vector<32x64xf32>, vector<16x64xf32> -> vector<16x64xf32>
    %c1_205 = arith.constant 1 : index
    %c0_206 = arith.constant 0 : index
    %c0_207 = arith.constant 0 : index
    %528 = vector.load %arg15[%c1_205, %c0_206, %c0_207] : memref<4x1x64xf32, #tpu.memory_space<vmem>>, vector<1x1x64xf32>
    %529 = vector.shape_cast %528 : vector<1x1x64xf32> to vector<1x64xf32>
    %530 = vector.broadcast %529 : vector<1x64xf32> to vector<16x64xf32>
    %531 = arith.addf %527, %530 : vector<16x64xf32>
    %cst_208 = arith.constant 0.000000e+00 : f32
    %532 = vector.broadcast %cst_208 : f32 to vector<16x64xf32>
    %533 = arith.maximumf %531, %532 : vector<16x64xf32>
    %c1_209 = arith.constant 1 : index
    %c0_210 = arith.constant 0 : index
    %c0_211 = arith.constant 0 : index
    %534 = vector.load %arg16[%c1_209, %c0_210, %c0_211] : memref<4x64x32xf32, #tpu.memory_space<vmem>>, vector<1x64x32xf32>
    %535 = vector.shape_cast %534 : vector<1x64x32xf32> to vector<64x32xf32>
    %cst_212 = arith.constant dense<0.000000e+00> : vector<16x32xf32>
    %536 = tpu.matmul %533, %535, %cst_212 {dimension_numbers = #tpu.dot_dimension_numbers<[1], [0], [0], [1], [0, 0, 1, 1], [], []>} : vector<16x64xf32>, vector<64x32xf32>, vector<16x32xf32> -> vector<16x32xf32>
    %c1_213 = arith.constant 1 : index
    %c0_214 = arith.constant 0 : index
    %c0_215 = arith.constant 0 : index
    %537 = vector.load %arg17[%c1_213, %c0_214, %c0_215] : memref<4x1x32xf32, #tpu.memory_space<vmem>>, vector<1x1x32xf32>
    %538 = vector.shape_cast %537 : vector<1x1x32xf32> to vector<1x32xf32>
    %539 = vector.broadcast %538 : vector<1x32xf32> to vector<16x32xf32>
    %540 = arith.addf %536, %539 : vector<16x32xf32>
    %541 = arith.addf %540, %524 : vector<16x32xf32>
    %c1_216 = arith.constant 1 : index
    %c0_217 = arith.constant 0 : index
    %c0_218 = arith.constant 0 : index
    %542 = vector.load %arg18[%c1_216, %c0_217, %c0_218] : memref<4x1x32xf32, #tpu.memory_space<vmem>>, vector<1x1x32xf32>
    %543 = vector.shape_cast %542 : vector<1x1x32xf32> to vector<1x32xf32>
    %c1_219 = arith.constant 1 : index
    %c0_220 = arith.constant 0 : index
    %c0_221 = arith.constant 0 : index
    %544 = vector.load %arg19[%c1_219, %c0_220, %c0_221] : memref<4x1x32xf32, #tpu.memory_space<vmem>>, vector<1x1x32xf32>
    %545 = vector.shape_cast %544 : vector<1x1x32xf32> to vector<1x32xf32>
    %cst_222 = arith.constant dense<0.000000e+00> : vector<16xf32>
    %546 = vector.multi_reduction <add>, %541, %cst_222 [1] : vector<16x32xf32> to vector<16xf32>
    %547 = vector.shape_cast %546 : vector<16xf32> to vector<16x1xf32>
    %cst_223 = arith.constant 3.200000e+01 : f32
    %548 = vector.broadcast %cst_223 : f32 to vector<16x1xf32>
    %549 = arith.divf %547, %548 : vector<16x1xf32>
    %550 = vector.broadcast %549 : vector<16x1xf32> to vector<16x32xf32>
    %551 = arith.subf %541, %550 : vector<16x32xf32>
    %552 = arith.mulf %551, %551 : vector<16x32xf32>
    %cst_224 = arith.constant dense<0.000000e+00> : vector<16xf32>
    %553 = vector.multi_reduction <add>, %552, %cst_224 [1] : vector<16x32xf32> to vector<16xf32>
    %554 = vector.shape_cast %553 : vector<16xf32> to vector<16x1xf32>
    %cst_225 = arith.constant 3.200000e+01 : f32
    %555 = vector.broadcast %cst_225 : f32 to vector<16x1xf32>
    %556 = arith.divf %554, %555 : vector<16x1xf32>
    %557 = vector.broadcast %549 : vector<16x1xf32> to vector<16x32xf32>
    %558 = arith.subf %541, %557 : vector<16x32xf32>
    %cst_226 = arith.constant 9.99999997E-7 : f32
    %559 = vector.broadcast %cst_226 : f32 to vector<16x1xf32>
    %560 = arith.addf %556, %559 : vector<16x1xf32>
    %561 = math.rsqrt %560 : vector<16x1xf32>
    %562 = vector.broadcast %561 : vector<16x1xf32> to vector<16x32xf32>
    %563 = arith.mulf %558, %562 : vector<16x32xf32>
    %564 = vector.broadcast %543 : vector<1x32xf32> to vector<16x32xf32>
    %565 = arith.mulf %563, %564 : vector<16x32xf32>
    %566 = vector.broadcast %545 : vector<1x32xf32> to vector<16x32xf32>
    %567 = arith.addf %565, %566 : vector<16x32xf32>
    %c0_227 = arith.constant 0 : index
    %c0_228 = arith.constant 0 : index
    %568 = vector.load %arg2[%c0_227, %c0_228] : memref<16x32xf32, #tpu.memory_space<vmem>>, vector<16x32xf32>
    %c0_229 = arith.constant 0 : index
    %c0_230 = arith.constant 0 : index
    %569 = vector.load %arg8[%c0_229, %c0_230] : memref<32x32xf32, #tpu.memory_space<vmem>>, vector<32x32xf32>
    %cst_231 = arith.constant dense<0.000000e+00> : vector<16x32xf32>
    %570 = tpu.matmul %568, %569, %cst_231 {dimension_numbers = #tpu.dot_dimension_numbers<[1], [0], [0], [1], [0, 0, 1, 1], [], []>} : vector<16x32xf32>, vector<32x32xf32>, vector<16x32xf32> -> vector<16x32xf32>
    %c0_232 = arith.constant 0 : index
    %c0_233 = arith.constant 0 : index
    %571 = vector.load %arg9[%c0_232, %c0_233] : memref<1x32xf32, #tpu.memory_space<vmem>>, vector<1x32xf32>
    %572 = vector.broadcast %571 : vector<1x32xf32> to vector<16x32xf32>
    %573 = arith.addf %570, %572 : vector<16x32xf32>
    %574 = arith.addf %567, %573 : vector<16x32xf32>
    %c2 = arith.constant 2 : index
    %c0_234 = arith.constant 0 : index
    %c0_235 = arith.constant 0 : index
    %575 = vector.load %arg10[%c2, %c0_234, %c0_235] : memref<4x32x96xf32, #tpu.memory_space<vmem>>, vector<1x32x96xf32>
    %576 = vector.shape_cast %575 : vector<1x32x96xf32> to vector<32x96xf32>
    %cst_236 = arith.constant dense<0.000000e+00> : vector<16x96xf32>
    %577 = tpu.matmul %574, %576, %cst_236 {dimension_numbers = #tpu.dot_dimension_numbers<[1], [0], [0], [1], [0, 0, 1, 1], [], []>} : vector<16x32xf32>, vector<32x96xf32>, vector<16x96xf32> -> vector<16x96xf32>
    %578 = vector.extract_strided_slice %577 {offsets = [0, 0], sizes = [8, 96], strides = [1, 1]} : vector<16x96xf32> to vector<8x96xf32>
    %c0_237 = arith.constant 0 : index
    %c0_238 = arith.constant 0 : index
    %c0_239 = arith.constant 0 : index
    %579 = vector.load %arg3[%c0_237, %c0_238, %c0_239] : memref<2x1x8xf32, #tpu.memory_space<vmem>>, vector<1x1x8xf32>
    %580 = vector.shape_cast %579 : vector<1x1x8xf32> to vector<1x8xf32>
    %581 = vector.extract_strided_slice %578 {offsets = [0, 0], sizes = [8, 8], strides = [1, 1]} : vector<8x96xf32> to vector<8x8xf32>
    %cst_240 = arith.constant 0.353553385 : f32
    %582 = vector.broadcast %cst_240 : f32 to vector<8x8xf32>
    %583 = arith.mulf %581, %582 : vector<8x8xf32>
    %584 = vector.extract_strided_slice %578 {offsets = [0, 32], sizes = [8, 8], strides = [1, 1]} : vector<8x96xf32> to vector<8x8xf32>
    %585 = vector.extract_strided_slice %578 {offsets = [0, 64], sizes = [8, 8], strides = [1, 1]} : vector<8x96xf32> to vector<8x8xf32>
    %cst_241 = arith.constant dense<0.000000e+00> : vector<8x8xf32>
    %586 = tpu.matmul %583, %584, %cst_241 {dimension_numbers = #tpu.dot_dimension_numbers<[1], [1], [0], [0], [0, 0, 1, 0], [], []>} : vector<8x8xf32>, vector<8x8xf32>, vector<8x8xf32> -> vector<8x8xf32>
    %cst_242 = arith.constant 0.000000e+00 : f32
    %587 = vector.broadcast %cst_242 : f32 to vector<1x8xf32>
    %588 = arith.cmpf ogt, %580, %587 : vector<1x8xf32>
    %cst_243 = arith.constant -1.000000e+09 : f32
    %589 = vector.shape_cast %588 : vector<1x8xi1> to vector<1x8xi1>
    %590 = vector.broadcast %589 : vector<1x8xi1> to vector<8x8xi1>
    %591 = vector.broadcast %cst_243 : f32 to vector<8x8xf32>
    %592 = arith.select %590, %586, %591 : vector<8x8xi1>, vector<8x8xf32>
    %cst_244 = arith.constant dense<0xFF800000> : vector<8xf32>
    %593 = vector.multi_reduction <maximumf>, %592, %cst_244 [1] : vector<8x8xf32> to vector<8xf32>
    %594 = vector.shape_cast %593 : vector<8xf32> to vector<8x1xf32>
    %595 = vector.broadcast %594 : vector<8x1xf32> to vector<8x8xf32>
    %596 = arith.subf %592, %595 : vector<8x8xf32>
    %597 = math.exp %596 : vector<8x8xf32>
    %cst_245 = arith.constant dense<0.000000e+00> : vector<8xf32>
    %598 = vector.multi_reduction <add>, %597, %cst_245 [1] : vector<8x8xf32> to vector<8xf32>
    %599 = vector.shape_cast %598 : vector<8xf32> to vector<8x1xf32>
    %600 = tpu.reciprocal %599 {approx = true} : vector<8x1xf32> -> vector<8x1xf32>
    %601 = vector.broadcast %600 : vector<8x1xf32> to vector<8x8xf32>
    %602 = arith.mulf %597, %601 : vector<8x8xf32>
    %cst_246 = arith.constant dense<0.000000e+00> : vector<8x8xf32>
    %603 = tpu.matmul %602, %585, %cst_246 {dimension_numbers = #tpu.dot_dimension_numbers<[1], [0], [0], [1], [0, 0, 1, 1], [], []>} : vector<8x8xf32>, vector<8x8xf32>, vector<8x8xf32> -> vector<8x8xf32>
    %604 = vector.extract_strided_slice %578 {offsets = [0, 8], sizes = [8, 8], strides = [1, 1]} : vector<8x96xf32> to vector<8x8xf32>
    %cst_247 = arith.constant 0.353553385 : f32
    %605 = vector.broadcast %cst_247 : f32 to vector<8x8xf32>
    %606 = arith.mulf %604, %605 : vector<8x8xf32>
    %607 = vector.extract_strided_slice %578 {offsets = [0, 40], sizes = [8, 8], strides = [1, 1]} : vector<8x96xf32> to vector<8x8xf32>
    %608 = vector.extract_strided_slice %578 {offsets = [0, 72], sizes = [8, 8], strides = [1, 1]} : vector<8x96xf32> to vector<8x8xf32>
    %cst_248 = arith.constant dense<0.000000e+00> : vector<8x8xf32>
    %609 = tpu.matmul %606, %607, %cst_248 {dimension_numbers = #tpu.dot_dimension_numbers<[1], [1], [0], [0], [0, 0, 1, 0], [], []>} : vector<8x8xf32>, vector<8x8xf32>, vector<8x8xf32> -> vector<8x8xf32>
    %cst_249 = arith.constant 0.000000e+00 : f32
    %610 = vector.broadcast %cst_249 : f32 to vector<1x8xf32>
    %611 = arith.cmpf ogt, %580, %610 : vector<1x8xf32>
    %cst_250 = arith.constant -1.000000e+09 : f32
    %612 = vector.shape_cast %611 : vector<1x8xi1> to vector<1x8xi1>
    %613 = vector.broadcast %612 : vector<1x8xi1> to vector<8x8xi1>
    %614 = vector.broadcast %cst_250 : f32 to vector<8x8xf32>
    %615 = arith.select %613, %609, %614 : vector<8x8xi1>, vector<8x8xf32>
    %cst_251 = arith.constant dense<0xFF800000> : vector<8xf32>
    %616 = vector.multi_reduction <maximumf>, %615, %cst_251 [1] : vector<8x8xf32> to vector<8xf32>
    %617 = vector.shape_cast %616 : vector<8xf32> to vector<8x1xf32>
    %618 = vector.broadcast %617 : vector<8x1xf32> to vector<8x8xf32>
    %619 = arith.subf %615, %618 : vector<8x8xf32>
    %620 = math.exp %619 : vector<8x8xf32>
    %cst_252 = arith.constant dense<0.000000e+00> : vector<8xf32>
    %621 = vector.multi_reduction <add>, %620, %cst_252 [1] : vector<8x8xf32> to vector<8xf32>
    %622 = vector.shape_cast %621 : vector<8xf32> to vector<8x1xf32>
    %623 = tpu.reciprocal %622 {approx = true} : vector<8x1xf32> -> vector<8x1xf32>
    %624 = vector.broadcast %623 : vector<8x1xf32> to vector<8x8xf32>
    %625 = arith.mulf %620, %624 : vector<8x8xf32>
    %cst_253 = arith.constant dense<0.000000e+00> : vector<8x8xf32>
    %626 = tpu.matmul %625, %608, %cst_253 {dimension_numbers = #tpu.dot_dimension_numbers<[1], [0], [0], [1], [0, 0, 1, 1], [], []>} : vector<8x8xf32>, vector<8x8xf32>, vector<8x8xf32> -> vector<8x8xf32>
    %627 = vector.extract_strided_slice %578 {offsets = [0, 16], sizes = [8, 8], strides = [1, 1]} : vector<8x96xf32> to vector<8x8xf32>
    %cst_254 = arith.constant 0.353553385 : f32
    %628 = vector.broadcast %cst_254 : f32 to vector<8x8xf32>
    %629 = arith.mulf %627, %628 : vector<8x8xf32>
    %630 = vector.extract_strided_slice %578 {offsets = [0, 48], sizes = [8, 8], strides = [1, 1]} : vector<8x96xf32> to vector<8x8xf32>
    %631 = vector.extract_strided_slice %578 {offsets = [0, 80], sizes = [8, 8], strides = [1, 1]} : vector<8x96xf32> to vector<8x8xf32>
    %cst_255 = arith.constant dense<0.000000e+00> : vector<8x8xf32>
    %632 = tpu.matmul %629, %630, %cst_255 {dimension_numbers = #tpu.dot_dimension_numbers<[1], [1], [0], [0], [0, 0, 1, 0], [], []>} : vector<8x8xf32>, vector<8x8xf32>, vector<8x8xf32> -> vector<8x8xf32>
    %cst_256 = arith.constant 0.000000e+00 : f32
    %633 = vector.broadcast %cst_256 : f32 to vector<1x8xf32>
    %634 = arith.cmpf ogt, %580, %633 : vector<1x8xf32>
    %cst_257 = arith.constant -1.000000e+09 : f32
    %635 = vector.shape_cast %634 : vector<1x8xi1> to vector<1x8xi1>
    %636 = vector.broadcast %635 : vector<1x8xi1> to vector<8x8xi1>
    %637 = vector.broadcast %cst_257 : f32 to vector<8x8xf32>
    %638 = arith.select %636, %632, %637 : vector<8x8xi1>, vector<8x8xf32>
    %cst_258 = arith.constant dense<0xFF800000> : vector<8xf32>
    %639 = vector.multi_reduction <maximumf>, %638, %cst_258 [1] : vector<8x8xf32> to vector<8xf32>
    %640 = vector.shape_cast %639 : vector<8xf32> to vector<8x1xf32>
    %641 = vector.broadcast %640 : vector<8x1xf32> to vector<8x8xf32>
    %642 = arith.subf %638, %641 : vector<8x8xf32>
    %643 = math.exp %642 : vector<8x8xf32>
    %cst_259 = arith.constant dense<0.000000e+00> : vector<8xf32>
    %644 = vector.multi_reduction <add>, %643, %cst_259 [1] : vector<8x8xf32> to vector<8xf32>
    %645 = vector.shape_cast %644 : vector<8xf32> to vector<8x1xf32>
    %646 = tpu.reciprocal %645 {approx = true} : vector<8x1xf32> -> vector<8x1xf32>
    %647 = vector.broadcast %646 : vector<8x1xf32> to vector<8x8xf32>
    %648 = arith.mulf %643, %647 : vector<8x8xf32>
    %cst_260 = arith.constant dense<0.000000e+00> : vector<8x8xf32>
    %649 = tpu.matmul %648, %631, %cst_260 {dimension_numbers = #tpu.dot_dimension_numbers<[1], [0], [0], [1], [0, 0, 1, 1], [], []>} : vector<8x8xf32>, vector<8x8xf32>, vector<8x8xf32> -> vector<8x8xf32>
    %650 = vector.extract_strided_slice %578 {offsets = [0, 24], sizes = [8, 8], strides = [1, 1]} : vector<8x96xf32> to vector<8x8xf32>
    %cst_261 = arith.constant 0.353553385 : f32
    %651 = vector.broadcast %cst_261 : f32 to vector<8x8xf32>
    %652 = arith.mulf %650, %651 : vector<8x8xf32>
    %653 = vector.extract_strided_slice %578 {offsets = [0, 56], sizes = [8, 8], strides = [1, 1]} : vector<8x96xf32> to vector<8x8xf32>
    %654 = vector.extract_strided_slice %578 {offsets = [0, 88], sizes = [8, 8], strides = [1, 1]} : vector<8x96xf32> to vector<8x8xf32>
    %cst_262 = arith.constant dense<0.000000e+00> : vector<8x8xf32>
    %655 = tpu.matmul %652, %653, %cst_262 {dimension_numbers = #tpu.dot_dimension_numbers<[1], [1], [0], [0], [0, 0, 1, 0], [], []>} : vector<8x8xf32>, vector<8x8xf32>, vector<8x8xf32> -> vector<8x8xf32>
    %cst_263 = arith.constant 0.000000e+00 : f32
    %656 = vector.broadcast %cst_263 : f32 to vector<1x8xf32>
    %657 = arith.cmpf ogt, %580, %656 : vector<1x8xf32>
    %cst_264 = arith.constant -1.000000e+09 : f32
    %658 = vector.shape_cast %657 : vector<1x8xi1> to vector<1x8xi1>
    %659 = vector.broadcast %658 : vector<1x8xi1> to vector<8x8xi1>
    %660 = vector.broadcast %cst_264 : f32 to vector<8x8xf32>
    %661 = arith.select %659, %655, %660 : vector<8x8xi1>, vector<8x8xf32>
    %cst_265 = arith.constant dense<0xFF800000> : vector<8xf32>
    %662 = vector.multi_reduction <maximumf>, %661, %cst_265 [1] : vector<8x8xf32> to vector<8xf32>
    %663 = vector.shape_cast %662 : vector<8xf32> to vector<8x1xf32>
    %664 = vector.broadcast %663 : vector<8x1xf32> to vector<8x8xf32>
    %665 = arith.subf %661, %664 : vector<8x8xf32>
    %666 = math.exp %665 : vector<8x8xf32>
    %cst_266 = arith.constant dense<0.000000e+00> : vector<8xf32>
    %667 = vector.multi_reduction <add>, %666, %cst_266 [1] : vector<8x8xf32> to vector<8xf32>
    %668 = vector.shape_cast %667 : vector<8xf32> to vector<8x1xf32>
    %669 = tpu.reciprocal %668 {approx = true} : vector<8x1xf32> -> vector<8x1xf32>
    %670 = vector.broadcast %669 : vector<8x1xf32> to vector<8x8xf32>
    %671 = arith.mulf %666, %670 : vector<8x8xf32>
    %cst_267 = arith.constant dense<0.000000e+00> : vector<8x8xf32>
    %672 = tpu.matmul %671, %654, %cst_267 {dimension_numbers = #tpu.dot_dimension_numbers<[1], [0], [0], [1], [0, 0, 1, 1], [], []>} : vector<8x8xf32>, vector<8x8xf32>, vector<8x8xf32> -> vector<8x8xf32>
    %673 = tpu.concatenate %603, %626, %649, %672 in 1 : vector<8x8xf32>, vector<8x8xf32>, vector<8x8xf32>, vector<8x8xf32> -> vector<8x32xf32>
    %674 = vector.extract_strided_slice %577 {offsets = [8, 0], sizes = [8, 96], strides = [1, 1]} : vector<16x96xf32> to vector<8x96xf32>
    %c1_268 = arith.constant 1 : index
    %c0_269 = arith.constant 0 : index
    %c0_270 = arith.constant 0 : index
    %675 = vector.load %arg3[%c1_268, %c0_269, %c0_270] : memref<2x1x8xf32, #tpu.memory_space<vmem>>, vector<1x1x8xf32>
    %676 = vector.shape_cast %675 : vector<1x1x8xf32> to vector<1x8xf32>
    %677 = vector.extract_strided_slice %674 {offsets = [0, 0], sizes = [8, 8], strides = [1, 1]} : vector<8x96xf32> to vector<8x8xf32>
    %cst_271 = arith.constant 0.353553385 : f32
    %678 = vector.broadcast %cst_271 : f32 to vector<8x8xf32>
    %679 = arith.mulf %677, %678 : vector<8x8xf32>
    %680 = vector.extract_strided_slice %674 {offsets = [0, 32], sizes = [8, 8], strides = [1, 1]} : vector<8x96xf32> to vector<8x8xf32>
    %681 = vector.extract_strided_slice %674 {offsets = [0, 64], sizes = [8, 8], strides = [1, 1]} : vector<8x96xf32> to vector<8x8xf32>
    %cst_272 = arith.constant dense<0.000000e+00> : vector<8x8xf32>
    %682 = tpu.matmul %679, %680, %cst_272 {dimension_numbers = #tpu.dot_dimension_numbers<[1], [1], [0], [0], [0, 0, 1, 0], [], []>} : vector<8x8xf32>, vector<8x8xf32>, vector<8x8xf32> -> vector<8x8xf32>
    %cst_273 = arith.constant 0.000000e+00 : f32
    %683 = vector.broadcast %cst_273 : f32 to vector<1x8xf32>
    %684 = arith.cmpf ogt, %676, %683 : vector<1x8xf32>
    %cst_274 = arith.constant -1.000000e+09 : f32
    %685 = vector.shape_cast %684 : vector<1x8xi1> to vector<1x8xi1>
    %686 = vector.broadcast %685 : vector<1x8xi1> to vector<8x8xi1>
    %687 = vector.broadcast %cst_274 : f32 to vector<8x8xf32>
    %688 = arith.select %686, %682, %687 : vector<8x8xi1>, vector<8x8xf32>
    %cst_275 = arith.constant dense<0xFF800000> : vector<8xf32>
    %689 = vector.multi_reduction <maximumf>, %688, %cst_275 [1] : vector<8x8xf32> to vector<8xf32>
    %690 = vector.shape_cast %689 : vector<8xf32> to vector<8x1xf32>
    %691 = vector.broadcast %690 : vector<8x1xf32> to vector<8x8xf32>
    %692 = arith.subf %688, %691 : vector<8x8xf32>
    %693 = math.exp %692 : vector<8x8xf32>
    %cst_276 = arith.constant dense<0.000000e+00> : vector<8xf32>
    %694 = vector.multi_reduction <add>, %693, %cst_276 [1] : vector<8x8xf32> to vector<8xf32>
    %695 = vector.shape_cast %694 : vector<8xf32> to vector<8x1xf32>
    %696 = tpu.reciprocal %695 {approx = true} : vector<8x1xf32> -> vector<8x1xf32>
    %697 = vector.broadcast %696 : vector<8x1xf32> to vector<8x8xf32>
    %698 = arith.mulf %693, %697 : vector<8x8xf32>
    %cst_277 = arith.constant dense<0.000000e+00> : vector<8x8xf32>
    %699 = tpu.matmul %698, %681, %cst_277 {dimension_numbers = #tpu.dot_dimension_numbers<[1], [0], [0], [1], [0, 0, 1, 1], [], []>} : vector<8x8xf32>, vector<8x8xf32>, vector<8x8xf32> -> vector<8x8xf32>
    %700 = vector.extract_strided_slice %674 {offsets = [0, 8], sizes = [8, 8], strides = [1, 1]} : vector<8x96xf32> to vector<8x8xf32>
    %cst_278 = arith.constant 0.353553385 : f32
    %701 = vector.broadcast %cst_278 : f32 to vector<8x8xf32>
    %702 = arith.mulf %700, %701 : vector<8x8xf32>
    %703 = vector.extract_strided_slice %674 {offsets = [0, 40], sizes = [8, 8], strides = [1, 1]} : vector<8x96xf32> to vector<8x8xf32>
    %704 = vector.extract_strided_slice %674 {offsets = [0, 72], sizes = [8, 8], strides = [1, 1]} : vector<8x96xf32> to vector<8x8xf32>
    %cst_279 = arith.constant dense<0.000000e+00> : vector<8x8xf32>
    %705 = tpu.matmul %702, %703, %cst_279 {dimension_numbers = #tpu.dot_dimension_numbers<[1], [1], [0], [0], [0, 0, 1, 0], [], []>} : vector<8x8xf32>, vector<8x8xf32>, vector<8x8xf32> -> vector<8x8xf32>
    %cst_280 = arith.constant 0.000000e+00 : f32
    %706 = vector.broadcast %cst_280 : f32 to vector<1x8xf32>
    %707 = arith.cmpf ogt, %676, %706 : vector<1x8xf32>
    %cst_281 = arith.constant -1.000000e+09 : f32
    %708 = vector.shape_cast %707 : vector<1x8xi1> to vector<1x8xi1>
    %709 = vector.broadcast %708 : vector<1x8xi1> to vector<8x8xi1>
    %710 = vector.broadcast %cst_281 : f32 to vector<8x8xf32>
    %711 = arith.select %709, %705, %710 : vector<8x8xi1>, vector<8x8xf32>
    %cst_282 = arith.constant dense<0xFF800000> : vector<8xf32>
    %712 = vector.multi_reduction <maximumf>, %711, %cst_282 [1] : vector<8x8xf32> to vector<8xf32>
    %713 = vector.shape_cast %712 : vector<8xf32> to vector<8x1xf32>
    %714 = vector.broadcast %713 : vector<8x1xf32> to vector<8x8xf32>
    %715 = arith.subf %711, %714 : vector<8x8xf32>
    %716 = math.exp %715 : vector<8x8xf32>
    %cst_283 = arith.constant dense<0.000000e+00> : vector<8xf32>
    %717 = vector.multi_reduction <add>, %716, %cst_283 [1] : vector<8x8xf32> to vector<8xf32>
    %718 = vector.shape_cast %717 : vector<8xf32> to vector<8x1xf32>
    %719 = tpu.reciprocal %718 {approx = true} : vector<8x1xf32> -> vector<8x1xf32>
    %720 = vector.broadcast %719 : vector<8x1xf32> to vector<8x8xf32>
    %721 = arith.mulf %716, %720 : vector<8x8xf32>
    %cst_284 = arith.constant dense<0.000000e+00> : vector<8x8xf32>
    %722 = tpu.matmul %721, %704, %cst_284 {dimension_numbers = #tpu.dot_dimension_numbers<[1], [0], [0], [1], [0, 0, 1, 1], [], []>} : vector<8x8xf32>, vector<8x8xf32>, vector<8x8xf32> -> vector<8x8xf32>
    %723 = vector.extract_strided_slice %674 {offsets = [0, 16], sizes = [8, 8], strides = [1, 1]} : vector<8x96xf32> to vector<8x8xf32>
    %cst_285 = arith.constant 0.353553385 : f32
    %724 = vector.broadcast %cst_285 : f32 to vector<8x8xf32>
    %725 = arith.mulf %723, %724 : vector<8x8xf32>
    %726 = vector.extract_strided_slice %674 {offsets = [0, 48], sizes = [8, 8], strides = [1, 1]} : vector<8x96xf32> to vector<8x8xf32>
    %727 = vector.extract_strided_slice %674 {offsets = [0, 80], sizes = [8, 8], strides = [1, 1]} : vector<8x96xf32> to vector<8x8xf32>
    %cst_286 = arith.constant dense<0.000000e+00> : vector<8x8xf32>
    %728 = tpu.matmul %725, %726, %cst_286 {dimension_numbers = #tpu.dot_dimension_numbers<[1], [1], [0], [0], [0, 0, 1, 0], [], []>} : vector<8x8xf32>, vector<8x8xf32>, vector<8x8xf32> -> vector<8x8xf32>
    %cst_287 = arith.constant 0.000000e+00 : f32
    %729 = vector.broadcast %cst_287 : f32 to vector<1x8xf32>
    %730 = arith.cmpf ogt, %676, %729 : vector<1x8xf32>
    %cst_288 = arith.constant -1.000000e+09 : f32
    %731 = vector.shape_cast %730 : vector<1x8xi1> to vector<1x8xi1>
    %732 = vector.broadcast %731 : vector<1x8xi1> to vector<8x8xi1>
    %733 = vector.broadcast %cst_288 : f32 to vector<8x8xf32>
    %734 = arith.select %732, %728, %733 : vector<8x8xi1>, vector<8x8xf32>
    %cst_289 = arith.constant dense<0xFF800000> : vector<8xf32>
    %735 = vector.multi_reduction <maximumf>, %734, %cst_289 [1] : vector<8x8xf32> to vector<8xf32>
    %736 = vector.shape_cast %735 : vector<8xf32> to vector<8x1xf32>
    %737 = vector.broadcast %736 : vector<8x1xf32> to vector<8x8xf32>
    %738 = arith.subf %734, %737 : vector<8x8xf32>
    %739 = math.exp %738 : vector<8x8xf32>
    %cst_290 = arith.constant dense<0.000000e+00> : vector<8xf32>
    %740 = vector.multi_reduction <add>, %739, %cst_290 [1] : vector<8x8xf32> to vector<8xf32>
    %741 = vector.shape_cast %740 : vector<8xf32> to vector<8x1xf32>
    %742 = tpu.reciprocal %741 {approx = true} : vector<8x1xf32> -> vector<8x1xf32>
    %743 = vector.broadcast %742 : vector<8x1xf32> to vector<8x8xf32>
    %744 = arith.mulf %739, %743 : vector<8x8xf32>
    %cst_291 = arith.constant dense<0.000000e+00> : vector<8x8xf32>
    %745 = tpu.matmul %744, %727, %cst_291 {dimension_numbers = #tpu.dot_dimension_numbers<[1], [0], [0], [1], [0, 0, 1, 1], [], []>} : vector<8x8xf32>, vector<8x8xf32>, vector<8x8xf32> -> vector<8x8xf32>
    %746 = vector.extract_strided_slice %674 {offsets = [0, 24], sizes = [8, 8], strides = [1, 1]} : vector<8x96xf32> to vector<8x8xf32>
    %cst_292 = arith.constant 0.353553385 : f32
    %747 = vector.broadcast %cst_292 : f32 to vector<8x8xf32>
    %748 = arith.mulf %746, %747 : vector<8x8xf32>
    %749 = vector.extract_strided_slice %674 {offsets = [0, 56], sizes = [8, 8], strides = [1, 1]} : vector<8x96xf32> to vector<8x8xf32>
    %750 = vector.extract_strided_slice %674 {offsets = [0, 88], sizes = [8, 8], strides = [1, 1]} : vector<8x96xf32> to vector<8x8xf32>
    %cst_293 = arith.constant dense<0.000000e+00> : vector<8x8xf32>
    %751 = tpu.matmul %748, %749, %cst_293 {dimension_numbers = #tpu.dot_dimension_numbers<[1], [1], [0], [0], [0, 0, 1, 0], [], []>} : vector<8x8xf32>, vector<8x8xf32>, vector<8x8xf32> -> vector<8x8xf32>
    %cst_294 = arith.constant 0.000000e+00 : f32
    %752 = vector.broadcast %cst_294 : f32 to vector<1x8xf32>
    %753 = arith.cmpf ogt, %676, %752 : vector<1x8xf32>
    %cst_295 = arith.constant -1.000000e+09 : f32
    %754 = vector.shape_cast %753 : vector<1x8xi1> to vector<1x8xi1>
    %755 = vector.broadcast %754 : vector<1x8xi1> to vector<8x8xi1>
    %756 = vector.broadcast %cst_295 : f32 to vector<8x8xf32>
    %757 = arith.select %755, %751, %756 : vector<8x8xi1>, vector<8x8xf32>
    %cst_296 = arith.constant dense<0xFF800000> : vector<8xf32>
    %758 = vector.multi_reduction <maximumf>, %757, %cst_296 [1] : vector<8x8xf32> to vector<8xf32>
    %759 = vector.shape_cast %758 : vector<8xf32> to vector<8x1xf32>
    %760 = vector.broadcast %759 : vector<8x1xf32> to vector<8x8xf32>
    %761 = arith.subf %757, %760 : vector<8x8xf32>
    %762 = math.exp %761 : vector<8x8xf32>
    %cst_297 = arith.constant dense<0.000000e+00> : vector<8xf32>
    %763 = vector.multi_reduction <add>, %762, %cst_297 [1] : vector<8x8xf32> to vector<8xf32>
    %764 = vector.shape_cast %763 : vector<8xf32> to vector<8x1xf32>
    %765 = tpu.reciprocal %764 {approx = true} : vector<8x1xf32> -> vector<8x1xf32>
    %766 = vector.broadcast %765 : vector<8x1xf32> to vector<8x8xf32>
    %767 = arith.mulf %762, %766 : vector<8x8xf32>
    %cst_298 = arith.constant dense<0.000000e+00> : vector<8x8xf32>
    %768 = tpu.matmul %767, %750, %cst_298 {dimension_numbers = #tpu.dot_dimension_numbers<[1], [0], [0], [1], [0, 0, 1, 1], [], []>} : vector<8x8xf32>, vector<8x8xf32>, vector<8x8xf32> -> vector<8x8xf32>
    %769 = tpu.concatenate %699, %722, %745, %768 in 1 : vector<8x8xf32>, vector<8x8xf32>, vector<8x8xf32>, vector<8x8xf32> -> vector<8x32xf32>
    %770 = tpu.concatenate %673, %769 in 0 : vector<8x32xf32>, vector<8x32xf32> -> vector<16x32xf32>
    %c2_299 = arith.constant 2 : index
    %c0_300 = arith.constant 0 : index
    %c0_301 = arith.constant 0 : index
    %771 = vector.load %arg11[%c2_299, %c0_300, %c0_301] : memref<4x32x32xf32, #tpu.memory_space<vmem>>, vector<1x32x32xf32>
    %772 = vector.shape_cast %771 : vector<1x32x32xf32> to vector<32x32xf32>
    %cst_302 = arith.constant dense<0.000000e+00> : vector<16x32xf32>
    %773 = tpu.matmul %770, %772, %cst_302 {dimension_numbers = #tpu.dot_dimension_numbers<[1], [0], [0], [1], [0, 0, 1, 1], [], []>} : vector<16x32xf32>, vector<32x32xf32>, vector<16x32xf32> -> vector<16x32xf32>
    %774 = arith.addf %773, %574 : vector<16x32xf32>
    %c2_303 = arith.constant 2 : index
    %c0_304 = arith.constant 0 : index
    %c0_305 = arith.constant 0 : index
    %775 = vector.load %arg12[%c2_303, %c0_304, %c0_305] : memref<4x1x32xf32, #tpu.memory_space<vmem>>, vector<1x1x32xf32>
    %776 = vector.shape_cast %775 : vector<1x1x32xf32> to vector<1x32xf32>
    %c2_306 = arith.constant 2 : index
    %c0_307 = arith.constant 0 : index
    %c0_308 = arith.constant 0 : index
    %777 = vector.load %arg13[%c2_306, %c0_307, %c0_308] : memref<4x1x32xf32, #tpu.memory_space<vmem>>, vector<1x1x32xf32>
    %778 = vector.shape_cast %777 : vector<1x1x32xf32> to vector<1x32xf32>
    %cst_309 = arith.constant dense<0.000000e+00> : vector<16xf32>
    %779 = vector.multi_reduction <add>, %774, %cst_309 [1] : vector<16x32xf32> to vector<16xf32>
    %780 = vector.shape_cast %779 : vector<16xf32> to vector<16x1xf32>
    %cst_310 = arith.constant 3.200000e+01 : f32
    %781 = vector.broadcast %cst_310 : f32 to vector<16x1xf32>
    %782 = arith.divf %780, %781 : vector<16x1xf32>
    %783 = vector.broadcast %782 : vector<16x1xf32> to vector<16x32xf32>
    %784 = arith.subf %774, %783 : vector<16x32xf32>
    %785 = arith.mulf %784, %784 : vector<16x32xf32>
    %cst_311 = arith.constant dense<0.000000e+00> : vector<16xf32>
    %786 = vector.multi_reduction <add>, %785, %cst_311 [1] : vector<16x32xf32> to vector<16xf32>
    %787 = vector.shape_cast %786 : vector<16xf32> to vector<16x1xf32>
    %cst_312 = arith.constant 3.200000e+01 : f32
    %788 = vector.broadcast %cst_312 : f32 to vector<16x1xf32>
    %789 = arith.divf %787, %788 : vector<16x1xf32>
    %790 = vector.broadcast %782 : vector<16x1xf32> to vector<16x32xf32>
    %791 = arith.subf %774, %790 : vector<16x32xf32>
    %cst_313 = arith.constant 9.99999997E-7 : f32
    %792 = vector.broadcast %cst_313 : f32 to vector<16x1xf32>
    %793 = arith.addf %789, %792 : vector<16x1xf32>
    %794 = math.rsqrt %793 : vector<16x1xf32>
    %795 = vector.broadcast %794 : vector<16x1xf32> to vector<16x32xf32>
    %796 = arith.mulf %791, %795 : vector<16x32xf32>
    %797 = vector.broadcast %776 : vector<1x32xf32> to vector<16x32xf32>
    %798 = arith.mulf %796, %797 : vector<16x32xf32>
    %799 = vector.broadcast %778 : vector<1x32xf32> to vector<16x32xf32>
    %800 = arith.addf %798, %799 : vector<16x32xf32>
    %c2_314 = arith.constant 2 : index
    %c0_315 = arith.constant 0 : index
    %c0_316 = arith.constant 0 : index
    %801 = vector.load %arg14[%c2_314, %c0_315, %c0_316] : memref<4x32x64xf32, #tpu.memory_space<vmem>>, vector<1x32x64xf32>
    %802 = vector.shape_cast %801 : vector<1x32x64xf32> to vector<32x64xf32>
    %cst_317 = arith.constant dense<0.000000e+00> : vector<16x64xf32>
    %803 = tpu.matmul %800, %802, %cst_317 {dimension_numbers = #tpu.dot_dimension_numbers<[1], [0], [0], [1], [0, 0, 1, 1], [], []>} : vector<16x32xf32>, vector<32x64xf32>, vector<16x64xf32> -> vector<16x64xf32>
    %c2_318 = arith.constant 2 : index
    %c0_319 = arith.constant 0 : index
    %c0_320 = arith.constant 0 : index
    %804 = vector.load %arg15[%c2_318, %c0_319, %c0_320] : memref<4x1x64xf32, #tpu.memory_space<vmem>>, vector<1x1x64xf32>
    %805 = vector.shape_cast %804 : vector<1x1x64xf32> to vector<1x64xf32>
    %806 = vector.broadcast %805 : vector<1x64xf32> to vector<16x64xf32>
    %807 = arith.addf %803, %806 : vector<16x64xf32>
    %cst_321 = arith.constant 0.000000e+00 : f32
    %808 = vector.broadcast %cst_321 : f32 to vector<16x64xf32>
    %809 = arith.maximumf %807, %808 : vector<16x64xf32>
    %c2_322 = arith.constant 2 : index
    %c0_323 = arith.constant 0 : index
    %c0_324 = arith.constant 0 : index
    %810 = vector.load %arg16[%c2_322, %c0_323, %c0_324] : memref<4x64x32xf32, #tpu.memory_space<vmem>>, vector<1x64x32xf32>
    %811 = vector.shape_cast %810 : vector<1x64x32xf32> to vector<64x32xf32>
    %cst_325 = arith.constant dense<0.000000e+00> : vector<16x32xf32>
    %812 = tpu.matmul %809, %811, %cst_325 {dimension_numbers = #tpu.dot_dimension_numbers<[1], [0], [0], [1], [0, 0, 1, 1], [], []>} : vector<16x64xf32>, vector<64x32xf32>, vector<16x32xf32> -> vector<16x32xf32>
    %c2_326 = arith.constant 2 : index
    %c0_327 = arith.constant 0 : index
    %c0_328 = arith.constant 0 : index
    %813 = vector.load %arg17[%c2_326, %c0_327, %c0_328] : memref<4x1x32xf32, #tpu.memory_space<vmem>>, vector<1x1x32xf32>
    %814 = vector.shape_cast %813 : vector<1x1x32xf32> to vector<1x32xf32>
    %815 = vector.broadcast %814 : vector<1x32xf32> to vector<16x32xf32>
    %816 = arith.addf %812, %815 : vector<16x32xf32>
    %817 = arith.addf %816, %800 : vector<16x32xf32>
    %c2_329 = arith.constant 2 : index
    %c0_330 = arith.constant 0 : index
    %c0_331 = arith.constant 0 : index
    %818 = vector.load %arg18[%c2_329, %c0_330, %c0_331] : memref<4x1x32xf32, #tpu.memory_space<vmem>>, vector<1x1x32xf32>
    %819 = vector.shape_cast %818 : vector<1x1x32xf32> to vector<1x32xf32>
    %c2_332 = arith.constant 2 : index
    %c0_333 = arith.constant 0 : index
    %c0_334 = arith.constant 0 : index
    %820 = vector.load %arg19[%c2_332, %c0_333, %c0_334] : memref<4x1x32xf32, #tpu.memory_space<vmem>>, vector<1x1x32xf32>
    %821 = vector.shape_cast %820 : vector<1x1x32xf32> to vector<1x32xf32>
    %cst_335 = arith.constant dense<0.000000e+00> : vector<16xf32>
    %822 = vector.multi_reduction <add>, %817, %cst_335 [1] : vector<16x32xf32> to vector<16xf32>
    %823 = vector.shape_cast %822 : vector<16xf32> to vector<16x1xf32>
    %cst_336 = arith.constant 3.200000e+01 : f32
    %824 = vector.broadcast %cst_336 : f32 to vector<16x1xf32>
    %825 = arith.divf %823, %824 : vector<16x1xf32>
    %826 = vector.broadcast %825 : vector<16x1xf32> to vector<16x32xf32>
    %827 = arith.subf %817, %826 : vector<16x32xf32>
    %828 = arith.mulf %827, %827 : vector<16x32xf32>
    %cst_337 = arith.constant dense<0.000000e+00> : vector<16xf32>
    %829 = vector.multi_reduction <add>, %828, %cst_337 [1] : vector<16x32xf32> to vector<16xf32>
    %830 = vector.shape_cast %829 : vector<16xf32> to vector<16x1xf32>
    %cst_338 = arith.constant 3.200000e+01 : f32
    %831 = vector.broadcast %cst_338 : f32 to vector<16x1xf32>
    %832 = arith.divf %830, %831 : vector<16x1xf32>
    %833 = vector.broadcast %825 : vector<16x1xf32> to vector<16x32xf32>
    %834 = arith.subf %817, %833 : vector<16x32xf32>
    %cst_339 = arith.constant 9.99999997E-7 : f32
    %835 = vector.broadcast %cst_339 : f32 to vector<16x1xf32>
    %836 = arith.addf %832, %835 : vector<16x1xf32>
    %837 = math.rsqrt %836 : vector<16x1xf32>
    %838 = vector.broadcast %837 : vector<16x1xf32> to vector<16x32xf32>
    %839 = arith.mulf %834, %838 : vector<16x32xf32>
    %840 = vector.broadcast %819 : vector<1x32xf32> to vector<16x32xf32>
    %841 = arith.mulf %839, %840 : vector<16x32xf32>
    %842 = vector.broadcast %821 : vector<1x32xf32> to vector<16x32xf32>
    %843 = arith.addf %841, %842 : vector<16x32xf32>
    %c3 = arith.constant 3 : index
    %c0_340 = arith.constant 0 : index
    %c0_341 = arith.constant 0 : index
    %844 = vector.load %arg10[%c3, %c0_340, %c0_341] : memref<4x32x96xf32, #tpu.memory_space<vmem>>, vector<1x32x96xf32>
    %845 = vector.shape_cast %844 : vector<1x32x96xf32> to vector<32x96xf32>
    %cst_342 = arith.constant dense<0.000000e+00> : vector<16x96xf32>
    %846 = tpu.matmul %843, %845, %cst_342 {dimension_numbers = #tpu.dot_dimension_numbers<[1], [0], [0], [1], [0, 0, 1, 1], [], []>} : vector<16x32xf32>, vector<32x96xf32>, vector<16x96xf32> -> vector<16x96xf32>
    %847 = vector.extract_strided_slice %846 {offsets = [0, 0], sizes = [8, 96], strides = [1, 1]} : vector<16x96xf32> to vector<8x96xf32>
    %c0_343 = arith.constant 0 : index
    %c0_344 = arith.constant 0 : index
    %c0_345 = arith.constant 0 : index
    %848 = vector.load %arg3[%c0_343, %c0_344, %c0_345] : memref<2x1x8xf32, #tpu.memory_space<vmem>>, vector<1x1x8xf32>
    %849 = vector.shape_cast %848 : vector<1x1x8xf32> to vector<1x8xf32>
    %850 = vector.extract_strided_slice %847 {offsets = [0, 0], sizes = [8, 8], strides = [1, 1]} : vector<8x96xf32> to vector<8x8xf32>
    %cst_346 = arith.constant 0.353553385 : f32
    %851 = vector.broadcast %cst_346 : f32 to vector<8x8xf32>
    %852 = arith.mulf %850, %851 : vector<8x8xf32>
    %853 = vector.extract_strided_slice %847 {offsets = [0, 32], sizes = [8, 8], strides = [1, 1]} : vector<8x96xf32> to vector<8x8xf32>
    %854 = vector.extract_strided_slice %847 {offsets = [0, 64], sizes = [8, 8], strides = [1, 1]} : vector<8x96xf32> to vector<8x8xf32>
    %cst_347 = arith.constant dense<0.000000e+00> : vector<8x8xf32>
    %855 = tpu.matmul %852, %853, %cst_347 {dimension_numbers = #tpu.dot_dimension_numbers<[1], [1], [0], [0], [0, 0, 1, 0], [], []>} : vector<8x8xf32>, vector<8x8xf32>, vector<8x8xf32> -> vector<8x8xf32>
    %cst_348 = arith.constant 0.000000e+00 : f32
    %856 = vector.broadcast %cst_348 : f32 to vector<1x8xf32>
    %857 = arith.cmpf ogt, %849, %856 : vector<1x8xf32>
    %cst_349 = arith.constant -1.000000e+09 : f32
    %858 = vector.shape_cast %857 : vector<1x8xi1> to vector<1x8xi1>
    %859 = vector.broadcast %858 : vector<1x8xi1> to vector<8x8xi1>
    %860 = vector.broadcast %cst_349 : f32 to vector<8x8xf32>
    %861 = arith.select %859, %855, %860 : vector<8x8xi1>, vector<8x8xf32>
    %cst_350 = arith.constant dense<0xFF800000> : vector<8xf32>
    %862 = vector.multi_reduction <maximumf>, %861, %cst_350 [1] : vector<8x8xf32> to vector<8xf32>
    %863 = vector.shape_cast %862 : vector<8xf32> to vector<8x1xf32>
    %864 = vector.broadcast %863 : vector<8x1xf32> to vector<8x8xf32>
    %865 = arith.subf %861, %864 : vector<8x8xf32>
    %866 = math.exp %865 : vector<8x8xf32>
    %cst_351 = arith.constant dense<0.000000e+00> : vector<8xf32>
    %867 = vector.multi_reduction <add>, %866, %cst_351 [1] : vector<8x8xf32> to vector<8xf32>
    %868 = vector.shape_cast %867 : vector<8xf32> to vector<8x1xf32>
    %869 = tpu.reciprocal %868 {approx = true} : vector<8x1xf32> -> vector<8x1xf32>
    %870 = vector.broadcast %869 : vector<8x1xf32> to vector<8x8xf32>
    %871 = arith.mulf %866, %870 : vector<8x8xf32>
    %cst_352 = arith.constant dense<0.000000e+00> : vector<8x8xf32>
    %872 = tpu.matmul %871, %854, %cst_352 {dimension_numbers = #tpu.dot_dimension_numbers<[1], [0], [0], [1], [0, 0, 1, 1], [], []>} : vector<8x8xf32>, vector<8x8xf32>, vector<8x8xf32> -> vector<8x8xf32>
    %873 = vector.extract_strided_slice %847 {offsets = [0, 8], sizes = [8, 8], strides = [1, 1]} : vector<8x96xf32> to vector<8x8xf32>
    %cst_353 = arith.constant 0.353553385 : f32
    %874 = vector.broadcast %cst_353 : f32 to vector<8x8xf32>
    %875 = arith.mulf %873, %874 : vector<8x8xf32>
    %876 = vector.extract_strided_slice %847 {offsets = [0, 40], sizes = [8, 8], strides = [1, 1]} : vector<8x96xf32> to vector<8x8xf32>
    %877 = vector.extract_strided_slice %847 {offsets = [0, 72], sizes = [8, 8], strides = [1, 1]} : vector<8x96xf32> to vector<8x8xf32>
    %cst_354 = arith.constant dense<0.000000e+00> : vector<8x8xf32>
    %878 = tpu.matmul %875, %876, %cst_354 {dimension_numbers = #tpu.dot_dimension_numbers<[1], [1], [0], [0], [0, 0, 1, 0], [], []>} : vector<8x8xf32>, vector<8x8xf32>, vector<8x8xf32> -> vector<8x8xf32>
    %cst_355 = arith.constant 0.000000e+00 : f32
    %879 = vector.broadcast %cst_355 : f32 to vector<1x8xf32>
    %880 = arith.cmpf ogt, %849, %879 : vector<1x8xf32>
    %cst_356 = arith.constant -1.000000e+09 : f32
    %881 = vector.shape_cast %880 : vector<1x8xi1> to vector<1x8xi1>
    %882 = vector.broadcast %881 : vector<1x8xi1> to vector<8x8xi1>
    %883 = vector.broadcast %cst_356 : f32 to vector<8x8xf32>
    %884 = arith.select %882, %878, %883 : vector<8x8xi1>, vector<8x8xf32>
    %cst_357 = arith.constant dense<0xFF800000> : vector<8xf32>
    %885 = vector.multi_reduction <maximumf>, %884, %cst_357 [1] : vector<8x8xf32> to vector<8xf32>
    %886 = vector.shape_cast %885 : vector<8xf32> to vector<8x1xf32>
    %887 = vector.broadcast %886 : vector<8x1xf32> to vector<8x8xf32>
    %888 = arith.subf %884, %887 : vector<8x8xf32>
    %889 = math.exp %888 : vector<8x8xf32>
    %cst_358 = arith.constant dense<0.000000e+00> : vector<8xf32>
    %890 = vector.multi_reduction <add>, %889, %cst_358 [1] : vector<8x8xf32> to vector<8xf32>
    %891 = vector.shape_cast %890 : vector<8xf32> to vector<8x1xf32>
    %892 = tpu.reciprocal %891 {approx = true} : vector<8x1xf32> -> vector<8x1xf32>
    %893 = vector.broadcast %892 : vector<8x1xf32> to vector<8x8xf32>
    %894 = arith.mulf %889, %893 : vector<8x8xf32>
    %cst_359 = arith.constant dense<0.000000e+00> : vector<8x8xf32>
    %895 = tpu.matmul %894, %877, %cst_359 {dimension_numbers = #tpu.dot_dimension_numbers<[1], [0], [0], [1], [0, 0, 1, 1], [], []>} : vector<8x8xf32>, vector<8x8xf32>, vector<8x8xf32> -> vector<8x8xf32>
    %896 = vector.extract_strided_slice %847 {offsets = [0, 16], sizes = [8, 8], strides = [1, 1]} : vector<8x96xf32> to vector<8x8xf32>
    %cst_360 = arith.constant 0.353553385 : f32
    %897 = vector.broadcast %cst_360 : f32 to vector<8x8xf32>
    %898 = arith.mulf %896, %897 : vector<8x8xf32>
    %899 = vector.extract_strided_slice %847 {offsets = [0, 48], sizes = [8, 8], strides = [1, 1]} : vector<8x96xf32> to vector<8x8xf32>
    %900 = vector.extract_strided_slice %847 {offsets = [0, 80], sizes = [8, 8], strides = [1, 1]} : vector<8x96xf32> to vector<8x8xf32>
    %cst_361 = arith.constant dense<0.000000e+00> : vector<8x8xf32>
    %901 = tpu.matmul %898, %899, %cst_361 {dimension_numbers = #tpu.dot_dimension_numbers<[1], [1], [0], [0], [0, 0, 1, 0], [], []>} : vector<8x8xf32>, vector<8x8xf32>, vector<8x8xf32> -> vector<8x8xf32>
    %cst_362 = arith.constant 0.000000e+00 : f32
    %902 = vector.broadcast %cst_362 : f32 to vector<1x8xf32>
    %903 = arith.cmpf ogt, %849, %902 : vector<1x8xf32>
    %cst_363 = arith.constant -1.000000e+09 : f32
    %904 = vector.shape_cast %903 : vector<1x8xi1> to vector<1x8xi1>
    %905 = vector.broadcast %904 : vector<1x8xi1> to vector<8x8xi1>
    %906 = vector.broadcast %cst_363 : f32 to vector<8x8xf32>
    %907 = arith.select %905, %901, %906 : vector<8x8xi1>, vector<8x8xf32>
    %cst_364 = arith.constant dense<0xFF800000> : vector<8xf32>
    %908 = vector.multi_reduction <maximumf>, %907, %cst_364 [1] : vector<8x8xf32> to vector<8xf32>
    %909 = vector.shape_cast %908 : vector<8xf32> to vector<8x1xf32>
    %910 = vector.broadcast %909 : vector<8x1xf32> to vector<8x8xf32>
    %911 = arith.subf %907, %910 : vector<8x8xf32>
    %912 = math.exp %911 : vector<8x8xf32>
    %cst_365 = arith.constant dense<0.000000e+00> : vector<8xf32>
    %913 = vector.multi_reduction <add>, %912, %cst_365 [1] : vector<8x8xf32> to vector<8xf32>
    %914 = vector.shape_cast %913 : vector<8xf32> to vector<8x1xf32>
    %915 = tpu.reciprocal %914 {approx = true} : vector<8x1xf32> -> vector<8x1xf32>
    %916 = vector.broadcast %915 : vector<8x1xf32> to vector<8x8xf32>
    %917 = arith.mulf %912, %916 : vector<8x8xf32>
    %cst_366 = arith.constant dense<0.000000e+00> : vector<8x8xf32>
    %918 = tpu.matmul %917, %900, %cst_366 {dimension_numbers = #tpu.dot_dimension_numbers<[1], [0], [0], [1], [0, 0, 1, 1], [], []>} : vector<8x8xf32>, vector<8x8xf32>, vector<8x8xf32> -> vector<8x8xf32>
    %919 = vector.extract_strided_slice %847 {offsets = [0, 24], sizes = [8, 8], strides = [1, 1]} : vector<8x96xf32> to vector<8x8xf32>
    %cst_367 = arith.constant 0.353553385 : f32
    %920 = vector.broadcast %cst_367 : f32 to vector<8x8xf32>
    %921 = arith.mulf %919, %920 : vector<8x8xf32>
    %922 = vector.extract_strided_slice %847 {offsets = [0, 56], sizes = [8, 8], strides = [1, 1]} : vector<8x96xf32> to vector<8x8xf32>
    %923 = vector.extract_strided_slice %847 {offsets = [0, 88], sizes = [8, 8], strides = [1, 1]} : vector<8x96xf32> to vector<8x8xf32>
    %cst_368 = arith.constant dense<0.000000e+00> : vector<8x8xf32>
    %924 = tpu.matmul %921, %922, %cst_368 {dimension_numbers = #tpu.dot_dimension_numbers<[1], [1], [0], [0], [0, 0, 1, 0], [], []>} : vector<8x8xf32>, vector<8x8xf32>, vector<8x8xf32> -> vector<8x8xf32>
    %cst_369 = arith.constant 0.000000e+00 : f32
    %925 = vector.broadcast %cst_369 : f32 to vector<1x8xf32>
    %926 = arith.cmpf ogt, %849, %925 : vector<1x8xf32>
    %cst_370 = arith.constant -1.000000e+09 : f32
    %927 = vector.shape_cast %926 : vector<1x8xi1> to vector<1x8xi1>
    %928 = vector.broadcast %927 : vector<1x8xi1> to vector<8x8xi1>
    %929 = vector.broadcast %cst_370 : f32 to vector<8x8xf32>
    %930 = arith.select %928, %924, %929 : vector<8x8xi1>, vector<8x8xf32>
    %cst_371 = arith.constant dense<0xFF800000> : vector<8xf32>
    %931 = vector.multi_reduction <maximumf>, %930, %cst_371 [1] : vector<8x8xf32> to vector<8xf32>
    %932 = vector.shape_cast %931 : vector<8xf32> to vector<8x1xf32>
    %933 = vector.broadcast %932 : vector<8x1xf32> to vector<8x8xf32>
    %934 = arith.subf %930, %933 : vector<8x8xf32>
    %935 = math.exp %934 : vector<8x8xf32>
    %cst_372 = arith.constant dense<0.000000e+00> : vector<8xf32>
    %936 = vector.multi_reduction <add>, %935, %cst_372 [1] : vector<8x8xf32> to vector<8xf32>
    %937 = vector.shape_cast %936 : vector<8xf32> to vector<8x1xf32>
    %938 = tpu.reciprocal %937 {approx = true} : vector<8x1xf32> -> vector<8x1xf32>
    %939 = vector.broadcast %938 : vector<8x1xf32> to vector<8x8xf32>
    %940 = arith.mulf %935, %939 : vector<8x8xf32>
    %cst_373 = arith.constant dense<0.000000e+00> : vector<8x8xf32>
    %941 = tpu.matmul %940, %923, %cst_373 {dimension_numbers = #tpu.dot_dimension_numbers<[1], [0], [0], [1], [0, 0, 1, 1], [], []>} : vector<8x8xf32>, vector<8x8xf32>, vector<8x8xf32> -> vector<8x8xf32>
    %942 = tpu.concatenate %872, %895, %918, %941 in 1 : vector<8x8xf32>, vector<8x8xf32>, vector<8x8xf32>, vector<8x8xf32> -> vector<8x32xf32>
    %943 = vector.extract_strided_slice %846 {offsets = [8, 0], sizes = [8, 96], strides = [1, 1]} : vector<16x96xf32> to vector<8x96xf32>
    %c1_374 = arith.constant 1 : index
    %c0_375 = arith.constant 0 : index
    %c0_376 = arith.constant 0 : index
    %944 = vector.load %arg3[%c1_374, %c0_375, %c0_376] : memref<2x1x8xf32, #tpu.memory_space<vmem>>, vector<1x1x8xf32>
    %945 = vector.shape_cast %944 : vector<1x1x8xf32> to vector<1x8xf32>
    %946 = vector.extract_strided_slice %943 {offsets = [0, 0], sizes = [8, 8], strides = [1, 1]} : vector<8x96xf32> to vector<8x8xf32>
    %cst_377 = arith.constant 0.353553385 : f32
    %947 = vector.broadcast %cst_377 : f32 to vector<8x8xf32>
    %948 = arith.mulf %946, %947 : vector<8x8xf32>
    %949 = vector.extract_strided_slice %943 {offsets = [0, 32], sizes = [8, 8], strides = [1, 1]} : vector<8x96xf32> to vector<8x8xf32>
    %950 = vector.extract_strided_slice %943 {offsets = [0, 64], sizes = [8, 8], strides = [1, 1]} : vector<8x96xf32> to vector<8x8xf32>
    %cst_378 = arith.constant dense<0.000000e+00> : vector<8x8xf32>
    %951 = tpu.matmul %948, %949, %cst_378 {dimension_numbers = #tpu.dot_dimension_numbers<[1], [1], [0], [0], [0, 0, 1, 0], [], []>} : vector<8x8xf32>, vector<8x8xf32>, vector<8x8xf32> -> vector<8x8xf32>
    %cst_379 = arith.constant 0.000000e+00 : f32
    %952 = vector.broadcast %cst_379 : f32 to vector<1x8xf32>
    %953 = arith.cmpf ogt, %945, %952 : vector<1x8xf32>
    %cst_380 = arith.constant -1.000000e+09 : f32
    %954 = vector.shape_cast %953 : vector<1x8xi1> to vector<1x8xi1>
    %955 = vector.broadcast %954 : vector<1x8xi1> to vector<8x8xi1>
    %956 = vector.broadcast %cst_380 : f32 to vector<8x8xf32>
    %957 = arith.select %955, %951, %956 : vector<8x8xi1>, vector<8x8xf32>
    %cst_381 = arith.constant dense<0xFF800000> : vector<8xf32>
    %958 = vector.multi_reduction <maximumf>, %957, %cst_381 [1] : vector<8x8xf32> to vector<8xf32>
    %959 = vector.shape_cast %958 : vector<8xf32> to vector<8x1xf32>
    %960 = vector.broadcast %959 : vector<8x1xf32> to vector<8x8xf32>
    %961 = arith.subf %957, %960 : vector<8x8xf32>
    %962 = math.exp %961 : vector<8x8xf32>
    %cst_382 = arith.constant dense<0.000000e+00> : vector<8xf32>
    %963 = vector.multi_reduction <add>, %962, %cst_382 [1] : vector<8x8xf32> to vector<8xf32>
    %964 = vector.shape_cast %963 : vector<8xf32> to vector<8x1xf32>
    %965 = tpu.reciprocal %964 {approx = true} : vector<8x1xf32> -> vector<8x1xf32>
    %966 = vector.broadcast %965 : vector<8x1xf32> to vector<8x8xf32>
    %967 = arith.mulf %962, %966 : vector<8x8xf32>
    %cst_383 = arith.constant dense<0.000000e+00> : vector<8x8xf32>
    %968 = tpu.matmul %967, %950, %cst_383 {dimension_numbers = #tpu.dot_dimension_numbers<[1], [0], [0], [1], [0, 0, 1, 1], [], []>} : vector<8x8xf32>, vector<8x8xf32>, vector<8x8xf32> -> vector<8x8xf32>
    %969 = vector.extract_strided_slice %943 {offsets = [0, 8], sizes = [8, 8], strides = [1, 1]} : vector<8x96xf32> to vector<8x8xf32>
    %cst_384 = arith.constant 0.353553385 : f32
    %970 = vector.broadcast %cst_384 : f32 to vector<8x8xf32>
    %971 = arith.mulf %969, %970 : vector<8x8xf32>
    %972 = vector.extract_strided_slice %943 {offsets = [0, 40], sizes = [8, 8], strides = [1, 1]} : vector<8x96xf32> to vector<8x8xf32>
    %973 = vector.extract_strided_slice %943 {offsets = [0, 72], sizes = [8, 8], strides = [1, 1]} : vector<8x96xf32> to vector<8x8xf32>
    %cst_385 = arith.constant dense<0.000000e+00> : vector<8x8xf32>
    %974 = tpu.matmul %971, %972, %cst_385 {dimension_numbers = #tpu.dot_dimension_numbers<[1], [1], [0], [0], [0, 0, 1, 0], [], []>} : vector<8x8xf32>, vector<8x8xf32>, vector<8x8xf32> -> vector<8x8xf32>
    %cst_386 = arith.constant 0.000000e+00 : f32
    %975 = vector.broadcast %cst_386 : f32 to vector<1x8xf32>
    %976 = arith.cmpf ogt, %945, %975 : vector<1x8xf32>
    %cst_387 = arith.constant -1.000000e+09 : f32
    %977 = vector.shape_cast %976 : vector<1x8xi1> to vector<1x8xi1>
    %978 = vector.broadcast %977 : vector<1x8xi1> to vector<8x8xi1>
    %979 = vector.broadcast %cst_387 : f32 to vector<8x8xf32>
    %980 = arith.select %978, %974, %979 : vector<8x8xi1>, vector<8x8xf32>
    %cst_388 = arith.constant dense<0xFF800000> : vector<8xf32>
    %981 = vector.multi_reduction <maximumf>, %980, %cst_388 [1] : vector<8x8xf32> to vector<8xf32>
    %982 = vector.shape_cast %981 : vector<8xf32> to vector<8x1xf32>
    %983 = vector.broadcast %982 : vector<8x1xf32> to vector<8x8xf32>
    %984 = arith.subf %980, %983 : vector<8x8xf32>
    %985 = math.exp %984 : vector<8x8xf32>
    %cst_389 = arith.constant dense<0.000000e+00> : vector<8xf32>
    %986 = vector.multi_reduction <add>, %985, %cst_389 [1] : vector<8x8xf32> to vector<8xf32>
    %987 = vector.shape_cast %986 : vector<8xf32> to vector<8x1xf32>
    %988 = tpu.reciprocal %987 {approx = true} : vector<8x1xf32> -> vector<8x1xf32>
    %989 = vector.broadcast %988 : vector<8x1xf32> to vector<8x8xf32>
    %990 = arith.mulf %985, %989 : vector<8x8xf32>
    %cst_390 = arith.constant dense<0.000000e+00> : vector<8x8xf32>
    %991 = tpu.matmul %990, %973, %cst_390 {dimension_numbers = #tpu.dot_dimension_numbers<[1], [0], [0], [1], [0, 0, 1, 1], [], []>} : vector<8x8xf32>, vector<8x8xf32>, vector<8x8xf32> -> vector<8x8xf32>
    %992 = vector.extract_strided_slice %943 {offsets = [0, 16], sizes = [8, 8], strides = [1, 1]} : vector<8x96xf32> to vector<8x8xf32>
    %cst_391 = arith.constant 0.353553385 : f32
    %993 = vector.broadcast %cst_391 : f32 to vector<8x8xf32>
    %994 = arith.mulf %992, %993 : vector<8x8xf32>
    %995 = vector.extract_strided_slice %943 {offsets = [0, 48], sizes = [8, 8], strides = [1, 1]} : vector<8x96xf32> to vector<8x8xf32>
    %996 = vector.extract_strided_slice %943 {offsets = [0, 80], sizes = [8, 8], strides = [1, 1]} : vector<8x96xf32> to vector<8x8xf32>
    %cst_392 = arith.constant dense<0.000000e+00> : vector<8x8xf32>
    %997 = tpu.matmul %994, %995, %cst_392 {dimension_numbers = #tpu.dot_dimension_numbers<[1], [1], [0], [0], [0, 0, 1, 0], [], []>} : vector<8x8xf32>, vector<8x8xf32>, vector<8x8xf32> -> vector<8x8xf32>
    %cst_393 = arith.constant 0.000000e+00 : f32
    %998 = vector.broadcast %cst_393 : f32 to vector<1x8xf32>
    %999 = arith.cmpf ogt, %945, %998 : vector<1x8xf32>
    %cst_394 = arith.constant -1.000000e+09 : f32
    %1000 = vector.shape_cast %999 : vector<1x8xi1> to vector<1x8xi1>
    %1001 = vector.broadcast %1000 : vector<1x8xi1> to vector<8x8xi1>
    %1002 = vector.broadcast %cst_394 : f32 to vector<8x8xf32>
    %1003 = arith.select %1001, %997, %1002 : vector<8x8xi1>, vector<8x8xf32>
    %cst_395 = arith.constant dense<0xFF800000> : vector<8xf32>
    %1004 = vector.multi_reduction <maximumf>, %1003, %cst_395 [1] : vector<8x8xf32> to vector<8xf32>
    %1005 = vector.shape_cast %1004 : vector<8xf32> to vector<8x1xf32>
    %1006 = vector.broadcast %1005 : vector<8x1xf32> to vector<8x8xf32>
    %1007 = arith.subf %1003, %1006 : vector<8x8xf32>
    %1008 = math.exp %1007 : vector<8x8xf32>
    %cst_396 = arith.constant dense<0.000000e+00> : vector<8xf32>
    %1009 = vector.multi_reduction <add>, %1008, %cst_396 [1] : vector<8x8xf32> to vector<8xf32>
    %1010 = vector.shape_cast %1009 : vector<8xf32> to vector<8x1xf32>
    %1011 = tpu.reciprocal %1010 {approx = true} : vector<8x1xf32> -> vector<8x1xf32>
    %1012 = vector.broadcast %1011 : vector<8x1xf32> to vector<8x8xf32>
    %1013 = arith.mulf %1008, %1012 : vector<8x8xf32>
    %cst_397 = arith.constant dense<0.000000e+00> : vector<8x8xf32>
    %1014 = tpu.matmul %1013, %996, %cst_397 {dimension_numbers = #tpu.dot_dimension_numbers<[1], [0], [0], [1], [0, 0, 1, 1], [], []>} : vector<8x8xf32>, vector<8x8xf32>, vector<8x8xf32> -> vector<8x8xf32>
    %1015 = vector.extract_strided_slice %943 {offsets = [0, 24], sizes = [8, 8], strides = [1, 1]} : vector<8x96xf32> to vector<8x8xf32>
    %cst_398 = arith.constant 0.353553385 : f32
    %1016 = vector.broadcast %cst_398 : f32 to vector<8x8xf32>
    %1017 = arith.mulf %1015, %1016 : vector<8x8xf32>
    %1018 = vector.extract_strided_slice %943 {offsets = [0, 56], sizes = [8, 8], strides = [1, 1]} : vector<8x96xf32> to vector<8x8xf32>
    %1019 = vector.extract_strided_slice %943 {offsets = [0, 88], sizes = [8, 8], strides = [1, 1]} : vector<8x96xf32> to vector<8x8xf32>
    %cst_399 = arith.constant dense<0.000000e+00> : vector<8x8xf32>
    %1020 = tpu.matmul %1017, %1018, %cst_399 {dimension_numbers = #tpu.dot_dimension_numbers<[1], [1], [0], [0], [0, 0, 1, 0], [], []>} : vector<8x8xf32>, vector<8x8xf32>, vector<8x8xf32> -> vector<8x8xf32>
    %cst_400 = arith.constant 0.000000e+00 : f32
    %1021 = vector.broadcast %cst_400 : f32 to vector<1x8xf32>
    %1022 = arith.cmpf ogt, %945, %1021 : vector<1x8xf32>
    %cst_401 = arith.constant -1.000000e+09 : f32
    %1023 = vector.shape_cast %1022 : vector<1x8xi1> to vector<1x8xi1>
    %1024 = vector.broadcast %1023 : vector<1x8xi1> to vector<8x8xi1>
    %1025 = vector.broadcast %cst_401 : f32 to vector<8x8xf32>
    %1026 = arith.select %1024, %1020, %1025 : vector<8x8xi1>, vector<8x8xf32>
    %cst_402 = arith.constant dense<0xFF800000> : vector<8xf32>
    %1027 = vector.multi_reduction <maximumf>, %1026, %cst_402 [1] : vector<8x8xf32> to vector<8xf32>
    %1028 = vector.shape_cast %1027 : vector<8xf32> to vector<8x1xf32>
    %1029 = vector.broadcast %1028 : vector<8x1xf32> to vector<8x8xf32>
    %1030 = arith.subf %1026, %1029 : vector<8x8xf32>
    %1031 = math.exp %1030 : vector<8x8xf32>
    %cst_403 = arith.constant dense<0.000000e+00> : vector<8xf32>
    %1032 = vector.multi_reduction <add>, %1031, %cst_403 [1] : vector<8x8xf32> to vector<8xf32>
    %1033 = vector.shape_cast %1032 : vector<8xf32> to vector<8x1xf32>
    %1034 = tpu.reciprocal %1033 {approx = true} : vector<8x1xf32> -> vector<8x1xf32>
    %1035 = vector.broadcast %1034 : vector<8x1xf32> to vector<8x8xf32>
    %1036 = arith.mulf %1031, %1035 : vector<8x8xf32>
    %cst_404 = arith.constant dense<0.000000e+00> : vector<8x8xf32>
    %1037 = tpu.matmul %1036, %1019, %cst_404 {dimension_numbers = #tpu.dot_dimension_numbers<[1], [0], [0], [1], [0, 0, 1, 1], [], []>} : vector<8x8xf32>, vector<8x8xf32>, vector<8x8xf32> -> vector<8x8xf32>
    %1038 = tpu.concatenate %968, %991, %1014, %1037 in 1 : vector<8x8xf32>, vector<8x8xf32>, vector<8x8xf32>, vector<8x8xf32> -> vector<8x32xf32>
    %1039 = tpu.concatenate %942, %1038 in 0 : vector<8x32xf32>, vector<8x32xf32> -> vector<16x32xf32>
    %c3_405 = arith.constant 3 : index
    %c0_406 = arith.constant 0 : index
    %c0_407 = arith.constant 0 : index
    %1040 = vector.load %arg11[%c3_405, %c0_406, %c0_407] : memref<4x32x32xf32, #tpu.memory_space<vmem>>, vector<1x32x32xf32>
    %1041 = vector.shape_cast %1040 : vector<1x32x32xf32> to vector<32x32xf32>
    %cst_408 = arith.constant dense<0.000000e+00> : vector<16x32xf32>
    %1042 = tpu.matmul %1039, %1041, %cst_408 {dimension_numbers = #tpu.dot_dimension_numbers<[1], [0], [0], [1], [0, 0, 1, 1], [], []>} : vector<16x32xf32>, vector<32x32xf32>, vector<16x32xf32> -> vector<16x32xf32>
    %1043 = arith.addf %1042, %843 : vector<16x32xf32>
    %c3_409 = arith.constant 3 : index
    %c0_410 = arith.constant 0 : index
    %c0_411 = arith.constant 0 : index
    %1044 = vector.load %arg12[%c3_409, %c0_410, %c0_411] : memref<4x1x32xf32, #tpu.memory_space<vmem>>, vector<1x1x32xf32>
    %1045 = vector.shape_cast %1044 : vector<1x1x32xf32> to vector<1x32xf32>
    %c3_412 = arith.constant 3 : index
    %c0_413 = arith.constant 0 : index
    %c0_414 = arith.constant 0 : index
    %1046 = vector.load %arg13[%c3_412, %c0_413, %c0_414] : memref<4x1x32xf32, #tpu.memory_space<vmem>>, vector<1x1x32xf32>
    %1047 = vector.shape_cast %1046 : vector<1x1x32xf32> to vector<1x32xf32>
    %cst_415 = arith.constant dense<0.000000e+00> : vector<16xf32>
    %1048 = vector.multi_reduction <add>, %1043, %cst_415 [1] : vector<16x32xf32> to vector<16xf32>
    %1049 = vector.shape_cast %1048 : vector<16xf32> to vector<16x1xf32>
    %cst_416 = arith.constant 3.200000e+01 : f32
    %1050 = vector.broadcast %cst_416 : f32 to vector<16x1xf32>
    %1051 = arith.divf %1049, %1050 : vector<16x1xf32>
    %1052 = vector.broadcast %1051 : vector<16x1xf32> to vector<16x32xf32>
    %1053 = arith.subf %1043, %1052 : vector<16x32xf32>
    %1054 = arith.mulf %1053, %1053 : vector<16x32xf32>
    %cst_417 = arith.constant dense<0.000000e+00> : vector<16xf32>
    %1055 = vector.multi_reduction <add>, %1054, %cst_417 [1] : vector<16x32xf32> to vector<16xf32>
    %1056 = vector.shape_cast %1055 : vector<16xf32> to vector<16x1xf32>
    %cst_418 = arith.constant 3.200000e+01 : f32
    %1057 = vector.broadcast %cst_418 : f32 to vector<16x1xf32>
    %1058 = arith.divf %1056, %1057 : vector<16x1xf32>
    %1059 = vector.broadcast %1051 : vector<16x1xf32> to vector<16x32xf32>
    %1060 = arith.subf %1043, %1059 : vector<16x32xf32>
    %cst_419 = arith.constant 9.99999997E-7 : f32
    %1061 = vector.broadcast %cst_419 : f32 to vector<16x1xf32>
    %1062 = arith.addf %1058, %1061 : vector<16x1xf32>
    %1063 = math.rsqrt %1062 : vector<16x1xf32>
    %1064 = vector.broadcast %1063 : vector<16x1xf32> to vector<16x32xf32>
    %1065 = arith.mulf %1060, %1064 : vector<16x32xf32>
    %1066 = vector.broadcast %1045 : vector<1x32xf32> to vector<16x32xf32>
    %1067 = arith.mulf %1065, %1066 : vector<16x32xf32>
    %1068 = vector.broadcast %1047 : vector<1x32xf32> to vector<16x32xf32>
    %1069 = arith.addf %1067, %1068 : vector<16x32xf32>
    %c3_420 = arith.constant 3 : index
    %c0_421 = arith.constant 0 : index
    %c0_422 = arith.constant 0 : index
    %1070 = vector.load %arg14[%c3_420, %c0_421, %c0_422] : memref<4x32x64xf32, #tpu.memory_space<vmem>>, vector<1x32x64xf32>
    %1071 = vector.shape_cast %1070 : vector<1x32x64xf32> to vector<32x64xf32>
    %cst_423 = arith.constant dense<0.000000e+00> : vector<16x64xf32>
    %1072 = tpu.matmul %1069, %1071, %cst_423 {dimension_numbers = #tpu.dot_dimension_numbers<[1], [0], [0], [1], [0, 0, 1, 1], [], []>} : vector<16x32xf32>, vector<32x64xf32>, vector<16x64xf32> -> vector<16x64xf32>
    %c3_424 = arith.constant 3 : index
    %c0_425 = arith.constant 0 : index
    %c0_426 = arith.constant 0 : index
    %1073 = vector.load %arg15[%c3_424, %c0_425, %c0_426] : memref<4x1x64xf32, #tpu.memory_space<vmem>>, vector<1x1x64xf32>
    %1074 = vector.shape_cast %1073 : vector<1x1x64xf32> to vector<1x64xf32>
    %1075 = vector.broadcast %1074 : vector<1x64xf32> to vector<16x64xf32>
    %1076 = arith.addf %1072, %1075 : vector<16x64xf32>
    %cst_427 = arith.constant 0.000000e+00 : f32
    %1077 = vector.broadcast %cst_427 : f32 to vector<16x64xf32>
    %1078 = arith.maximumf %1076, %1077 : vector<16x64xf32>
    %c3_428 = arith.constant 3 : index
    %c0_429 = arith.constant 0 : index
    %c0_430 = arith.constant 0 : index
    %1079 = vector.load %arg16[%c3_428, %c0_429, %c0_430] : memref<4x64x32xf32, #tpu.memory_space<vmem>>, vector<1x64x32xf32>
    %1080 = vector.shape_cast %1079 : vector<1x64x32xf32> to vector<64x32xf32>
    %cst_431 = arith.constant dense<0.000000e+00> : vector<16x32xf32>
    %1081 = tpu.matmul %1078, %1080, %cst_431 {dimension_numbers = #tpu.dot_dimension_numbers<[1], [0], [0], [1], [0, 0, 1, 1], [], []>} : vector<16x64xf32>, vector<64x32xf32>, vector<16x32xf32> -> vector<16x32xf32>
    %c3_432 = arith.constant 3 : index
    %c0_433 = arith.constant 0 : index
    %c0_434 = arith.constant 0 : index
    %1082 = vector.load %arg17[%c3_432, %c0_433, %c0_434] : memref<4x1x32xf32, #tpu.memory_space<vmem>>, vector<1x1x32xf32>
    %1083 = vector.shape_cast %1082 : vector<1x1x32xf32> to vector<1x32xf32>
    %1084 = vector.broadcast %1083 : vector<1x32xf32> to vector<16x32xf32>
    %1085 = arith.addf %1081, %1084 : vector<16x32xf32>
    %1086 = arith.addf %1085, %1069 : vector<16x32xf32>
    %c3_435 = arith.constant 3 : index
    %c0_436 = arith.constant 0 : index
    %c0_437 = arith.constant 0 : index
    %1087 = vector.load %arg18[%c3_435, %c0_436, %c0_437] : memref<4x1x32xf32, #tpu.memory_space<vmem>>, vector<1x1x32xf32>
    %1088 = vector.shape_cast %1087 : vector<1x1x32xf32> to vector<1x32xf32>
    %c3_438 = arith.constant 3 : index
    %c0_439 = arith.constant 0 : index
    %c0_440 = arith.constant 0 : index
    %1089 = vector.load %arg19[%c3_438, %c0_439, %c0_440] : memref<4x1x32xf32, #tpu.memory_space<vmem>>, vector<1x1x32xf32>
    %1090 = vector.shape_cast %1089 : vector<1x1x32xf32> to vector<1x32xf32>
    %cst_441 = arith.constant dense<0.000000e+00> : vector<16xf32>
    %1091 = vector.multi_reduction <add>, %1086, %cst_441 [1] : vector<16x32xf32> to vector<16xf32>
    %1092 = vector.shape_cast %1091 : vector<16xf32> to vector<16x1xf32>
    %cst_442 = arith.constant 3.200000e+01 : f32
    %1093 = vector.broadcast %cst_442 : f32 to vector<16x1xf32>
    %1094 = arith.divf %1092, %1093 : vector<16x1xf32>
    %1095 = vector.broadcast %1094 : vector<16x1xf32> to vector<16x32xf32>
    %1096 = arith.subf %1086, %1095 : vector<16x32xf32>
    %1097 = arith.mulf %1096, %1096 : vector<16x32xf32>
    %cst_443 = arith.constant dense<0.000000e+00> : vector<16xf32>
    %1098 = vector.multi_reduction <add>, %1097, %cst_443 [1] : vector<16x32xf32> to vector<16xf32>
    %1099 = vector.shape_cast %1098 : vector<16xf32> to vector<16x1xf32>
    %cst_444 = arith.constant 3.200000e+01 : f32
    %1100 = vector.broadcast %cst_444 : f32 to vector<16x1xf32>
    %1101 = arith.divf %1099, %1100 : vector<16x1xf32>
    %1102 = vector.broadcast %1094 : vector<16x1xf32> to vector<16x32xf32>
    %1103 = arith.subf %1086, %1102 : vector<16x32xf32>
    %cst_445 = arith.constant 9.99999997E-7 : f32
    %1104 = vector.broadcast %cst_445 : f32 to vector<16x1xf32>
    %1105 = arith.addf %1101, %1104 : vector<16x1xf32>
    %1106 = math.rsqrt %1105 : vector<16x1xf32>
    %1107 = vector.broadcast %1106 : vector<16x1xf32> to vector<16x32xf32>
    %1108 = arith.mulf %1103, %1107 : vector<16x32xf32>
    %1109 = vector.broadcast %1088 : vector<1x32xf32> to vector<16x32xf32>
    %1110 = arith.mulf %1108, %1109 : vector<16x32xf32>
    %1111 = vector.broadcast %1090 : vector<1x32xf32> to vector<16x32xf32>
    %1112 = arith.addf %1110, %1111 : vector<16x32xf32>
    %c0_446 = arith.constant 0 : index
    %c0_447 = arith.constant 0 : index
    %1113 = vector.load %arg20[%c0_446, %c0_447] : memref<32x128xf32, #tpu.memory_space<vmem>>, vector<32x128xf32>
    %cst_448 = arith.constant dense<0.000000e+00> : vector<16x128xf32>
    %1114 = tpu.matmul %1112, %1113, %cst_448 {dimension_numbers = #tpu.dot_dimension_numbers<[1], [0], [0], [1], [0, 0, 1, 1], [], []>} : vector<16x32xf32>, vector<32x128xf32>, vector<16x128xf32> -> vector<16x128xf32>
    %c0_449 = arith.constant 0 : index
    %c0_450 = arith.constant 0 : index
    %1115 = vector.load %arg21[%c0_449, %c0_450] : memref<16x128xf32, #tpu.memory_space<vmem>>, vector<16x128xf32>
    tpu.vector_store %arg21[%c0_449, %c0_450], %1114 {strides = array<i32>} : memref<16x128xf32, #tpu.memory_space<vmem>>, vector<16x128xf32>,
    return
  }
  func.func @transform_0(%arg0: i32) -> (i32, i32) {
    %c0_i32 = arith.constant 0 : i32
    %c0_i32_0 = arith.constant 0 : i32
    %c0_i32_1 = arith.constant 0 : i32
    return %c0_i32, %c0_i32_0 : i32, i32
  }
  func.func @transform_1(%arg0: i32) -> (i32, i32) {
    %c0_i32 = arith.constant 0 : i32
    %c0_i32_0 = arith.constant 0 : i32
    %c0_i32_1 = arith.constant 0 : i32
    return %c0_i32, %c0_i32_0 : i32, i32
  }
  func.func @transform_2(%arg0: i32) -> (i32, i32, i32) {
    %c0_i32 = arith.constant 0 : i32
    %c0_i32_0 = arith.constant 0 : i32
    %c0_i32_1 = arith.constant 0 : i32
    %c0_i32_2 = arith.constant 0 : i32
    return %c0_i32, %c0_i32_0, %c0_i32_1 : i32, i32, i32
  }
  func.func @transform_3(%arg0: i32) -> (i32, i32) {
    %c0_i32 = arith.constant 0 : i32
    %c0_i32_0 = arith.constant 0 : i32
    %c0_i32_1 = arith.constant 0 : i32
    return %c0_i32, %c0_i32_0 : i32, i32
  }
  func.func @transform_4(%arg0: i32) -> (i32, i32) {
    %c0_i32 = arith.constant 0 : i32
    %c0_i32_0 = arith.constant 0 : i32
    %c0_i32_1 = arith.constant 0 : i32
    return %c0_i32, %c0_i32_0 : i32, i32
  }
  func.func @transform_5(%arg0: i32) -> (i32, i32) {
    %c0_i32 = arith.constant 0 : i32
    %c0_i32_0 = arith.constant 0 : i32
    %c0_i32_1 = arith.constant 0 : i32
    return %c0_i32, %c0_i32_0 : i32, i32
  }
  func.func @transform_6(%arg0: i32) -> (i32, i32) {
    %c0_i32 = arith.constant 0 : i32
    %c0_i32_0 = arith.constant 0 : i32
    %c0_i32_1 = arith.constant 0 : i32
    return %c0_i32, %c0_i32_0 : i32, i32
  }
  func.func @transform_7(%arg0: i32) -> (i32, i32) {
    %c0_i32 = arith.constant 0 : i32
    %c0_i32_0 = arith.constant 0 : i32
    %c0_i32_1 = arith.constant 0 : i32
    return %c0_i32, %c0_i32_0 : i32, i32
  }
  func.func @transform_8(%arg0: i32) -> (i32, i32) {
    %c0_i32 = arith.constant 0 : i32
    %c0_i32_0 = arith.constant 0 : i32
    %c0_i32_1 = arith.constant 0 : i32
    return %c0_i32, %c0_i32_0 : i32, i32
  }
  func.func @transform_9(%arg0: i32) -> (i32, i32, i32) {
    %c0_i32 = arith.constant 0 : i32
    %c0_i32_0 = arith.constant 0 : i32
    %c0_i32_1 = arith.constant 0 : i32
    %c0_i32_2 = arith.constant 0 : i32
    return %c0_i32, %c0_i32_0, %c0_i32_1 : i32, i32, i32
  }
  func.func @transform_10(%arg0: i32) -> (i32, i32, i32) {
    %c0_i32 = arith.constant 0 : i32
    %c0_i32_0 = arith.constant 0 : i32
    %c0_i32_1 = arith.constant 0 : i32
    %c0_i32_2 = arith.constant 0 : i32
    return %c0_i32, %c0_i32_0, %c0_i32_1 : i32, i32, i32
  }
  func.func @transform_11(%arg0: i32) -> (i32, i32, i32) {
    %c0_i32 = arith.constant 0 : i32
    %c0_i32_0 = arith.constant 0 : i32
    %c0_i32_1 = arith.constant 0 : i32
    %c0_i32_2 = arith.constant 0 : i32
    return %c0_i32, %c0_i32_0, %c0_i32_1 : i32, i32, i32
  }
  func.func @transform_12(%arg0: i32) -> (i32, i32, i32) {
    %c0_i32 = arith.constant 0 : i32
    %c0_i32_0 = arith.constant 0 : i32
    %c0_i32_1 = arith.constant 0 : i32
    %c0_i32_2 = arith.constant 0 : i32
    return %c0_i32, %c0_i32_0, %c0_i32_1 : i32, i32, i32
  }
  func.func @transform_13(%arg0: i32) -> (i32, i32, i32) {
    %c0_i32 = arith.constant 0 : i32
    %c0_i32_0 = arith.constant 0 : i32
    %c0_i32_1 = arith.constant 0 : i32
    %c0_i32_2 = arith.constant 0 : i32
    return %c0_i32, %c0_i32_0, %c0_i32_1 : i32, i32, i32
  }
  func.func @transform_14(%arg0: i32) -> (i32, i32, i32) {
    %c0_i32 = arith.constant 0 : i32
    %c0_i32_0 = arith.constant 0 : i32
    %c0_i32_1 = arith.constant 0 : i32
    %c0_i32_2 = arith.constant 0 : i32
    return %c0_i32, %c0_i32_0, %c0_i32_1 : i32, i32, i32
  }
  func.func @transform_15(%arg0: i32) -> (i32, i32, i32) {
    %c0_i32 = arith.constant 0 : i32
    %c0_i32_0 = arith.constant 0 : i32
    %c0_i32_1 = arith.constant 0 : i32
    %c0_i32_2 = arith.constant 0 : i32
    return %c0_i32, %c0_i32_0, %c0_i32_1 : i32, i32, i32
  }
  func.func @transform_16(%arg0: i32) -> (i32, i32, i32) {
    %c0_i32 = arith.constant 0 : i32
    %c0_i32_0 = arith.constant 0 : i32
    %c0_i32_1 = arith.constant 0 : i32
    %c0_i32_2 = arith.constant 0 : i32
    return %c0_i32, %c0_i32_0, %c0_i32_1 : i32, i32, i32
  }
  func.func @transform_17(%arg0: i32) -> (i32, i32, i32) {
    %c0_i32 = arith.constant 0 : i32
    %c0_i32_0 = arith.constant 0 : i32
    %c0_i32_1 = arith.constant 0 : i32
    %c0_i32_2 = arith.constant 0 : i32
    return %c0_i32, %c0_i32_0, %c0_i32_1 : i32, i32, i32
  }
  func.func @transform_18(%arg0: i32) -> (i32, i32, i32) {
    %c0_i32 = arith.constant 0 : i32
    %c0_i32_0 = arith.constant 0 : i32
    %c0_i32_1 = arith.constant 0 : i32
    %c0_i32_2 = arith.constant 0 : i32
    return %c0_i32, %c0_i32_0, %c0_i32_1 : i32, i32, i32
  }
  func.func @transform_19(%arg0: i32) -> (i32, i32) {
    %c0_i32 = arith.constant 0 : i32
    %c0_i32_0 = arith.constant 0 : i32
    %c0_i32_1 = arith.constant 0 : i32
    return %c0_i32, %c0_i32_0 : i32, i32
  }
  func.func @transform_20(%arg0: i32) -> (i32, i32) {
    %c0_i32 = arith.constant 0 : i32
    %c0_i32_0 = arith.constant 0 : i32
    %c0_i32_1 = arith.constant 0 : i32
    return %c0_i32, %c0_i32_0 : i32, i32
  }
}

</mosaic_0001>

<bundles_post_ra>
// kernel: run.1
= control target key start
LH: loop header
LB: loop body
LE: loop exit
PB: predicated region body
PF: predicated region fallthrough
CT: control target
= control target key end

     0   :  { %vm75_vm0 = vcmask 261120   ;;  %v4001_v9 = vmov 32.0   ;;  %s5273_s22 = smov 64   ;;  %s5254_s24 = smov 80   ;;  %vm206_vm5 = vcmask 64512   ;;  %v4009_v48 = vmov 0   ;;  %s5223_s3 = inlined_call_operand.vmem [shape: f32[32,32], index: 3, kind: input, shape index: {}]   ;;  %s5224_s4 = inlined_call_operand.vmem [shape: f32[1,32], index: 4, kind: input, shape index: {}]   ;;  %s5225_s0 = inlined_call_operand.vmem [shape: f32[16,32], index: 0, kind: input, shape index: {}]   ;;  %s5226_s5 = inlined_call_operand.vmem [shape: f32[1,32], index: 5, kind: input, shape index: {}]   ;;  %s5227_s6 = inlined_call_operand.vmem [shape: f32[1,32], index: 6, kind: input, shape index: {}]   ;;  %s5228_s9 = inlined_call_operand.vmem [shape: f32[4,32,96], index: 9, kind: input, shape index: {}]   ;;  %s5229_s2 = inlined_call_operand.vmem [shape: f32[2,1,8], index: 2, kind: input, shape index: {}]   ;;  %s5230_s10 = inlined_call_operand.vmem [shape: f32[4,32,32], index: 10, kind: input, shape index: {}]   ;;  %s5231_s11 = inlined_call_operand.vmem [shape: f32[4,1,32], index: 11, kind: input, shape index: {}]   ;;  %s5232_s12 = inlined_call_operand.vmem [shape: f32[4,1,32], index: 12, kind: input, shape index: {}]   ;;  %s5233_s13 = inlined_call_operand.vmem [shape: f32[4,32,64], index: 13, kind: input, shape index: {}]   ;;  %s5234_s14 = inlined_call_operand.vmem [shape: f32[4,1,64], index: 14, kind: input, shape index: {}]   ;;  %s5235_s15 = inlined_call_operand.vmem [shape: f32[4,64,32], index: 15, kind: input, shape index: {}]   ;;  %s5236_s16 = inlined_call_operand.vmem [shape: f32[4,1,32], index: 16, kind: input, shape index: {}]   ;;  %s5237_s17 = inlined_call_operand.vmem [shape: f32[4,1,32], index: 17, kind: input, shape index: {}]   ;;  %s5238_s18 = inlined_call_operand.vmem [shape: f32[4,1,32], index: 18, kind: input, shape index: {}]   ;;  %s5239_s7 = inlined_call_operand.vmem [shape: f32[32,32], index: 7, kind: input, shape index: {}]   ;;  %s5240_s1 = inlined_call_operand.vmem [shape: f32[16,32], index: 1, kind: input, shape index: {}]   ;;  %s5241_s8 = inlined_call_operand.vmem [shape: f32[1,32], index: 8, kind: input, shape index: {}]   ;;  %s5242_s19 = inlined_call_operand.vmem [shape: f32[32,128], index: 19, kind: input, shape index: {}]   ;;  %s5243_s20 = inlined_call_operand.vmem [shape: f32[16,128], index: 20, kind: output, shape index: {}]  }
   0x1   :  { %5284 = sst [smem:[#allocation2_spill]] %s5223_s3  ;;  %3835 = vrcp.f32 %v4001_v9  ;;  %v171_v21 = vld [vmem:[%s5228_s9 + $0x18] sm:$0xff]  ;;  %v170_v22 = vld [vmem:[%s5228_s9 + $0x10] sm:$0xff]  ;;  %v169_v23 = vld [vmem:[%s5228_s9 + $0x8] sm:$0xff]  ;;  %s5252_s25 = smov 72   ;;  %vm485_vm13 = vcmask 130048  }
   0x2   :  { %5285 = sst [smem:[#allocation3_spill]] %s5224_s4  ;;  %190 = vmatpush.msra.mxu1 %v171_v21  ;;  %v168_v24 = vld [vmem:[%s5228_s9] sm:$0xff]  ;;  %s5250_s4 = smov 88   ;;  %vm487_vm14 = vcmask 195584  }
   0x3   :  { %5286 = sst [smem:[#allocation4_spill]] %s5225_s0  ;;  %s5246_s0 = smov 120   ;;  %v201_v47 = vld [vmem:[%s5229_s2] sm:$0x1] }
   0x4   :  { %5287 = sst [smem:[#allocation5_spill]] %s5226_s5  ;;  %191 = vmatpush.msra.mxu1 %v170_v22  ;;  %s5248_s5 = smov 112   ;;  %vm232_vm6 = vcmp.gt.f32.partialorder %v201_v47, 0.0 }
   0x5   :  { %5288 = sst [smem:[#allocation6_spill]] %s5227_s6  ;;  %v233_v49 = vsel %vm232_vm6, 1, %v4009_v48  ;;  %s5262_s30 = smov 104  }
   0x6   :  { %5289 = sst [smem:[#allocation7_spill]] %s5230_s10  ;;  %192 = vmatpush.msra.mxu1 %v169_v23  ;;  %v234_v50 = vperm.slane %v233_v49, 0  ;;  %s5266_s3 = smov 40  }
   0x7   :  { %5290 = sst [smem:[#allocation8_spill]] %s5231_s11  ;;  %v3836_v10 = vpop.eup %3835  ;;  %s5260_s26 = smov 8  }
   0x8   :  { %5291 = sst [smem:[#allocation9_spill]] %s5232_s12  ;;  %v114_v11 = vmul.f32 32.0, %v3836_v10  ;;  %vm118_vm1 = vweird.f32 %v3836_v10  ;;  %193 = vmatpush.msra.mxu1 %v168_v24  ;;  %vm4201_vm7 = vcmp.eq.s32.totalorder %v234_v50, 1  ;;  %s5258_s27 = smov 16  }
   0x9   :  { %5292 = sst [smem:[#allocation10_spill]] %s5236_s16  ;;  %s5264_s28 = smov 24  }
   0xa   :  { %5293 = sst [smem:[#allocation11_spill]] %s5242_s19  ;;  %v115_v12 = vsub.f32 1.0, %v114_v11 }
   0xb   :  { %5294 = sst [smem:[#allocation12_spill]] %s5243_s20  ;;  %s5312_s20 = smov 48  }
   0xc   :  { %s5295_s23 = sld [smem:[#allocation2_spill]]  ;;  %v116_v13 = vmul.f32 %v3836_v10, %v115_v12 }
   0xd   :  { %s5296_s29 = sld [smem:[#allocation4_spill]] }
   0xe   :  { %s5297_s21 = sld [smem:[#allocation3_spill]]  ;;  %v117_v14 = vadd.f32 %v3836_v10, %v116_v13 }
   0xf   :  { %s5298_s6 = sld [smem:[#allocation5_spill]] }
  0x10   :  { %v4145_v15 = vsel %vm118_vm1, %v3836_v10, %v117_v14 }
  0x12   :  { %v70_v0 = vld [vmem:[%s5295_s23 + $0x18] sm:$0xff]  ;;  %v69_v1 = vld [vmem:[%s5295_s23 + $0x10] sm:$0xff]  ;;  %v68_v2 = vld [vmem:[%s5295_s23 + $0x8] sm:$0xff] }
  0x13   :  { %94 = vmatpush.msra.mxu0 %v70_v0  ;;  %v67_v3 = vld [vmem:[%s5295_s23] sm:$0xff]  ;;  %s5256_s23 = smov 96   ;;  %v66_v55 = vld [vmem:[%s5296_s29 + $0x8] sm:$0xff] }
  0x14   :  { %v65_v4 = vld [vmem:[%s5296_s29] sm:$0xff]  ;;  %s5270_s29 = smov 48  }
  0x15   :  { %95 = vmatpush.msra.mxu0 %v69_v1  ;;  %v4141_v5 = vld [vmem:[%s5297_s21] ss:$0 sm:$0xff]  ;;  %s5299_s21 = sld [smem:[#allocation6_spill]] }
  0x16   :  { %v4165_v34 = vld [vmem:[%s5298_s6] ss:$0 sm:$0xff]  ;;  %s5319_s6 = sld [smem:[#allocation8_spill]] }
  0x17   :  { %96 = vmatpush.msra.mxu0 %v68_v2 }
  0x19   :  { %97 = vmatpush.msra.mxu0 %v67_v3 }
  0x1a   :  { %3573 = vmatmul.msk.f32.vlgmr.msra.gmra.mxu0 %vm75_vm0, %v65_v4 }
  0x1b   :  { %v4170_v37 = vld [vmem:[%s5299_s21] ss:$0 sm:$0xff]  ;;  %s5268_s21 = smov 56  }
  0x22   :  { %3574 = vmatmul.msk.f32.gmra.mxu0 %vm75_vm0, %v66_v55 }
  0x97   :  { %v99_v6 = vpop.f32.mrf.mxu0 }
  0x98   :  { %v100_v7 = vadd.f32 %v4141_v5, %v99_v6 }
  0x9a   :  { %v107_v8 = vsel %vm75_vm0, %v100_v7, 0.0 }
  0x9b   :  { %108 = vadd.xlane.f32.xlu0 %v107_v8 }
  0x9f   :  { %v102_v61 = vpop.f32.mrf.mxu0 }
  0xa0   :  { %v103_v63 = vadd.f32 %v4141_v5, %v102_v61 }
  0xa2   :  { %v110_v0 = vsel %vm75_vm0, %v103_v63, 0.0 }
 0x10e   :  { %v109_v16 = vpop.xlane.xlu0 %108 }
 0x10f   :  { %v120_v17 = vmul.f32 %v4145_v15, %v109_v16 }
 0x111   :  { %v122_v18 = vsub.f32 %v100_v7, %v120_v17 }
 0x113   :  { %v124_v19 = vmul.f32 %v122_v18, %v122_v18 }
 0x115   :  { %v126_v20 = vsel %vm75_vm0, %v124_v19, 0.0 }
 0x116   :  { %127 = vadd.xlane.f32.xlu0 %v126_v20 }
 0x189   :  { %v128_v25 = vpop.xlane.xlu0 %127 }
 0x18a   :  { %v132_v26 = vmul.f32 %v128_v25, %v4145_v15 }
 0x18c   :  { %v134_v27 = vadd.f32 1e-06, %v132_v26 }
 0x18e   :  { %3837 = vrsqrt.f32 %v134_v27  ;;  %vm142_vm3 = vweird.f32 %v134_v27 }
 0x194   :  { %v3838_v28 = vpop.eup %3837 }
 0x195   :  { %v137_v29 = vmul.f32 %v3838_v28, %v134_v27  ;;  %vm143_vm2 = vweird.f32 %v3838_v28 }
 0x196   :  { %vm144_vm4 = vmor %vm142_vm3, %vm143_vm2  ;;  %vm915_vm3 = vcmask 523264  }
 0x197   :  { %v138_v30 = vmul.f32 %v3838_v28, %v137_v29 }
 0x199   :  { %v139_v31 = vmul.f32 0.5, %v138_v30 }
 0x19b   :  { %v140_v32 = vsub.f32 1.5, %v139_v31 }
 0x19d   :  { %v141_v33 = vmul.f32 %v3838_v28, %v140_v32 }
 0x19f   :  { %v145_v35 = vsel %vm144_vm4, %v3838_v28, %v141_v33 }
 0x1a0   :  { %v156_v36 = vmul.f32 %v145_v35, %v122_v18 }
 0x1a2   :  { %v161_v38 = vmul.f32 %v4165_v34, %v156_v36 }
 0x1a4   :  { %v4174_v39 = vadd.f32 %v4170_v37, %v161_v38 }
 0x1a6   :  { %3575 = vmatmul.msk.f32.vlgmr.msra.gmra.mxu1 %vm75_vm0, %v4174_v39 }
 0x223   :  { %v4178_v40 = vpop.f32.mrf.mxu1 }
 0x224   :  { %276 = vrot.lane.b32.xlu0 %v4178_v40, %s5250_s4  ;;  %248 = vrot.lane.b32.xlu2 %v4178_v40, %s5273_s22  ;;  %v202_v41 = vmul.f32 0.35355338, %v4178_v40 }
 0x225   :  { %204 = vrot.lane.b32.xlu1 %v4178_v40, %s5256_s23 }
 0x22c   :  { %342 = vrot.lane.b32.xlu0 %v4178_v40, %s5254_s24  ;;  %274 = vrot.lane.b32.xlu2 %v202_v41, %s5246_s0 }
 0x234   :  { %408 = vrot.lane.b32.xlu0 %v4178_v40, %s5252_s25  ;;  %340 = vrot.lane.b32.xlu2 %v202_v41, %s5248_s5 }
 0x27e   :  { %v249_v42 = vpop.permute.xlu2 %248 }
 0x27f   :  { %269 = vmatpush.msra.mxu3 %v249_v42 }
 0x286   :  { %v275_v62 = vpop.permute.xlu2 %274 }
 0x28e   :  { %v341_v1 = vpop.permute.xlu2 %340 }
 0x296   :  { %v277_v43 = vpop.permute.xlu0 %276 }
 0x297   :  { %v205_v44 = vpop.permute.xlu1 %204  ;;  %3580 = vmatpush.xpose.msk.msrb.mxu3 %vm206_vm5, %v277_v43 }
 0x298   :  { %3577 = vmatpush.xpose.msk.msra.mxu2 %vm206_vm5, %v205_v44 }
 0x29b   :  { %3578 = vmatmul.msk.f32.vlgmr.msra.gmra.mxu2 %vm206_vm5, %v202_v41 }
 0x29e   :  { %v343_v45 = vpop.permute.xlu0 %342 }
 0x2a6   :  { %v409_v46 = vpop.permute.xlu0 %408 }
 0x2a7   :  { %3586 = vmatpush.xpose.msk.msrb.mxu0 %vm206_vm5, %v409_v46 }
 0x31e   :  { %v229_v52 = vpop.f32.mrf.mxu2 }
 0x31f   :  { %v236_v53 = vsel %vm4201_vm7, %v229_v52, -1e+09 }
 0x320   :  { %v237_v54 = vsel %vm206_vm5, %v236_v53, -inf }
 0x321   :  { %238 = vmax.xlane.f32.xlu1 %v237_v54 }
 0x329   :  { %111 = vadd.xlane.f32.xlu1 %v110_v0 }
 0x394   :  { %v239_v56 = vpop.xlane.xlu1 %238 }
 0x395   :  { %v240_v57 = vsub.f32 %v236_v53, %v239_v56 }
 0x397   :  { %v241_v58 = vmul.f32 1.442695, %v240_v57 }
 0x399   :  { %3839 = vpow2.f32 %v241_v58 }
 0x39c   :  { %v112_v5 = vpop.xlane.xlu1 %111 }
 0x39d   :  { %v121_v7 = vmul.f32 %v4145_v15, %v112_v5 }
 0x39f   :  { %v3840_v59 = vpop.eup %3839  ;;  %v123_v9 = vsub.f32 %v103_v63, %v121_v7 }
 0x3a0   :  { %v243_v60 = vsel %vm206_vm5, %v3840_v59, 0.0 }
 0x3a1   :  { %244 = vadd.xlane.f32.xlu2 %v243_v60  ;;  %v125_v12 = vmul.f32 %v123_v9, %v123_v9 }
 0x3a3   :  { %v129_v14 = vsel %vm75_vm0, %v125_v12, 0.0  ;;  %v3589_v12 = vld [vmem:[%s5229_s2 + $0x1] sm:$0x1]  ;;  %s5305_s2 = smov 96  }
 0x3a4   :  { %vm520_vm11 = vcmp.gt.f32.partialorder %v3589_v12, 0.0 }
 0x3b9   :  { %406 = vrot.lane.b32.xlu2 %v202_v41, %s5262_s30 }
 0x414   :  { %v245_v2 = vpop.xlane.xlu2 %244 }
 0x415   :  { %3841 = vrcp.f32 %v245_v2 }
 0x41b   :  { %v3842_v3 = vpop.eup %3841 }
 0x41c   :  { %v407_v4 = vpop.permute.xlu2 %406  ;;  %v247_v6 = vmul.f32 %v3842_v3, %v3840_v59 }
 0x41d   :  { %3587 = vmatmul.msk.f32.vlgmr.msrb.gmra.mxu0 %vm206_vm5, %v407_v4 }
 0x41e   :  { %3579 = vmatmul.msk.f32.vlgmr.msra.gmra.mxu3 %vm206_vm5, %v247_v6 }
 0x41f   :  { %3583 = vmatpush.xpose.msk.msra.mxu3 %vm206_vm5, %v343_v45 }
 0x426   :  { %3581 = vmatmul.msk.f32.vlgmr.msrb.gmra.mxu3 %vm206_vm5, %v275_v62 }
 0x42e   :  { %3584 = vmatmul.msk.f32.vlgmr.msra.gmra.mxu3 %vm206_vm5, %v341_v1 }
 0x49a   :  { %v431_v8 = vpop.f32.mrf.mxu0 }
 0x49b   :  { %v434_v10 = vsel %vm4201_vm7, %v431_v8, -1e+09 }
 0x49c   :  { %v435_v11 = vsel %vm206_vm5, %v434_v10, -inf }
 0x49d   :  { %436 = vmax.xlane.f32.xlu1 %v435_v11 }
 0x4a1   :  { %v4225_v13 = vpop.f32.mrf.mxu3 }
 0x4a5   :  { %130 = vadd.xlane.f32.xlu1 %v129_v14  ;;  %v778_v14 = vld [vmem:[%s5230_s10 + $0x18] sm:$0xff] }
 0x4a9   :  { %v299_v16 = vpop.f32.mrf.mxu3 }
 0x4aa   :  { %v302_v17 = vsel %vm4201_vm7, %v299_v16, -1e+09  ;;  %v777_v16 = vld [vmem:[%s5230_s10 + $0x10] sm:$0xff] }
 0x4ab   :  { %v303_v18 = vsel %vm206_vm5, %v302_v17, -inf }
 0x4ac   :  { %304 = vmax.xlane.f32.xlu0 %v303_v18  ;;  %v521_v18 = vsel %vm520_vm11, 1, %v4009_v48 }
 0x4b1   :  { %v365_v19 = vpop.f32.mrf.mxu3 }
 0x4b2   :  { %v368_v20 = vsel %vm4201_vm7, %v365_v19, -1e+09  ;;  %v522_v19 = vperm.slane %v521_v18, 0 }
 0x4b3   :  { %v369_v21 = vsel %vm206_vm5, %v368_v20, -inf }
 0x4b4   :  { %370 = vmax.xlane.f32.xlu2 %v369_v21  ;;  %vm4297_vm12 = vcmp.eq.s32.totalorder %v522_v19, 1 }
 0x4cc   :  { %380 = vrot.lane.b32.xlu2 %v4178_v40, %s5270_s29 }
 0x510   :  { %v437_v22 = vpop.xlane.xlu1 %436 }
 0x511   :  { %v438_v23 = vsub.f32 %v434_v10, %v437_v22 }
 0x513   :  { %v439_v24 = vmul.f32 1.442695, %v438_v23 }
 0x515   :  { %3843 = vpow2.f32 %v439_v24 }
 0x518   :  { %v131_v25 = vpop.xlane.xlu1 %130 }
 0x519   :  { %v133_v26 = vmul.f32 %v131_v25, %v4145_v15 }
 0x51b   :  { %v4237_v27 = vpop.eup %3843  ;;  %v135_v28 = vadd.f32 1e-06, %v133_v26 }
 0x51c   :  { %v441_v29 = vsel %vm206_vm5, %v4237_v27, 0.0 }
 0x51d   :  { %3845 = vrsqrt.f32 %v135_v28  ;;  %442 = vadd.xlane.f32.xlu0 %v441_v29  ;;  %vm152_vm8 = vweird.f32 %v135_v28 }
 0x51f   :  { %v305_v30 = vpop.xlane.xlu0 %304 }
 0x520   :  { %v306_v31 = vsub.f32 %v302_v17, %v305_v30  ;;  %v776_v17 = vld [vmem:[%s5230_s10 + $0x8] sm:$0xff] }
 0x522   :  { %v307_v32 = vmul.f32 1.442695, %v306_v31 }
 0x523   :  { %v3846_v33 = vpop.eup %3845 }
 0x524   :  { %v147_v35 = vmul.f32 %v3846_v33, %v135_v28  ;;  %3847 = vpow2.f32 %v307_v32  ;;  %vm153_vm9 = vweird.f32 %v3846_v33 }
 0x525   :  { %vm154_vm10 = vmor %vm152_vm8, %vm153_vm9 }
 0x526   :  { %v148_v36 = vmul.f32 %v3846_v33, %v147_v35 }
 0x527   :  { %v371_v38 = vpop.xlane.xlu2 %370 }
 0x528   :  { %v149_v41 = vmul.f32 0.5, %v148_v36  ;;  %v372_v42 = vsub.f32 %v368_v20, %v371_v38  ;;  %v775_v20 = vld [vmem:[%s5230_s10] sm:$0xff] }
 0x52a   :  { %v3848_v43 = vpop.eup %3847  ;;  %v150_v44 = vsub.f32 1.5, %v149_v41  ;;  %v373_v45 = vmul.f32 1.442695, %v372_v42 }
 0x52b   :  { %v309_v46 = vsel %vm206_vm5, %v3848_v43, 0.0 }
 0x52c   :  { %v151_v47 = vmul.f32 %v3846_v33, %v150_v44  ;;  %3849 = vpow2.f32 %v373_v45  ;;  %310 = vadd.xlane.f32.xlu1 %v309_v46 }
 0x52e   :  { %v155_v49 = vsel %vm154_vm10, %v3846_v33, %v151_v47 }
 0x52f   :  { %v157_v50 = vmul.f32 %v155_v49, %v123_v9  ;;  %v381_v61 = vpop.permute.xlu2 %380 }
 0x531   :  { %446 = vrot.lane.b32.xlu0 %v4178_v40, %s5266_s3  ;;  %v162_v52 = vmul.f32 %v4165_v34, %v157_v50 }
 0x532   :  { %v3850_v53 = vpop.eup %3849 }
 0x533   :  { %v375_v54 = vsel %vm206_vm5, %v3850_v53, 0.0  ;;  %v4247_v55 = vadd.f32 %v4170_v37, %v162_v52 }
 0x534   :  { %376 = vadd.xlane.f32.xlu1 %v375_v54 }
 0x535   :  { %3576 = vmatmul.msk.f32.gmra.mxu1 %vm75_vm0, %v4247_v55 }
 0x54d   :  { %314 = vrot.lane.b32.xlu1 %v4178_v40, %s5268_s21 }
 0x590   :  { %v443_v58 = vpop.xlane.xlu0 %442 }
 0x59f   :  { %v311_v56 = vpop.xlane.xlu1 %310 }
 0x5a0   :  { %3851 = vrcp.f32 %v311_v56 }
 0x5a3   :  { %v447_v62 = vpop.permute.xlu0 %446 }
 0x5a6   :  { %v3852_v40 = vpop.eup %3851 }
 0x5a7   :  { %v377_v37 = vpop.xlane.xlu1 %376  ;;  %v313_v60 = vmul.f32 %v3852_v40, %v3848_v43 }
 0x5a8   :  { %3853 = vrcp.f32 %v377_v37 }
 0x5a9   :  { %3855 = vrcp.f32 %v443_v58 }
 0x5ae   :  { %v3854_v63 = vpop.eup %3853 }
 0x5af   :  { %v379_v0 = vmul.f32 %v3854_v63, %v3850_v53  ;;  %v3856_v1 = vpop.eup %3855 }
 0x5b0   :  { %v445_v2 = vmul.f32 %v3856_v1, %v4237_v27 }
 0x5b2   :  { %v4253_v57 = vpop.f32.mrf.mxu1 }
 0x5b3   :  { %630 = vrot.lane.b32.xlu2 %v4253_v57, %s5254_s24  ;;  %493 = vrot.lane.b32.xlu1 %v4253_v57, %s5256_s23  ;;  %v491_v34 = vmul.f32 0.35355338, %v4253_v57  ;;  %s5308_s23 = smov 88   ;;  %s5309_s24 = smov 112  }
 0x5b5   :  { %628 = vrot.lane.b32.xlu0 %v491_v34, %s5248_s5  ;;  %s5311_s5 = smov 8  }
 0x5bb   :  { %564 = vrot.lane.b32.xlu1 %v4253_v57, %s5250_s4  ;;  %562 = vrot.lane.b32.xlu2 %v491_v34, %s5246_s0  ;;  %s5306_s0 = smov 80   ;;  %s5307_s4 = smov 72  }
 0x5bf   :  { %v315_v59 = vpop.permute.xlu1 %314 }
 0x5c0   :  { %335 = vmatpush.msrb.mxu2 %v315_v59 }
 0x5c1   :  { %3582 = vmatmul.msk.f32.vlgmr.msrb.gmra.mxu2 %vm206_vm5, %v313_v60 }
 0x5c2   :  { %401 = vmatpush.msra.mxu2 %v381_v61 }
 0x5c3   :  { %696 = vrot.lane.b32.xlu2 %v4253_v57, %s5252_s25  ;;  %s5310_s25 = smov 120  }
 0x5c4   :  { %467 = vmatpush.msrb.mxu2 %v447_v62 }
 0x5c9   :  { %3585 = vmatmul.msk.f32.vlgmr.msra.gmra.mxu2 %vm206_vm5, %v379_v0 }
 0x5d1   :  { %3588 = vmatmul.msk.f32.vlgmr.msrb.gmra.mxu2 %vm206_vm5, %v445_v2 }
 0x60d   :  { %v631_v3 = vpop.permute.xlu2 %630 }
 0x615   :  { %v563_v4 = vpop.permute.xlu2 %562 }
 0x61d   :  { %v697_v7 = vpop.permute.xlu2 %696 }
 0x625   :  { %v494_v6 = vpop.permute.xlu1 %493 }
 0x626   :  { %3590 = vmatpush.xpose.msk.msrb.mxu3 %vm206_vm5, %v494_v6 }
 0x627   :  { %v629_v8 = vpop.permute.xlu0 %628 }
 0x629   :  { %3591 = vmatmul.msk.f32.vlgmr.msrb.gmra.mxu3 %vm206_vm5, %v491_v34 }
 0x62a   :  { %3596 = vmatpush.xpose.msk.msra.mxu3 %vm206_vm5, %v631_v3 }
 0x62d   :  { %v565_v5 = vpop.permute.xlu1 %564 }
 0x62e   :  { %3593 = vmatpush.xpose.msk.msra.mxu0 %vm206_vm5, %v565_v5  ;;  %797 = vmatpush.msrb.mxu3 %v778_v14 }
 0x630   :  { %798 = vmatpush.msrb.mxu3 %v777_v16 }
 0x631   :  { %3594 = vmatmul.msk.f32.vlgmr.msra.gmra.mxu0 %vm206_vm5, %v563_v4  ;;  %3597 = vmatmul.msk.f32.vlgmr.msra.gmra.mxu3 %vm206_vm5, %v629_v8 }
 0x632   :  { %3599 = vmatpush.xpose.msk.msrb.mxu0 %vm206_vm5, %v697_v7  ;;  %799 = vmatpush.msrb.mxu3 %v776_v17 }
 0x634   :  { %800 = vmatpush.msrb.mxu3 %v775_v20 }
 0x644   :  { %v337_v9 = vpop.f32.mrf.mxu2 }
 0x645   :  { %473 = vrot.lane.b32.xlu0 %v337_v9, %s5260_s26 }
 0x64c   :  { %v403_v10 = vpop.f32.mrf.mxu2 }
 0x64d   :  { %477 = vrot.lane.b32.xlu1 %v403_v10, %s5258_s27  ;;  %s5317_s27 = smov 104  }
 0x654   :  { %v469_v11 = vpop.f32.mrf.mxu2 }
 0x655   :  { %694 = vrot.lane.b32.xlu1 %v491_v34, %s5262_s30  ;;  %481 = vrot.lane.b32.xlu0 %v469_v11, %s5264_s28 }
 0x6ac   :  { %v517_v22 = vpop.f32.mrf.mxu3 }
 0x6ad   :  { %v524_v23 = vsel %vm4297_vm12, %v517_v22, -1e+09 }
 0x6ae   :  { %v587_v24 = vpop.f32.mrf.mxu0  ;;  %v525_v25 = vsel %vm206_vm5, %v524_v23, -inf }
 0x6af   :  { %v590_v48 = vsel %vm4297_vm12, %v587_v24, -1e+09  ;;  %526 = vmax.xlane.f32.xlu2 %v525_v25 }
 0x6b0   :  { %v591_v26 = vsel %vm206_vm5, %v590_v48, -inf }
 0x6b1   :  { %592 = vmax.xlane.f32.xlu0 %v591_v26 }
 0x6b4   :  { %v653_v27 = vpop.f32.mrf.mxu3 }
 0x6b5   :  { %v656_v28 = vsel %vm4297_vm12, %v653_v27, -1e+09 }
 0x6b6   :  { %v657_v29 = vsel %vm206_vm5, %v656_v28, -inf }
 0x6b7   :  { %658 = vmax.xlane.f32.xlu1 %v657_v29  ;;  %v474_v30 = vpop.permute.xlu0 %473 }
 0x6b8   :  { %v484_v32 = vsel %vm206_vm5, %v4225_v13, %v474_v30 }
 0x6bf   :  { %v478_v31 = vpop.permute.xlu1 %477 }
 0x6c0   :  { %v486_v33 = vsel %vm485_vm13, %v484_v32, %v478_v31  ;;  %v865_v31 = vld [vmem:[%s5233_s13 + $0x8] sm:$0xff] }
 0x6c7   :  { %v482_v35 = vpop.permute.xlu0 %481  ;;  %v695_v36 = vpop.permute.xlu1 %694 }
 0x6c8   :  { %v488_v38 = vsel %vm487_vm14, %v486_v33, %v482_v35  ;;  %3600 = vmatmul.msk.f32.vlgmr.msrb.gmra.mxu0 %vm206_vm5, %v695_v36  ;;  %v864_v33 = vld [vmem:[%s5233_s13] sm:$0xff] }
 0x6c9   :  { %3602 = vmatmul.msk.f32.vlgmr.msrb.gmra.mxu3 %vm75_vm0, %v488_v38 }
 0x722   :  { %v527_v41 = vpop.xlane.xlu2 %526 }
 0x723   :  { %v528_v42 = vsub.f32 %v524_v23, %v527_v41  ;;  %v4355_v41 = vld [vmem:[%s5231_s11] ss:$0 sm:$0xff] }
 0x724   :  { %v593_v46 = vpop.xlane.xlu0 %592 }
 0x725   :  { %v529_v43 = vmul.f32 1.442695, %v528_v42  ;;  %v594_v13 = vsub.f32 %v590_v48, %v593_v46 }
 0x727   :  { %3857 = vpow2.f32 %v529_v43  ;;  %v595_v47 = vmul.f32 1.442695, %v594_v13 }
 0x729   :  { %3859 = vpow2.f32 %v595_v47  ;;  %v910_v47 = vld [vmem:[%s5235_s15 + $0x38] sm:$0xff] }
 0x72a   :  { %v659_v49 = vpop.xlane.xlu1 %658  ;;  %930 = vmatpush.msra.mxu0 %v910_v47 }
 0x72b   :  { %v660_v52 = vsub.f32 %v656_v28, %v659_v49  ;;  %v867_v28 = vld [vmem:[%s5233_s13 + $0x18] sm:$0xff]  ;;  %v909_v49 = vld [vmem:[%s5235_s15 + $0x30] sm:$0xff] }
 0x72c   :  { %931 = vmatpush.msra.mxu0 %v909_v49 }
 0x72d   :  { %v3858_v44 = vpop.eup %3857  ;;  %v661_v56 = vmul.f32 1.442695, %v660_v52  ;;  %v907_v52 = vld [vmem:[%s5235_s15 + $0x20] sm:$0xff] }
 0x72e   :  { %v531_v45 = vsel %vm206_vm5, %v3858_v44, 0.0 }
 0x72f   :  { %532 = vadd.xlane.f32.xlu1 %v531_v45  ;;  %v3860_v37 = vpop.eup %3859  ;;  %3861 = vpow2.f32 %v661_v56  ;;  %v905_v56 = vld [vmem:[%s5235_s15 + $0x10] sm:$0xff] }
 0x730   :  { %v597_v59 = vsel %vm206_vm5, %v3860_v37, 0.0 }
 0x735   :  { %v3862_v60 = vpop.eup %3861 }
 0x736   :  { %v663_v61 = vsel %vm206_vm5, %v3862_v60, 0.0 }
 0x745   :  { %v719_v50 = vpop.f32.mrf.mxu0 }
 0x746   :  { %v722_v53 = vsel %vm4297_vm12, %v719_v50, -1e+09  ;;  %v908_v50 = vld [vmem:[%s5235_s15 + $0x28] sm:$0xff] }
 0x747   :  { %v723_v54 = vsel %vm206_vm5, %v722_v53, -inf  ;;  %932 = vmatpush.msra.mxu0 %v908_v50 }
 0x748   :  { %536 = vrot.lane.b32.xlu1 %v4253_v57, %s5273_s22  ;;  %724 = vmax.xlane.f32.xlu2 %v723_v54 }
 0x749   :  { %933 = vmatpush.msra.mxu0 %v907_v52 }
 0x74c   :  { %v802_v34 = vpop.f32.mrf.mxu3 }
 0x74d   :  { %v803_v58 = vadd.f32 %v802_v34, %v4174_v39  ;;  %v904_v34 = vld [vmem:[%s5235_s15 + $0x8] sm:$0xff] }
 0x74f   :  { %v810_v40 = vsel %vm75_vm0, %v803_v58, 0.0 }
 0x750   :  { %734 = vrot.lane.b32.xlu1 %v4253_v57, %s5266_s3  ;;  %811 = vadd.xlane.f32.xlu0 %v810_v40 }
 0x751   :  { %598 = vadd.xlane.f32.xlu2 %v597_v59  ;;  %v4395_v59 = vld [vmem:[%s5234_s14] ss:$0 sm:$0xff] }
 0x758   :  { %664 = vadd.xlane.f32.xlu0 %v663_v61 }
 0x76c   :  { %602 = vrot.lane.b32.xlu0 %v4253_v57, %s5268_s21 }
 0x7a2   :  { %v533_v62 = vpop.xlane.xlu1 %532 }
 0x7a3   :  { %3863 = vrcp.f32 %v533_v62 }
 0x7a9   :  { %v3864_v39 = vpop.eup %3863 }
 0x7aa   :  { %v535_v63 = vmul.f32 %v3864_v39, %v3858_v44  ;;  %v4360_v44 = vld [vmem:[%s5232_s12] ss:$0 sm:$0xff] }
 0x7ba   :  { %v537_v0 = vpop.permute.xlu1 %536 }
 0x7bb   :  { %v725_v1 = vpop.xlane.xlu2 %724  ;;  %557 = vmatpush.msra.mxu2 %v537_v0 }
 0x7bc   :  { %v726_v2 = vsub.f32 %v722_v53, %v725_v1  ;;  %3592 = vmatmul.msk.f32.vlgmr.msra.gmra.mxu2 %vm206_vm5, %v535_v63  ;;  %v906_v53 = vld [vmem:[%s5235_s15 + $0x18] sm:$0xff] }
 0x7bd   :  { %934 = vmatpush.msra.mxu0 %v906_v53 }
 0x7be   :  { %v727_v3 = vmul.f32 1.442695, %v726_v2 }
 0x7bf   :  { %935 = vmatpush.msra.mxu0 %v905_v56 }
 0x7c0   :  { %3865 = vpow2.f32 %v727_v3 }
 0x7c1   :  { %936 = vmatpush.msra.mxu0 %v904_v34 }
 0x7c2   :  { %v735_v18 = vpop.permute.xlu1 %734 }
 0x7c3   :  { %v812_v4 = vpop.xlane.xlu0 %811 }
 0x7c4   :  { %v816_v6 = vmul.f32 %v812_v4, %v4145_v15  ;;  %v599_v11 = vpop.xlane.xlu2 %598  ;;  %v4406_v4 = vld [vmem:[%s5236_s16] ss:$0 sm:$0xff] }
 0x7c5   :  { %3867 = vrcp.f32 %v599_v11 }
 0x7c6   :  { %v3866_v5 = vpop.eup %3865  ;;  %v818_v7 = vsub.f32 %v803_v58, %v816_v6 }
 0x7c7   :  { %v729_v8 = vsel %vm206_vm5, %v3866_v5, 0.0 }
 0x7c8   :  { %730 = vadd.xlane.f32.xlu2 %v729_v8  ;;  %v820_v9 = vmul.f32 %v818_v7, %v818_v7 }
 0x7ca   :  { %v822_v10 = vsel %vm75_vm0, %v820_v9, 0.0 }
 0x7cb   :  { %v665_v12 = vpop.xlane.xlu0 %664  ;;  %v3868_v14 = vpop.eup %3867 }
 0x7cc   :  { %v601_v17 = vmul.f32 %v3868_v14, %v3860_v37  ;;  %v903_v37 = vld [vmem:[%s5235_s15] sm:$0xff] }
 0x7cd   :  { %937 = vmatpush.msra.mxu0 %v903_v37 }
 0x7d0   :  { %823 = vadd.xlane.f32.xlu2 %v822_v10 }
 0x7de   :  { %v603_v16 = vpop.permute.xlu0 %602 }
 0x7df   :  { %623 = vmatpush.msrb.mxu1 %v603_v16 }
 0x7e0   :  { %3595 = vmatmul.msk.f32.vlgmr.msrb.gmra.mxu1 %vm206_vm5, %v601_v17 }
 0x7e1   :  { %755 = vmatpush.msra.mxu1 %v735_v18 }
 0x7e8   :  { %668 = vrot.lane.b32.xlu2 %v4253_v57, %s5270_s29  ;;  %v866_v57 = vld [vmem:[%s5233_s13 + $0x10] sm:$0xff] }
 0x83b   :  { %v731_v19 = vpop.xlane.xlu2 %730 }
 0x83c   :  { %3869 = vrcp.f32 %v731_v19 }
 0x83d   :  { %3871 = vrcp.f32 %v665_v12 }
 0x83f   :  { %v559_v58 = vpop.f32.mrf.mxu2 }
 0x842   :  { %v3870_v20 = vpop.eup %3869 }
 0x843   :  { %v733_v22 = vmul.f32 %v3870_v20, %v3866_v5  ;;  %v824_v23 = vpop.xlane.xlu2 %823  ;;  %v3872_v48 = vpop.eup %3871 }
 0x844   :  { %v828_v24 = vmul.f32 %v824_v23, %v4145_v15  ;;  %v667_v26 = vmul.f32 %v3872_v48, %v3862_v60  ;;  %v3609_v48 = vld [vmem:[%s5228_s9 + $0x28] sm:$0xff] }
 0x845   :  { %3601 = vmatmul.msk.f32.vlgmr.msra.gmra.mxu1 %vm206_vm5, %v733_v22 }
 0x846   :  { %v830_v25 = vadd.f32 1e-06, %v828_v24 }
 0x848   :  { %3873 = vrsqrt.f32 %v830_v25  ;;  %vm838_vm1 = vweird.f32 %v830_v25 }
 0x84b   :  { %v669_v27 = vpop.permute.xlu2 %668 }
 0x84c   :  { %689 = vmatpush.msrb.mxu2 %v669_v27 }
 0x84d   :  { %3598 = vmatmul.msk.f32.vlgmr.msrb.gmra.mxu2 %vm206_vm5, %v667_v26  ;;  %v3608_v26 = vld [vmem:[%s5228_s9 + $0x20] sm:$0xff] }
 0x84e   :  { %v3874_v29 = vpop.eup %3873  ;;  %890 = vmatpush.msra.mxu2 %v867_v28 }
 0x84f   :  { %v833_v30 = vmul.f32 %v3874_v29, %v830_v25  ;;  %vm839_vm15 = vweird.f32 %v3874_v29  ;;  %v3610_v25 = vld [vmem:[%s5228_s9 + $0x30] sm:$0xff] }
 0x850   :  { %891 = vmatpush.msra.mxu2 %v866_v57  ;;  %vm840_vm2 = vmor %vm838_vm1, %vm839_vm15 }
 0x851   :  { %v834_v32 = vmul.f32 %v3874_v29, %v833_v30 }
 0x852   :  { %892 = vmatpush.msra.mxu2 %v865_v31 }
 0x853   :  { %v835_v35 = vmul.f32 0.5, %v834_v32 }
 0x854   :  { %893 = vmatpush.msra.mxu2 %v864_v33 }
 0x855   :  { %v836_v36 = vsub.f32 1.5, %v835_v35 }
 0x857   :  { %v837_v38 = vmul.f32 %v3874_v29, %v836_v36  ;;  %v4432_v36 = vld [vmem:[%s5237_s17] ss:$0 sm:$0xff] }
 0x859   :  { %v841_v42 = vsel %vm840_vm2, %v3874_v29, %v837_v38 }
 0x85a   :  { %v852_v43 = vmul.f32 %v841_v42, %v818_v7 }
 0x85c   :  { %v857_v45 = vmul.f32 %v4355_v41, %v852_v43  ;;  %v4437_v43 = vld [vmem:[%s5238_s18] ss:$0 sm:$0xff] }
 0x85d   :  { %v625_v46 = vpop.f32.mrf.mxu1 }
 0x85e   :  { %761 = vrot.lane.b32.xlu0 %v625_v46, %s5260_s26  ;;  %v862_v13 = vadd.f32 %v4360_v44, %v857_v45  ;;  %s5304_s26 = smov 16  }
 0x860   :  { %3604 = vmatmul.msk.f32.vlgmr.msra.gmra.mxu2 %vm75_vm0, %v862_v13 }
 0x8c2   :  { %v757_v54 = vpop.f32.mrf.mxu1 }
 0x8c3   :  { %769 = vrot.lane.b32.xlu0 %v757_v54, %s5264_s28 }
 0x8d0   :  { %v691_v40 = vpop.f32.mrf.mxu2  ;;  %v762_v39 = vpop.permute.xlu0 %761 }
 0x8d1   :  { %765 = vrot.lane.b32.xlu1 %v691_v40, %s5304_s26  ;;  %v772_v63 = vsel %vm206_vm5, %v559_v58, %v762_v39 }
 0x8e3   :  { %v895_v60 = vpop.f32.mrf.mxu2 }
 0x8e4   :  { %v896_v61 = vadd.f32 %v4395_v59, %v895_v60 }
 0x8e6   :  { %v901_v62 = vmax.f32 %v896_v61, 0.0 }
 0x8e8   :  { %3606 = vmatmul.msk.f32.vlgmr.msra.gmra.mxu0 %vm915_vm3, %v901_v62 }
 0x935   :  { %v770_v1 = vpop.permute.xlu0 %769 }
 0x943   :  { %v766_v0 = vpop.permute.xlu1 %765 }
 0x944   :  { %v773_v2 = vsel %vm485_vm13, %v772_v63, %v766_v0 }
 0x945   :  { %v774_v3 = vsel %vm487_vm14, %v773_v2, %v770_v1 }
 0x946   :  { %3603 = vmatmul.msk.f32.gmra.mxu3 %vm75_vm0, %v774_v3 }
 0x965   :  { %v939_v6 = vpop.f32.mrf.mxu0 }
 0x966   :  { %v940_v5 = vadd.f32 %v4406_v4, %v939_v6 }
 0x968   :  { %v945_v7 = vadd.f32 %v940_v5, %v862_v13 }
 0x96a   :  { %v949_v8 = vsel %vm75_vm0, %v945_v7, 0.0 }
 0x96b   :  { %950 = vadd.xlane.f32.xlu1 %v949_v8 }
 0x9c9   :  { %v805_v9 = vpop.f32.mrf.mxu3 }
 0x9ca   :  { %v806_v10 = vadd.f32 %v805_v9, %v4247_v55  ;;  %v3611_v55 = vld [vmem:[%s5228_s9 + $0x38] sm:$0xff] }
 0x9cb   :  { %1026 = vmatpush.msrb.mxu1 %v3611_v55 }
 0x9cc   :  { %v813_v11 = vsel %vm75_vm0, %v806_v10, 0.0 }
 0x9cd   :  { %814 = vadd.xlane.f32.xlu0 %v813_v11  ;;  %1027 = vmatpush.msrb.mxu1 %v3610_v25 }
 0x9cf   :  { %1028 = vmatpush.msrb.mxu1 %v3609_v48 }
 0x9d1   :  { %1029 = vmatpush.msrb.mxu1 %v3608_v26 }
 0x9de   :  { %v951_v12 = vpop.xlane.xlu1 %950 }
 0x9df   :  { %v955_v14 = vmul.f32 %v951_v12, %v4145_v15 }
 0x9e1   :  { %v957_v16 = vsub.f32 %v945_v7, %v955_v14 }
 0x9e3   :  { %v959_v17 = vmul.f32 %v957_v16, %v957_v16 }
 0x9e5   :  { %v961_v18 = vsel %vm75_vm0, %v959_v17, 0.0 }
 0x9e6   :  { %962 = vadd.xlane.f32.xlu2 %v961_v18 }
 0xa40   :  { %v815_v19 = vpop.xlane.xlu0 %814 }
 0xa41   :  { %v817_v20 = vmul.f32 %v815_v19, %v4145_v15 }
 0xa43   :  { %v819_v22 = vsub.f32 %v806_v10, %v817_v20 }
 0xa45   :  { %v821_v23 = vmul.f32 %v819_v22, %v819_v22 }
 0xa47   :  { %v825_v24 = vsel %vm75_vm0, %v821_v23, 0.0 }
 0xa48   :  { %826 = vadd.xlane.f32.xlu1 %v825_v24 }
 0xa59   :  { %v963_v27 = vpop.xlane.xlu2 %962 }
 0xa5a   :  { %v967_v28 = vmul.f32 %v963_v27, %v4145_v15 }
 0xa5c   :  { %v969_v57 = vadd.f32 1e-06, %v967_v28 }
 0xa5e   :  { %3875 = vrsqrt.f32 %v969_v57  ;;  %vm977_vm6 = vweird.f32 %v969_v57 }
 0xa64   :  { %v3876_v29 = vpop.eup %3875 }
 0xa65   :  { %v972_v30 = vmul.f32 %v3876_v29, %v969_v57  ;;  %vm978_vm4 = vweird.f32 %v3876_v29 }
 0xa66   :  { %vm979_vm8 = vmor %vm977_vm6, %vm978_vm4 }
 0xa67   :  { %v973_v31 = vmul.f32 %v3876_v29, %v972_v30 }
 0xa69   :  { %v974_v32 = vmul.f32 0.5, %v973_v31 }
 0xa6b   :  { %v975_v33 = vsub.f32 1.5, %v974_v32 }
 0xa6d   :  { %v976_v35 = vmul.f32 %v3876_v29, %v975_v33 }
 0xa6f   :  { %v980_v38 = vsel %vm979_vm8, %v3876_v29, %v976_v35 }
 0xa70   :  { %v991_v42 = vmul.f32 %v980_v38, %v957_v16 }
 0xa72   :  { %v996_v45 = vmul.f32 %v4432_v36, %v991_v42 }
 0xa74   :  { %v4441_v46 = vadd.f32 %v4437_v43, %v996_v45 }
 0xa76   :  { %3612 = vmatmul.msk.f32.vlgmr.msrb.gmra.mxu1 %vm75_vm0, %v4441_v46 }
 0xabb   :  { %v827_v13 = vpop.xlane.xlu1 %826 }
 0xabc   :  { %v829_v47 = vmul.f32 %v827_v13, %v4145_v15 }
 0xabe   :  { %v831_v49 = vadd.f32 1e-06, %v829_v47 }
 0xac0   :  { %3877 = vrsqrt.f32 %v831_v49  ;;  %vm848_vm10 = vweird.f32 %v831_v49 }
 0xac6   :  { %v3878_v50 = vpop.eup %3877 }
 0xac7   :  { %v843_v52 = vmul.f32 %v3878_v50, %v831_v49  ;;  %vm849_vm9 = vweird.f32 %v3878_v50 }
 0xac8   :  { %vm850_vm11 = vmor %vm848_vm10, %vm849_vm9 }
 0xac9   :  { %v844_v53 = vmul.f32 %v3878_v50, %v843_v52 }
 0xacb   :  { %v845_v54 = vmul.f32 0.5, %v844_v53 }
 0xacd   :  { %v846_v56 = vsub.f32 1.5, %v845_v54 }
 0xacf   :  { %v847_v34 = vmul.f32 %v3878_v50, %v846_v56 }
 0xad1   :  { %v851_v37 = vsel %vm850_vm11, %v3878_v50, %v847_v34 }
 0xad2   :  { %v853_v58 = vmul.f32 %v851_v37, %v819_v22 }
 0xad4   :  { %v858_v40 = vmul.f32 %v4355_v41, %v853_v58 }
 0xad6   :  { %v863_v60 = vadd.f32 %v4360_v44, %v858_v40 }
 0xad8   :  { %3605 = vmatmul.msk.f32.gmra.mxu2 %vm75_vm0, %v863_v60 }
 0xaf3   :  { %v4449_v61 = vpop.f32.mrf.mxu1 }
 0xaf4   :  { %1039 = vrot.lane.b32.xlu0 %v4449_v61, %s5305_s2  ;;  %v1037_v41 = vmul.f32 0.35355338, %v4449_v61 }
 0xafc   :  { %1078 = vrot.lane.b32.xlu0 %v4449_v61, %s5273_s22 }
 0xb04   :  { %1172 = vrot.lane.b32.xlu0 %v4449_v61, %s5306_s0 }
 0xb0c   :  { %1238 = vrot.lane.b32.xlu0 %v4449_v61, %s5307_s4 }
 0xb14   :  { %1236 = vrot.lane.b32.xlu0 %v1037_v41, %s5262_s30 }
 0xb5b   :  { %v898_v44 = vpop.f32.mrf.mxu2 }
 0xb5c   :  { %v899_v62 = vadd.f32 %v4395_v59, %v898_v44 }
 0xb5e   :  { %v902_v39 = vmax.f32 %v899_v62, 0.0 }
 0xb60   :  { %3607 = vmatmul.msk.f32.gmra.mxu0 %vm915_vm3, %v902_v39 }
 0xb66   :  { %v1040_v63 = vpop.permute.xlu0 %1039 }
 0xb67   :  { %3614 = vmatpush.xpose.msk.msra.mxu3 %vm206_vm5, %v1040_v63 }
 0xb6a   :  { %3615 = vmatmul.msk.f32.vlgmr.msra.gmra.mxu3 %vm206_vm5, %v1037_v41 }
 0xb6e   :  { %v1079_v0 = vpop.permute.xlu0 %1078 }
 0xb6f   :  { %1099 = vmatpush.msrb.mxu2 %v1079_v0 }
 0xb76   :  { %v1173_v1 = vpop.permute.xlu0 %1172 }
 0xb77   :  { %3620 = vmatpush.xpose.msk.msra.mxu2 %vm206_vm5, %v1173_v1 }
 0xb7e   :  { %v1239_v55 = vpop.permute.xlu0 %1238 }
 0xb86   :  { %v1237_v13 = vpop.permute.xlu0 %1236 }
 0xbdd   :  { %v942_v2 = vpop.f32.mrf.mxu0 }
 0xbde   :  { %v943_v3 = vadd.f32 %v4406_v4, %v942_v2 }
 0xbe0   :  { %v946_v6 = vadd.f32 %v943_v3, %v863_v60 }
 0xbe2   :  { %v952_v5 = vsel %vm75_vm0, %v946_v6, 0.0 }
 0xbe3   :  { %953 = vadd.xlane.f32.xlu2 %v952_v5 }
 0xbed   :  { %v1063_v59 = vpop.f32.mrf.mxu3 }
 0xbee   :  { %v1066_v7 = vsel %vm4201_vm7, %v1063_v59, -1e+09 }
 0xbef   :  { %v1067_v8 = vsel %vm206_vm5, %v1066_v7, -inf }
 0xbf0   :  { %1068 = vmax.xlane.f32.xlu1 %v1067_v8 }
 0xc56   :  { %v954_v9 = vpop.xlane.xlu2 %953 }
 0xc57   :  { %v956_v10 = vmul.f32 %v954_v9, %v4145_v15 }
 0xc59   :  { %v958_v11 = vsub.f32 %v946_v6, %v956_v10 }
 0xc5b   :  { %v960_v12 = vmul.f32 %v958_v11, %v958_v11 }
 0xc5d   :  { %v964_v14 = vsel %vm75_vm0, %v960_v12, 0.0 }
 0xc5e   :  { %965 = vadd.xlane.f32.xlu2 %v964_v14 }
 0xc63   :  { %v1069_v4 = vpop.xlane.xlu1 %1068 }
 0xc64   :  { %v1070_v16 = vsub.f32 %v1066_v7, %v1069_v4 }
 0xc66   :  { %v1071_v17 = vmul.f32 1.442695, %v1070_v16 }
 0xc68   :  { %3879 = vpow2.f32 %v1071_v17 }
 0xc6e   :  { %v3880_v18 = vpop.eup %3879 }
 0xc6f   :  { %v1073_v19 = vsel %vm206_vm5, %v3880_v18, 0.0 }
 0xc70   :  { %1074 = vadd.xlane.f32.xlu1 %v1073_v19 }
 0xc76   :  { %1106 = vrot.lane.b32.xlu2 %v4449_v61, %s5308_s23 }
 0xc7e   :  { %1170 = vrot.lane.b32.xlu2 %v1037_v41, %s5309_s24 }
 0xc89   :  { %1104 = vrot.lane.b32.xlu1 %v1037_v41, %s5310_s25 }
 0xcd1   :  { %v966_v20 = vpop.xlane.xlu2 %965 }
 0xcd2   :  { %v968_v22 = vmul.f32 %v966_v20, %v4145_v15 }
 0xcd4   :  { %v970_v23 = vadd.f32 1e-06, %v968_v22 }
 0xcd6   :  { %3881 = vrsqrt.f32 %v970_v23  ;;  %vm987_vm1 = vweird.f32 %v970_v23 }
 0xcd9   :  { %v1107_v24 = vpop.permute.xlu2 %1106 }
 0xcda   :  { %3617 = vmatpush.xpose.msk.msra.mxu1 %vm206_vm5, %v1107_v24 }
 0xcdc   :  { %v3882_v25 = vpop.eup %3881 }
 0xcdd   :  { %v982_v48 = vmul.f32 %v3882_v25, %v970_v23  ;;  %vm988_vm15 = vweird.f32 %v3882_v25 }
 0xcde   :  { %3623 = vmatpush.xpose.msk.msrb.mxu1 %vm206_vm5, %v1239_v55  ;;  %vm989_vm2 = vmor %vm987_vm1, %vm988_vm15 }
 0xcdf   :  { %v983_v26 = vmul.f32 %v3882_v25, %v982_v48 }
 0xce1   :  { %v984_v27 = vmul.f32 0.5, %v983_v26  ;;  %v1171_v42 = vpop.permute.xlu2 %1170 }
 0xce3   :  { %v985_v28 = vsub.f32 1.5, %v984_v27  ;;  %v1075_v57 = vpop.xlane.xlu1 %1074 }
 0xce4   :  { %3883 = vrcp.f32 %v1075_v57 }
 0xce5   :  { %v986_v29 = vmul.f32 %v3882_v25, %v985_v28 }
 0xce7   :  { %v990_v30 = vsel %vm989_vm2, %v3882_v25, %v986_v29 }
 0xce8   :  { %v992_v31 = vmul.f32 %v990_v30, %v958_v11  ;;  %v3641_v30 = vld [vmem:[%s5230_s10 + $0x38] sm:$0xff] }
 0xcea   :  { %v3884_v32 = vpop.eup %3883  ;;  %v997_v33 = vmul.f32 %v4432_v36, %v992_v31  ;;  %v3640_v31 = vld [vmem:[%s5230_s10 + $0x30] sm:$0xff] }
 0xceb   :  { %v1077_v35 = vmul.f32 %v3884_v32, %v3880_v18  ;;  %v3639_v32 = vld [vmem:[%s5230_s10 + $0x28] sm:$0xff] }
 0xcec   :  { %v4483_v38 = vadd.f32 %v4437_v43, %v997_v33  ;;  %v3638_v33 = vld [vmem:[%s5230_s10 + $0x20] sm:$0xff] }
 0xced   :  { %3616 = vmatmul.msk.f32.vlgmr.msrb.gmra.mxu2 %vm206_vm5, %v1077_v35 }
 0xcee   :  { %3613 = vmatmul.msk.f32.gmra.mxu1 %vm75_vm0, %v4483_v38 }
 0xcf5   :  { %3621 = vmatmul.msk.f32.vlgmr.msra.gmra.mxu2 %vm206_vm5, %v1171_v42 }
 0xcfb   :  { %v1105_v45 = vpop.permute.xlu1 %1104 }
 0xcfc   :  { %3618 = vmatmul.msk.f32.vlgmr.msra.gmra.mxu1 %vm206_vm5, %v1105_v45 }
 0xd04   :  { %3624 = vmatmul.msk.f32.vlgmr.msrb.gmra.mxu1 %vm206_vm5, %v1237_v13 }
 0xd6b   :  { %v4493_v36 = vpop.f32.mrf.mxu1 }
 0xd6c   :  { %v1317_v9 = vmul.f32 0.35355338, %v4493_v36 }
 0xd70   :  { %v4491_v47 = vpop.f32.mrf.mxu2 }
 0xd78   :  { %v1195_v43 = vpop.f32.mrf.mxu2 }
 0xd79   :  { %v1198_v49 = vsel %vm4201_vm7, %v1195_v43, -1e+09  ;;  %v1129_v50 = vpop.f32.mrf.mxu1 }
 0xd7a   :  { %v1132_v52 = vsel %vm4201_vm7, %v1129_v50, -1e+09  ;;  %v1199_v53 = vsel %vm206_vm5, %v1198_v49, -inf }
 0xd7b   :  { %1200 = vmax.xlane.f32.xlu0 %v1199_v53  ;;  %v1133_v54 = vsel %vm206_vm5, %v1132_v52, -inf }
 0xd7c   :  { %1134 = vmax.xlane.f32.xlu1 %v1133_v54 }
 0xd81   :  { %v1261_v56 = vpop.f32.mrf.mxu1 }
 0xd82   :  { %v1264_v34 = vsel %vm4201_vm7, %v1261_v56, -1e+09 }
 0xd83   :  { %v1265_v37 = vsel %vm206_vm5, %v1264_v34, -inf }
 0xd84   :  { %1266 = vmax.xlane.f32.xlu2 %v1265_v37 }
 0xd8f   :  { %1144 = vrot.lane.b32.xlu0 %v4449_v61, %s5268_s21  ;;  %s5320_s21 = sld [smem:[#allocation9_spill]] }
 0xd97   :  { %1319 = vrot.lane.b32.xlu0 %v4493_v36, %s5305_s2 }
 0xd9f   :  { %1452 = vrot.lane.b32.xlu0 %v4493_v36, %s5306_s0 }
 0xdee   :  { %v1201_v58 = vpop.xlane.xlu0 %1200 }
 0xdef   :  { %v1135_v40 = vpop.xlane.xlu1 %1134  ;;  %v1202_v41 = vsub.f32 %v1198_v49, %v1201_v58 }
 0xdf0   :  { %v1136_v60 = vsub.f32 %v1132_v52, %v1135_v40 }
 0xdf1   :  { %v1203_v62 = vmul.f32 1.442695, %v1202_v41 }
 0xdf2   :  { %v1137_v44 = vmul.f32 1.442695, %v1136_v60 }
 0xdf4   :  { %3885 = vpow2.f32 %v1137_v44 }
 0xdf5   :  { %3887 = vpow2.f32 %v1203_v62 }
 0xdf7   :  { %v1267_v39 = vpop.xlane.xlu2 %1266 }
 0xdf8   :  { %v1268_v63 = vsub.f32 %v1264_v34, %v1267_v39 }
 0xdfa   :  { %v3886_v0 = vpop.eup %3885  ;;  %v1269_v1 = vmul.f32 1.442695, %v1268_v63 }
 0xdfb   :  { %v1139_v2 = vsel %vm206_vm5, %v3886_v0, 0.0  ;;  %v3888_v3 = vpop.eup %3887 }
 0xdfc   :  { %3889 = vpow2.f32 %v1269_v1  ;;  %1140 = vadd.xlane.f32.xlu1 %v1139_v2  ;;  %v1205_v7 = vsel %vm206_vm5, %v3888_v3, 0.0 }
 0xe01   :  { %v1145_v6 = vpop.permute.xlu0 %1144 }
 0xe02   :  { %v3890_v5 = vpop.eup %3889  ;;  %1165 = vmatpush.msrb.mxu3 %v1145_v6 }
 0xe03   :  { %v1271_v59 = vsel %vm206_vm5, %v3890_v5, 0.0 }
 0xe04   :  { %1272 = vadd.xlane.f32.xlu2 %v1271_v59  ;;  %1206 = vadd.xlane.f32.xlu1 %v1205_v7 }
 0xe09   :  { %v1320_v8 = vpop.permute.xlu0 %1319 }
 0xe0a   :  { %3626 = vmatpush.xpose.msk.msrb.mxu2 %vm206_vm5, %v1320_v8 }
 0xe0d   :  { %3627 = vmatmul.msk.f32.vlgmr.msrb.gmra.mxu2 %vm206_vm5, %v1317_v9 }
 0xe11   :  { %v1453_v10 = vpop.permute.xlu0 %1452 }
 0xe12   :  { %3632 = vmatpush.xpose.msk.msra.mxu2 %vm206_vm5, %v1453_v10 }
 0xe16   :  { %1620 = vmatpush.msrb.mxu2 %v3641_v30  ;;  %v3649_v30 = vld [vmem:[%s5233_s13 + $0x38] sm:$0xff] }
 0xe18   :  { %1621 = vmatpush.msrb.mxu2 %v3640_v31 }
 0xe1a   :  { %1622 = vmatpush.msrb.mxu2 %v3639_v32 }
 0xe1c   :  { %1276 = vrot.lane.b32.xlu2 %v4449_v61, %s5266_s3  ;;  %1623 = vmatpush.msrb.mxu2 %v3638_v33  ;;  %v3647_v33 = vld [vmem:[%s5233_s13 + $0x28] sm:$0xff] }
 0xe1d   :  { %1210 = vrot.lane.b32.xlu1 %v4449_v61, %s5270_s29  ;;  %s5314_s29 = smov 40  }
 0xe24   :  { %1450 = vrot.lane.b32.xlu2 %v1317_v9, %s5309_s24 }
 0xe6f   :  { %v1141_v11 = vpop.xlane.xlu1 %1140 }
 0xe70   :  { %3891 = vrcp.f32 %v1141_v11 }
 0xe76   :  { %v3892_v12 = vpop.eup %3891 }
 0xe77   :  { %v1143_v14 = vmul.f32 %v3892_v12, %v3886_v0  ;;  %v1273_v4 = vpop.xlane.xlu2 %1272  ;;  %v1207_v19 = vpop.xlane.xlu1 %1206 }
 0xe78   :  { %3893 = vrcp.f32 %v1273_v4 }
 0xe79   :  { %3619 = vmatmul.msk.f32.vlgmr.msrb.gmra.mxu3 %vm206_vm5, %v1143_v14  ;;  %3895 = vrcp.f32 %v1207_v19 }
 0xe7e   :  { %v3894_v16 = vpop.eup %3893 }
 0xe7f   :  { %v1275_v17 = vmul.f32 %v3894_v16, %v3890_v5  ;;  %v1277_v18 = vpop.permute.xlu2 %1276  ;;  %v3896_v61 = vpop.eup %3895 }
 0xe80   :  { %1297 = vmatpush.msra.mxu3 %v1277_v18  ;;  %v1209_v22 = vmul.f32 %v3896_v61, %v3888_v3 }
 0xe81   :  { %3625 = vmatmul.msk.f32.vlgmr.msra.gmra.mxu3 %vm206_vm5, %v1275_v17 }
 0xe87   :  { %v1451_v20 = vpop.permute.xlu2 %1450 }
 0xe88   :  { %3633 = vmatmul.msk.f32.vlgmr.msra.gmra.mxu2 %vm206_vm5, %v1451_v20 }
 0xe8f   :  { %v1211_v23 = vpop.permute.xlu1 %1210 }
 0xe90   :  { %1231 = vmatpush.msrb.mxu0 %v1211_v23  ;;  %v1343_v48 = vpop.f32.mrf.mxu2 }
 0xe91   :  { %3622 = vmatmul.msk.f32.vlgmr.msrb.gmra.mxu0 %vm206_vm5, %v1209_v22  ;;  %v1346_v57 = vsel %vm4297_vm12, %v1343_v48, -1e+09 }
 0xe92   :  { %v1347_v29 = vsel %vm206_vm5, %v1346_v57, -inf }
 0xefc   :  { %v1167_v24 = vpop.f32.mrf.mxu3 }
 0xefd   :  { %1303 = vrot.lane.b32.xlu0 %v1167_v24, %s5311_s5 }
 0xf04   :  { %v1299_v55 = vpop.f32.mrf.mxu3 }
 0xf05   :  { %1386 = vrot.lane.b32.xlu0 %v4493_v36, %s5308_s23  ;;  %1311 = vrot.lane.b32.xlu2 %v1299_v55, %s5264_s28 }
 0xf0b   :  { %v1475_v26 = vpop.f32.mrf.mxu2 }
 0xf0c   :  { %v1478_v27 = vsel %vm4297_vm12, %v1475_v26, -1e+09 }
 0xf0d   :  { %1516 = vrot.lane.b32.xlu0 %v1317_v9, %s5262_s30  ;;  %1518 = vrot.lane.b32.xlu2 %v4493_v36, %s5307_s4  ;;  %v1479_v28 = vsel %vm206_vm5, %v1478_v27, -inf  ;;  %s5313_s30 = smov 56  }
 0xf0e   :  { %v1233_v25 = vpop.f32.mrf.mxu0 }
 0xf0f   :  { %1307 = vrot.lane.b32.xlu1 %v1233_v25, %s5304_s26 }
 0xf17   :  { %1384 = vrot.lane.b32.xlu1 %v1317_v9, %s5310_s25 }
 0xf37   :  { %1480 = vmax.xlane.f32.xlu0 %v1479_v28 }
 0xf41   :  { %1348 = vmax.xlane.f32.xlu1 %v1347_v29 }
 0xf4b   :  { %1358 = vrot.lane.b32.xlu0 %v4493_v36, %s5273_s22  ;;  %s5315_s22 = smov 24  }
 0xf5f   :  { %v1312_v35 = vpop.permute.xlu2 %1311 }
 0xf67   :  { %v1519_v13 = vpop.permute.xlu2 %1518 }
 0xf6f   :  { %v1304_v42 = vpop.permute.xlu0 %1303 }
 0xf70   :  { %v1314_v43 = vsel %vm206_vm5, %v4491_v47, %v1304_v42  ;;  %v3646_v42 = vld [vmem:[%s5233_s13 + $0x20] sm:$0xff] }
 0xf77   :  { %v1387_v45 = vpop.permute.xlu0 %1386 }
 0xf78   :  { %3629 = vmatpush.xpose.msk.msra.mxu1 %vm206_vm5, %v1387_v45 }
 0xf7c   :  { %3635 = vmatpush.xpose.msk.msrb.mxu1 %vm206_vm5, %v1519_v13 }
 0xf7f   :  { %v1517_v54 = vpop.permute.xlu0 %1516 }
 0xf81   :  { %v1308_v49 = vpop.permute.xlu1 %1307 }
 0xf82   :  { %v1315_v50 = vsel %vm485_vm13, %v1314_v43, %v1308_v49 }
 0xf83   :  { %v1316_v52 = vsel %vm487_vm14, %v1315_v50, %v1312_v35  ;;  %v4602_v50 = vld [vmem:[%s5231_s11 + $0x1] ss:$0 sm:$0xff]  ;;  %s5318_s11 = sld [smem:[#allocation7_spill]] }
 0xf84   :  { %3642 = vmatmul.msk.f32.vlgmr.msrb.gmra.mxu2 %vm75_vm0, %v1316_v52 }
 0xf89   :  { %v1385_v53 = vpop.permute.xlu1 %1384 }
 0xf8a   :  { %3630 = vmatmul.msk.f32.vlgmr.msra.gmra.mxu1 %vm206_vm5, %v1385_v53 }
 0xf92   :  { %3636 = vmatmul.msk.f32.vlgmr.msrb.gmra.mxu1 %vm206_vm5, %v1517_v54  ;;  %v4607_v54 = vld [vmem:[%s5232_s12 + $0x1] ss:$0 sm:$0xff]  ;;  %s5321_s12 = sld [smem:[#allocation10_spill]] }
 0xfaa   :  { %v1481_v34 = vpop.xlane.xlu0 %1480 }
 0xfab   :  { %v1482_v41 = vsub.f32 %v1478_v27, %v1481_v34 }
 0xfad   :  { %v1483_v44 = vmul.f32 1.442695, %v1482_v41 }
 0xfb4   :  { %v1349_v56 = vpop.xlane.xlu1 %1348 }
 0xfb5   :  { %v1350_v37 = vsub.f32 %v1346_v57, %v1349_v56 }
 0xfb7   :  { %v1351_v58 = vmul.f32 1.442695, %v1350_v37 }
 0xfb9   :  { %3897 = vpow2.f32 %v1351_v58 }
 0xfba   :  { %3899 = vpow2.f32 %v1483_v44 }
 0xfbd   :  { %v1359_v40 = vpop.permute.xlu0 %1358 }
 0xfbe   :  { %1379 = vmatpush.msra.mxu0 %v1359_v40 }
 0xfbf   :  { %v3898_v47 = vpop.eup %3897 }
 0xfc0   :  { %v1353_v60 = vsel %vm206_vm5, %v3898_v47, 0.0  ;;  %v3900_v3 = vpop.eup %3899 }
 0xfc1   :  { %1354 = vadd.xlane.f32.xlu1 %v1353_v60  ;;  %v1485_v7 = vsel %vm206_vm5, %v3900_v3, 0.0 }
0x1007   :  { %v1409_v62 = vpop.f32.mrf.mxu1  ;;  %v1625_v39 = vpop.f32.mrf.mxu2 }
0x1008   :  { %v1412_v63 = vsel %vm4297_vm12, %v1409_v62, -1e+09  ;;  %v1626_v0 = vadd.f32 %v1625_v39, %v4441_v46  ;;  %v3660_v62 = vld [vmem:[%s5235_s15 + $0x78] sm:$0xff]  ;;  %v3659_v39 = vld [vmem:[%s5235_s15 + $0x70] sm:$0xff] }
0x1009   :  { %v1413_v1 = vsel %vm206_vm5, %v1412_v63, -inf  ;;  %1758 = vmatpush.msra.mxu1 %v3660_v62  ;;  %v4702_v62 = vld [vmem:[%s5241_s8] ss:$0 sm:$0xff]  ;;  %s5316_s8 = smov 64  }
0x100a   :  { %1414 = vmax.xlane.f32.xlu1 %v1413_v1  ;;  %v1635_v2 = vsel %vm75_vm0, %v1626_v0, 0.0  ;;  %v3656_v1 = vld [vmem:[%s5235_s15 + $0x58] sm:$0xff] }
0x100b   :  { %1636 = vadd.xlane.f32.xlu2 %v1635_v2  ;;  %1759 = vmatpush.msra.mxu1 %v3659_v39  ;;  %v3655_v2 = vld [vmem:[%s5235_s15 + $0x50] sm:$0xff] }
0x100f   :  { %v1541_v6 = vpop.f32.mrf.mxu1 }
0x1010   :  { %v1544_v5 = vsel %vm4297_vm12, %v1541_v6, -1e+09  ;;  %v3653_v6 = vld [vmem:[%s5235_s15 + $0x40] sm:$0xff] }
0x1011   :  { %v1545_v59 = vsel %vm206_vm5, %v1544_v5, -inf }
0x1012   :  { %1546 = vmax.xlane.f32.xlu1 %v1545_v59 }
0x1013   :  { %1486 = vadd.xlane.f32.xlu2 %v1485_v7  ;;  %v4641_v7 = vld [vmem:[%s5234_s14 + $0x1] ss:$0 sm:$0xff] }
0x1034   :  { %v1355_v8 = vpop.xlane.xlu1 %1354 }
0x1035   :  { %3901 = vrcp.f32 %v1355_v8 }
0x103b   :  { %v3902_v46 = vpop.eup %3901 }
0x103c   :  { %v1357_v9 = vmul.f32 %v3902_v46, %v3898_v47 }
0x103e   :  { %3628 = vmatmul.msk.f32.vlgmr.msra.gmra.mxu0 %vm206_vm5, %v1357_v9 }
0x107d   :  { %v1415_v10 = vpop.xlane.xlu1 %1414 }
0x107e   :  { %v1416_v11 = vsub.f32 %v1412_v63, %v1415_v10  ;;  %v1637_v12 = vpop.xlane.xlu2 %1636  ;;  %v3658_v63 = vld [vmem:[%s5235_s15 + $0x68] sm:$0xff] }
0x107f   :  { %v1641_v14 = vmul.f32 %v1637_v12, %v4145_v15  ;;  %1760 = vmatpush.msra.mxu1 %v3658_v63 }
0x1080   :  { %v1417_v4 = vmul.f32 1.442695, %v1416_v11 }
0x1081   :  { %v1643_v16 = vsub.f32 %v1626_v0, %v1641_v14  ;;  %v3657_v0 = vld [vmem:[%s5235_s15 + $0x60] sm:$0xff] }
0x1082   :  { %3903 = vpow2.f32 %v1417_v4  ;;  %1761 = vmatpush.msra.mxu1 %v3657_v0  ;;  %v4651_v4 = vld [vmem:[%s5236_s16 + $0x1] ss:$0 sm:$0xff] }
0x1083   :  { %v1645_v17 = vmul.f32 %v1643_v16, %v1643_v16 }
0x1084   :  { %1762 = vmatpush.msra.mxu1 %v3656_v1  ;;  %v4707_v1 = vld [vmem:[%s5238_s18 + $0x1] ss:$0 sm:$0xff] }
0x1085   :  { %v1547_v18 = vpop.xlane.xlu1 %1546  ;;  %v1647_v19 = vsel %vm75_vm0, %v1645_v17, 0.0 }
0x1086   :  { %v1548_v20 = vsub.f32 %v1544_v5, %v1547_v18  ;;  %1648 = vadd.xlane.f32.xlu2 %v1647_v19  ;;  %v1487_v25 = vpop.xlane.xlu2 %1486  ;;  %1763 = vmatpush.msra.mxu1 %v3655_v2 }
0x1088   :  { %v3904_v61 = vpop.eup %3903  ;;  %v1549_v22 = vmul.f32 1.442695, %v1548_v20 }
0x1089   :  { %v1419_v23 = vsel %vm206_vm5, %v3904_v61, 0.0 }
0x108a   :  { %3905 = vpow2.f32 %v1549_v22  ;;  %1420 = vadd.xlane.f32.xlu1 %v1419_v23 }
0x108b   :  { %3907 = vrcp.f32 %v1487_v25  ;;  %v1836_v25 = vld [vmem:[%s5239_s7 + $0x8] sm:$0xff] }
0x1090   :  { %v3906_v24 = vpop.eup %3905 }
0x1091   :  { %v1551_v55 = vsel %vm206_vm5, %v3906_v24, 0.0  ;;  %v3908_v28 = vpop.eup %3907 }
0x1092   :  { %1552 = vadd.xlane.f32.xlu0 %v1551_v55  ;;  %v1489_v57 = vmul.f32 %v3908_v28, %v3900_v3  ;;  %v3654_v3 = vld [vmem:[%s5235_s15 + $0x48] sm:$0xff]  ;;  %v1837_v55 = vld [vmem:[%s5239_s7 + $0x10] sm:$0xff] }
0x1093   :  { %1764 = vmatpush.msra.mxu1 %v3654_v3 }
0x1095   :  { %1765 = vmatpush.msra.mxu1 %v3653_v6 }
0x109e   :  { %1490 = vrot.lane.b32.xlu2 %v4493_v36, %s5312_s20 }
0x10a3   :  { %1424 = vrot.lane.b32.xlu1 %v4493_v36, %s5313_s30 }
0x10a6   :  { %1556 = vrot.lane.b32.xlu2 %v4493_v36, %s5314_s29  ;;  %v3648_v36 = vld [vmem:[%s5233_s13 + $0x30] sm:$0xff] }
0x10bb   :  { %v1381_v5 = vpop.f32.mrf.mxu0 }
0x10f9   :  { %v1649_v48 = vpop.xlane.xlu2 %1648 }
0x10fa   :  { %v1653_v26 = vmul.f32 %v1649_v48, %v4145_v15  ;;  %v1835_v48 = vld [vmem:[%s5239_s7] sm:$0xff] }
0x10fc   :  { %v1655_v27 = vadd.f32 1e-06, %v1653_v26  ;;  %v1833_v26 = vld [vmem:[%s5240_s1] sm:$0xff] }
0x10fd   :  { %v1421_v13 = vpop.xlane.xlu1 %1420 }
0x10fe   :  { %3909 = vrsqrt.f32 %v1655_v27  ;;  %vm1663_vm6 = vweird.f32 %v1655_v27 }
0x10ff   :  { %3911 = vrcp.f32 %v1421_v13 }
0x1101   :  { %v1491_v29 = vpop.permute.xlu2 %1490 }
0x1102   :  { %1511 = vmatpush.msrb.mxu0 %v1491_v29 }
0x1103   :  { %3634 = vmatmul.msk.f32.vlgmr.msrb.gmra.mxu0 %vm206_vm5, %v1489_v57 }
0x1104   :  { %v3910_v31 = vpop.eup %3909  ;;  %1717 = vmatpush.msra.mxu0 %v3649_v30 }
0x1105   :  { %v1658_v32 = vmul.f32 %v3910_v31, %v1655_v27  ;;  %vm1664_vm4 = vweird.f32 %v3910_v31  ;;  %v1553_v56 = vpop.xlane.xlu0 %1552  ;;  %v3912_v34 = vpop.eup %3911 }
0x1106   :  { %1718 = vmatpush.msra.mxu0 %v3648_v36  ;;  %vm1665_vm8 = vmor %vm1663_vm6, %vm1664_vm4  ;;  %3913 = vrcp.f32 %v1553_v56  ;;  %v1423_v40 = vmul.f32 %v3912_v34, %v3904_v61 }
0x1107   :  { %v1659_v35 = vmul.f32 %v3910_v31, %v1658_v32 }
0x1108   :  { %1719 = vmatpush.msra.mxu0 %v3647_v33  ;;  %v3671_v33 = vld [vmem:[%s5228_s9 + $0x58] sm:$0xff] }
0x1109   :  { %v1660_v45 = vmul.f32 0.5, %v1659_v35  ;;  %v1557_v60 = vpop.permute.xlu2 %1556  ;;  %1897 = vmatpush.msra.mxu2 %v3671_v33  ;;  %v3670_v35 = vld [vmem:[%s5228_s9 + $0x50] sm:$0xff] }
0x110a   :  { %1720 = vmatpush.msra.mxu0 %v3646_v42  ;;  %v3669_v42 = vld [vmem:[%s5228_s9 + $0x48] sm:$0xff] }
0x110b   :  { %v1661_v43 = vsub.f32 1.5, %v1660_v45  ;;  %1898 = vmatpush.msra.mxu2 %v3670_v35 }
0x110c   :  { %v3914_v41 = vpop.eup %3913 }
0x110d   :  { %v1662_v49 = vmul.f32 %v3910_v31, %v1661_v43  ;;  %v1555_v44 = vmul.f32 %v3914_v41, %v3906_v24  ;;  %v1838_v24 = vld [vmem:[%s5239_s7 + $0x18] sm:$0xff]  ;;  %1899 = vmatpush.msra.mxu2 %v3669_v42 }
0x110f   :  { %v1666_v52 = vsel %vm1665_vm8, %v3910_v31, %v1662_v49 }
0x1110   :  { %v1677_v53 = vmul.f32 %v1666_v52, %v1643_v16 }
0x1112   :  { %v1682_v37 = vmul.f32 %v4602_v50, %v1677_v53 }
0x1114   :  { %v1687_v58 = vadd.f32 %v4607_v54, %v1682_v37 }
0x1115   :  { %v1425_v47 = vpop.permute.xlu1 %1424 }
0x1116   :  { %1445 = vmatpush.msrb.mxu3 %v1425_v47  ;;  %3651 = vmatmul.msk.f32.vlgmr.msra.gmra.mxu0 %vm75_vm0, %v1687_v58 }
0x1117   :  { %3631 = vmatmul.msk.f32.vlgmr.msrb.gmra.mxu3 %vm206_vm5, %v1423_v40 }
0x1118   :  { %1577 = vmatpush.msra.mxu3 %v1557_v60 }
0x111a   :  { %1861 = vmatpush.msrb.mxu3 %v1838_v24 }
0x111c   :  { %1862 = vmatpush.msrb.mxu3 %v1837_v55 }
0x111e   :  { %1863 = vmatpush.msrb.mxu3 %v1836_v25 }
0x111f   :  { %3637 = vmatmul.msk.f32.vlgmr.msra.gmra.mxu3 %vm206_vm5, %v1555_v44  ;;  %v4697_v44 = vld [vmem:[%s5237_s17 + $0x1] ss:$0 sm:$0xff] }
0x1120   :  { %1864 = vmatpush.msrb.mxu3 %v1835_v48 }
0x1127   :  { %3666 = vmatmul.msk.f32.vlgmr.msrb.gmra.mxu3 %vm75_vm0, %v1833_v26 }
0x1180   :  { %v1513_v59 = vpop.f32.mrf.mxu0 }
0x1193   :  { %v1722_v8 = vpop.f32.mrf.mxu0 }
0x1194   :  { %v1723_v46 = vadd.f32 %v4641_v7, %v1722_v8 }
0x1196   :  { %v1728_v9 = vmax.f32 %v1723_v46, 0.0 }
0x1198   :  { %3662 = vmatmul.msk.f32.vlgmr.msra.gmra.mxu1 %vm915_vm3, %v1728_v9 }
0x119a   :  { %v1447_v10 = vpop.f32.mrf.mxu3 }
0x119b   :  { %1583 = vrot.lane.b32.xlu2 %v1447_v10, %s5311_s5 }
0x11a2   :  { %v1579_v11 = vpop.f32.mrf.mxu3 }
0x11a3   :  { %1587 = vrot.lane.b32.xlu2 %v1513_v59, %s5304_s26  ;;  %1591 = vrot.lane.b32.xlu1 %v1579_v11, %s5315_s22 }
0x11aa   :  { %v1866_v63 = vpop.f32.mrf.mxu3 }
0x11ab   :  { %v1867_v3 = vadd.f32 %v4702_v62, %v1866_v63 }
0x11f5   :  { %v1584_v12 = vpop.permute.xlu2 %1583 }
0x11f6   :  { %v1594_v16 = vsel %vm206_vm5, %v1381_v5, %v1584_v12 }
0x11fd   :  { %v1588_v14 = vpop.permute.xlu2 %1587 }
0x11fe   :  { %v1595_v17 = vsel %vm485_vm13, %v1594_v16, %v1588_v14 }
0x1215   :  { %v1767_v18 = vpop.f32.mrf.mxu1  ;;  %v1592_v19 = vpop.permute.xlu1 %1591 }
0x1216   :  { %v1768_v20 = vadd.f32 %v4651_v4, %v1767_v18  ;;  %v1596_v61 = vsel %vm487_vm14, %v1595_v17, %v1592_v19 }
0x1217   :  { %3643 = vmatmul.msk.f32.gmra.mxu2 %vm75_vm0, %v1596_v61 }
0x1218   :  { %v1773_v22 = vadd.f32 %v1768_v20, %v1687_v58 }
0x121a   :  { %v1779_v23 = vsel %vm75_vm0, %v1773_v22, 0.0 }
0x121b   :  { %1780 = vadd.xlane.f32.xlu2 %v1779_v23 }
0x128e   :  { %v1781_v27 = vpop.xlane.xlu2 %1780 }
0x128f   :  { %v1785_v28 = vmul.f32 %v1781_v27, %v4145_v15 }
0x1291   :  { %v1787_v57 = vsub.f32 %v1773_v22, %v1785_v28 }
0x1293   :  { %v1789_v29 = vmul.f32 %v1787_v57, %v1787_v57 }
0x1295   :  { %v1791_v30 = vsel %vm75_vm0, %v1789_v29, 0.0 }
0x1296   :  { %1792 = vadd.xlane.f32.xlu1 %v1791_v30 }
0x129a   :  { %v1628_v36 = vpop.f32.mrf.mxu2 }
0x129b   :  { %v1629_v31 = vadd.f32 %v1628_v36, %v4483_v38  ;;  %v3668_v38 = vld [vmem:[%s5228_s9 + $0x40] sm:$0xff] }
0x129c   :  { %1900 = vmatpush.msra.mxu2 %v3668_v38 }
0x129d   :  { %v1638_v32 = vsel %vm75_vm0, %v1629_v31, 0.0 }
0x129e   :  { %1639 = vadd.xlane.f32.xlu0 %v1638_v32 }
0x1309   :  { %v1793_v45 = vpop.xlane.xlu1 %1792 }
0x130a   :  { %v1797_v13 = vmul.f32 %v1793_v45, %v4145_v15 }
0x130c   :  { %v1799_v43 = vadd.f32 1e-06, %v1797_v13 }
0x130e   :  { %3915 = vrsqrt.f32 %v1799_v43  ;;  %vm1807_vm10 = vweird.f32 %v1799_v43 }
0x1311   :  { %v1640_v49 = vpop.xlane.xlu0 %1639 }
0x1312   :  { %v1642_v52 = vmul.f32 %v1640_v49, %v4145_v15 }
0x1314   :  { %v3916_v53 = vpop.eup %3915  ;;  %v1644_v56 = vsub.f32 %v1629_v31, %v1642_v52 }
0x1315   :  { %v1802_v34 = vmul.f32 %v3916_v53, %v1799_v43  ;;  %vm1808_vm9 = vweird.f32 %v3916_v53 }
0x1316   :  { %v1646_v37 = vmul.f32 %v1644_v56, %v1644_v56  ;;  %vm1809_vm11 = vmor %vm1807_vm10, %vm1808_vm9 }
0x1317   :  { %v1803_v58 = vmul.f32 %v3916_v53, %v1802_v34 }
0x1318   :  { %v1650_v40 = vsel %vm75_vm0, %v1646_v37, 0.0 }
0x1319   :  { %v1804_v47 = vmul.f32 0.5, %v1803_v58  ;;  %1651 = vadd.xlane.f32.xlu0 %v1650_v40 }
0x131b   :  { %v1805_v60 = vsub.f32 1.5, %v1804_v47 }
0x131d   :  { %v1806_v41 = vmul.f32 %v3916_v53, %v1805_v60 }
0x131f   :  { %v1810_v39 = vsel %vm1809_vm11, %v3916_v53, %v1806_v41 }
0x1320   :  { %v1821_v0 = vmul.f32 %v1810_v39, %v1787_v57 }
0x1322   :  { %v1826_v2 = vmul.f32 %v4697_v44, %v1821_v0 }
0x1324   :  { %v1831_v6 = vadd.f32 %v4707_v1, %v1826_v2 }
0x1326   :  { %v4712_v5 = vadd.f32 %v1867_v3, %v1831_v6 }
0x1328   :  { %3672 = vmatmul.msk.f32.vlgmr.msra.gmra.mxu2 %vm75_vm0, %v4712_v5 }
0x138c   :  { %v1652_v59 = vpop.xlane.xlu0 %1651 }
0x138d   :  { %v1654_v8 = vmul.f32 %v1652_v59, %v4145_v15 }
0x138f   :  { %v1656_v46 = vadd.f32 1e-06, %v1654_v8 }
0x1391   :  { %3917 = vrsqrt.f32 %v1656_v46  ;;  %vm1673_vm1 = vweird.f32 %v1656_v46 }
0x1397   :  { %v3918_v9 = vpop.eup %3917 }
0x1398   :  { %v1668_v10 = vmul.f32 %v3918_v9, %v1656_v46  ;;  %vm1674_vm15 = vweird.f32 %v3918_v9 }
0x1399   :  { %vm1675_vm2 = vmor %vm1673_vm1, %vm1674_vm15 }
0x139a   :  { %v1669_v11 = vmul.f32 %v3918_v9, %v1668_v10 }
0x139c   :  { %v1670_v12 = vmul.f32 0.5, %v1669_v11 }
0x139e   :  { %v1671_v14 = vsub.f32 1.5, %v1670_v12 }
0x13a0   :  { %v1672_v16 = vmul.f32 %v3918_v9, %v1671_v14 }
0x13a2   :  { %v1676_v17 = vsel %vm1675_vm2, %v3918_v9, %v1672_v16 }
0x13a3   :  { %v1678_v18 = vmul.f32 %v1676_v17, %v1644_v56 }
0x13a5   :  { %v1683_v19 = vmul.f32 %v4602_v50, %v1678_v18 }
0x13a7   :  { %v1688_v20 = vadd.f32 %v4607_v54, %v1683_v19 }
0x13a9   :  { %3652 = vmatmul.msk.f32.gmra.mxu0 %vm75_vm0, %v1688_v20 }
0x13ab   :  { %v4720_v61 = vpop.f32.mrf.mxu2 }
0x13ac   :  { %1910 = vrot.lane.b32.xlu0 %v4720_v61, %s5305_s2  ;;  %v1908_v23 = vmul.f32 0.35355338, %v4720_v61 }
0x141e   :  { %v1911_v22 = vpop.permute.xlu0 %1910 }
0x141f   :  { %3674 = vmatpush.xpose.msk.msrb.mxu0 %vm206_vm5, %v1911_v22 }
0x1422   :  { %3675 = vmatmul.msk.f32.vlgmr.msrb.gmra.mxu0 %vm206_vm5, %v1908_v23 }
0x1426   :  { %v1725_v24 = vpop.f32.mrf.mxu0 }
0x1427   :  { %v1726_v55 = vadd.f32 %v4641_v7, %v1725_v24  ;;  %v1834_v7 = vld [vmem:[%s5240_s1 + $0x8] sm:$0xff]  ;;  %s5322_s1 = sld [smem:[#allocation8_spill]] }
0x1428   :  { %3667 = vmatmul.msk.f32.gmra.mxu3 %vm75_vm0, %v1834_v7 }
0x1429   :  { %v1729_v50 = vmax.f32 %v1726_v55, 0.0 }
0x142b   :  { %3663 = vmatmul.msk.f32.gmra.mxu1 %vm915_vm3, %v1729_v50 }
0x149f   :  { %v1934_v54 = vpop.f32.mrf.mxu0 }
0x14a0   :  { %v1937_v25 = vsel %vm4201_vm7, %v1934_v54, -1e+09 }
0x14a1   :  { %v1938_v48 = vsel %vm206_vm5, %v1937_v25, -inf }
0x14a2   :  { %1939 = vmax.xlane.f32.xlu2 %v1938_v48 }
0x14a8   :  { %v1770_v26 = vpop.f32.mrf.mxu1 }
0x14a9   :  { %v1771_v27 = vadd.f32 %v4651_v4, %v1770_v26 }
0x14ab   :  { %v1774_v28 = vadd.f32 %v1771_v27, %v1688_v20  ;;  %v1869_v59 = vpop.f32.mrf.mxu3 }
0x14ac   :  { %v1870_v9 = vadd.f32 %v4702_v62, %v1869_v59 }
0x14ad   :  { %v1782_v57 = vsel %vm75_vm0, %v1774_v28, 0.0 }
0x14ae   :  { %1783 = vadd.xlane.f32.xlu1 %v1782_v57 }
0x14ba   :  { %1949 = vrot.lane.b32.xlu2 %v4720_v61, %s5316_s8 }
0x14c2   :  { %2041 = vrot.lane.b32.xlu2 %v1908_v23, %s5309_s24 }
0x14c7   :  { %2043 = vrot.lane.b32.xlu1 %v4720_v61, %s5306_s0 }
0x14ca   :  { %1975 = vrot.lane.b32.xlu2 %v1908_v23, %s5310_s25 }
0x14cf   :  { %1977 = vrot.lane.b32.xlu1 %v4720_v61, %s5308_s23 }
0x14d7   :  { %2107 = vrot.lane.b32.xlu1 %v1908_v23, %s5317_s27 }
0x1515   :  { %v1940_v4 = vpop.xlane.xlu2 %1939 }
0x1516   :  { %v1941_v29 = vsub.f32 %v1937_v25, %v1940_v4 }
0x1518   :  { %v1942_v30 = vmul.f32 1.442695, %v1941_v29 }
0x151a   :  { %3919 = vpow2.f32 %v1942_v30 }
0x151d   :  { %v1950_v36 = vpop.permute.xlu2 %1949 }
0x151e   :  { %1970 = vmatpush.msra.mxu3 %v1950_v36 }
0x1520   :  { %v3920_v31 = vpop.eup %3919 }
0x1521   :  { %v1784_v32 = vpop.xlane.xlu1 %1783  ;;  %v1944_v33 = vsel %vm206_vm5, %v3920_v31, 0.0 }
0x1522   :  { %v1786_v35 = vmul.f32 %v1784_v32, %v4145_v15  ;;  %1945 = vadd.xlane.f32.xlu0 %v1944_v33 }
0x1524   :  { %v1788_v42 = vsub.f32 %v1774_v28, %v1786_v35 }
0x1525   :  { %v2042_v43 = vpop.permute.xlu2 %2041 }
0x1526   :  { %v1790_v38 = vmul.f32 %v1788_v42, %v1788_v42 }
0x1528   :  { %v1794_v45 = vsel %vm75_vm0, %v1790_v38, 0.0 }
0x1529   :  { %1795 = vadd.xlane.f32.xlu2 %v1794_v45 }
0x152d   :  { %v1976_v52 = vpop.permute.xlu2 %1975 }
0x1536   :  { %2109 = vrot.lane.b32.xlu0 %v4720_v61, %s5307_s4 }
0x1539   :  { %v2044_v13 = vpop.permute.xlu1 %2043 }
0x153a   :  { %3680 = vmatpush.xpose.msk.msrb.mxu3 %vm206_vm5, %v2044_v13 }
0x1541   :  { %v1978_v49 = vpop.permute.xlu1 %1977 }
0x1542   :  { %3677 = vmatpush.xpose.msk.msra.mxu0 %vm206_vm5, %v1978_v49 }
0x1545   :  { %3678 = vmatmul.msk.f32.vlgmr.msra.gmra.mxu0 %vm206_vm5, %v1976_v52 }
0x1549   :  { %v2108_v63 = vpop.permute.xlu1 %2107 }
0x1595   :  { %v1946_v53 = vpop.xlane.xlu0 %1945 }
0x1596   :  { %3921 = vrcp.f32 %v1946_v53 }
0x159c   :  { %v3922_v56 = vpop.eup %3921  ;;  %v1796_v34 = vpop.xlane.xlu2 %1795 }
0x159d   :  { %v1948_v37 = vmul.f32 %v3922_v56, %v3920_v31  ;;  %v1798_v58 = vmul.f32 %v1796_v34, %v4145_v15 }
0x159f   :  { %v1800_v40 = vadd.f32 1e-06, %v1798_v58  ;;  %3676 = vmatmul.msk.f32.vlgmr.msra.gmra.mxu3 %vm206_vm5, %v1948_v37 }
0x15a1   :  { %3923 = vrsqrt.f32 %v1800_v40  ;;  %vm1817_vm6 = vweird.f32 %v1800_v40 }
0x15a7   :  { %v3924_v47 = vpop.eup %3923  ;;  %3681 = vmatmul.msk.f32.vlgmr.msrb.gmra.mxu3 %vm206_vm5, %v2042_v43 }
0x15a8   :  { %v1812_v60 = vmul.f32 %v3924_v47, %v1800_v40  ;;  %v2110_v41 = vpop.permute.xlu0 %2109  ;;  %vm1818_vm4 = vweird.f32 %v3924_v47 }
0x15a9   :  { %3683 = vmatpush.xpose.msk.msrb.mxu0 %vm206_vm5, %v2110_v41  ;;  %vm1819_vm8 = vmor %vm1817_vm6, %vm1818_vm4 }
0x15aa   :  { %v1813_v39 = vmul.f32 %v3924_v47, %v1812_v60 }
0x15ac   :  { %v1814_v0 = vmul.f32 0.5, %v1813_v39  ;;  %3684 = vmatmul.msk.f32.vlgmr.msrb.gmra.mxu0 %vm206_vm5, %v2108_v63 }
0x15ae   :  { %v1815_v2 = vsub.f32 1.5, %v1814_v0 }
0x15b0   :  { %v1816_v3 = vmul.f32 %v3924_v47, %v1815_v2 }
0x15b2   :  { %v1820_v6 = vsel %vm1819_vm8, %v3924_v47, %v1816_v3 }
0x15b3   :  { %v1822_v8 = vmul.f32 %v1820_v6, %v1788_v42 }
0x15b5   :  { %v1827_v46 = vmul.f32 %v4697_v44, %v1822_v8 }
0x15b7   :  { %v1832_v10 = vadd.f32 %v4707_v1, %v1827_v46 }
0x15b9   :  { %v4763_v11 = vadd.f32 %v1870_v9, %v1832_v10 }
0x15bb   :  { %3673 = vmatmul.msk.f32.gmra.mxu2 %vm75_vm0, %v4763_v11 }
0x15c2   :  { %v2000_v12 = vpop.f32.mrf.mxu0 }
0x15c3   :  { %v2003_v14 = vsel %vm4201_vm7, %v2000_v12, -1e+09 }
0x15c4   :  { %v2004_v16 = vsel %vm206_vm5, %v2003_v14, -inf }
0x15c5   :  { %2005 = vmax.xlane.f32.xlu1 %v2004_v16  ;;  %v3701_v16 = vld [vmem:[%s5318_s11 + $0x58] sm:$0xff] }
0x1622   :  { %v4770_v17 = vpop.f32.mrf.mxu3 }
0x1629   :  { %v2132_v18 = vpop.f32.mrf.mxu0 }
0x162a   :  { %v2135_v44 = vsel %vm4201_vm7, %v2132_v18, -1e+09  ;;  %v2066_v62 = vpop.f32.mrf.mxu3  ;;  %v3700_v18 = vld [vmem:[%s5318_s11 + $0x50] sm:$0xff] }
0x162b   :  { %v2069_v1 = vsel %vm4201_vm7, %v2066_v62, -1e+09  ;;  %v2136_v19 = vsel %vm206_vm5, %v2135_v44, -inf  ;;  %v3698_v62 = vld [vmem:[%s5318_s11 + $0x40] sm:$0xff] }
0x162c   :  { %2137 = vmax.xlane.f32.xlu2 %v2136_v19  ;;  %v2070_v20 = vsel %vm206_vm5, %v2069_v1, -inf }
0x162d   :  { %2071 = vmax.xlane.f32.xlu0 %v2070_v20 }
0x1638   :  { %v2006_v22 = vpop.xlane.xlu1 %2005 }
0x1639   :  { %v2007_v23 = vsub.f32 %v2003_v14, %v2006_v22 }
0x163b   :  { %v2008_v24 = vmul.f32 1.442695, %v2007_v23 }
0x163d   :  { %3925 = vpow2.f32 %v2008_v24 }
0x163e   :  { %v4785_v54 = vpop.f32.mrf.mxu2 }
0x163f   :  { %v2188_v25 = vmul.f32 0.35355338, %v4785_v54 }
0x1641   :  { %2081 = vrot.lane.b32.xlu0 %v4720_v61, %s5312_s20 }
0x1643   :  { %v3926_v55 = vpop.eup %3925 }
0x1644   :  { %2015 = vrot.lane.b32.xlu2 %v4720_v61, %s5313_s30  ;;  %v2010_v50 = vsel %vm206_vm5, %v3926_v55, 0.0 }
0x1645   :  { %2011 = vadd.xlane.f32.xlu1 %v2010_v50 }
0x1649   :  { %2147 = vrot.lane.b32.xlu0 %v4720_v61, %s5314_s29 }
0x164c   :  { %2323 = vrot.lane.b32.xlu2 %v4785_v54, %s5306_s0 }
0x1651   :  { %2321 = vrot.lane.b32.xlu0 %v2188_v25, %s5309_s24 }
0x1659   :  { %2389 = vrot.lane.b32.xlu0 %v4785_v54, %s5307_s4 }
0x169f   :  { %v2138_v48 = vpop.xlane.xlu2 %2137 }
0x16a0   :  { %v2139_v26 = vsub.f32 %v2135_v44, %v2138_v48  ;;  %v2072_v27 = vpop.xlane.xlu0 %2071  ;;  %v3699_v44 = vld [vmem:[%s5318_s11 + $0x48] sm:$0xff] }
0x16a1   :  { %v2073_v28 = vsub.f32 %v2069_v1, %v2072_v27 }
0x16a2   :  { %v2140_v57 = vmul.f32 1.442695, %v2139_v26 }
0x16a3   :  { %v2074_v7 = vmul.f32 1.442695, %v2073_v28 }
0x16a4   :  { %3927 = vpow2.f32 %v2140_v57 }
0x16a5   :  { %3929 = vpow2.f32 %v2074_v7 }
0x16a7   :  { %v2016_v61 = vpop.permute.xlu2 %2015 }
0x16a8   :  { %2036 = vmatpush.msrb.mxu1 %v2016_v61 }
0x16aa   :  { %v3928_v4 = vpop.eup %3927 }
0x16ab   :  { %v3930_v29 = vpop.eup %3929  ;;  %v2142_v30 = vsel %vm206_vm5, %v3928_v4, 0.0 }
0x16ac   :  { %2143 = vadd.xlane.f32.xlu1 %v2142_v30  ;;  %v2076_v36 = vsel %vm206_vm5, %v3930_v29, 0.0 }
0x16ad   :  { %2077 = vadd.xlane.f32.xlu2 %v2076_v36 }
0x16af   :  { %v2324_v38 = vpop.permute.xlu2 %2323 }
0x16b3   :  { %v2082_v31 = vpop.permute.xlu0 %2081 }
0x16b4   :  { %2102 = vmatpush.msrb.mxu2 %v2082_v31 }
0x16b8   :  { %v2012_v32 = vpop.xlane.xlu1 %2011 }
0x16b9   :  { %3931 = vrcp.f32 %v2012_v32 }
0x16bb   :  { %v2148_v33 = vpop.permute.xlu0 %2147 }
0x16bc   :  { %2168 = vmatpush.msra.mxu1 %v2148_v33 }
0x16bf   :  { %v3932_v35 = vpop.eup %3931 }
0x16c0   :  { %v2014_v42 = vmul.f32 %v3932_v35, %v3926_v55 }
0x16c2   :  { %3679 = vmatmul.msk.f32.vlgmr.msrb.gmra.mxu1 %vm206_vm5, %v2014_v42 }
0x16c3   :  { %v2322_v56 = vpop.permute.xlu0 %2321 }
0x16c5   :  { %2255 = vrot.lane.b32.xlu2 %v2188_v25, %s5310_s25  ;;  %2190 = vrot.lane.b32.xlu1 %v4785_v54, %s5305_s2 }
0x16cb   :  { %v2390_v40 = vpop.permute.xlu0 %2389 }
0x16cd   :  { %2257 = vrot.lane.b32.xlu1 %v4785_v54, %s5308_s23 }
0x16d5   :  { %2387 = vrot.lane.b32.xlu1 %v2188_v25, %s5317_s27 }
0x171f   :  { %v2144_v45 = vpop.xlane.xlu1 %2143 }
0x1720   :  { %3933 = vrcp.f32 %v2144_v45  ;;  %v2078_v13 = vpop.xlane.xlu2 %2077 }
0x1721   :  { %3935 = vrcp.f32 %v2078_v13 }
0x1726   :  { %v3934_v43 = vpop.eup %3933 }
0x1727   :  { %v3936_v49 = vpop.eup %3935  ;;  %v2146_v52 = vmul.f32 %v3934_v43, %v3928_v4 }
0x1728   :  { %v2080_v53 = vmul.f32 %v3936_v49, %v3930_v29  ;;  %v2256_v47 = vpop.permute.xlu2 %2255 }
0x1729   :  { %3685 = vmatmul.msk.f32.vlgmr.msra.gmra.mxu1 %vm206_vm5, %v2146_v52 }
0x172a   :  { %3682 = vmatmul.msk.f32.vlgmr.msrb.gmra.mxu2 %vm206_vm5, %v2080_v53 }
0x1737   :  { %v2191_v34 = vpop.permute.xlu1 %2190 }
0x1738   :  { %3686 = vmatpush.xpose.msk.msra.mxu3 %vm206_vm5, %v2191_v34 }
0x173b   :  { %3687 = vmatmul.msk.f32.vlgmr.msra.gmra.mxu3 %vm206_vm5, %v2188_v25 }
0x173c   :  { %3692 = vmatpush.xpose.msk.msrb.mxu3 %vm206_vm5, %v2324_v38 }
0x173f   :  { %v2258_v37 = vpop.permute.xlu1 %2257  ;;  %v2038_v58 = vpop.f32.mrf.mxu1 }
0x1740   :  { %3689 = vmatpush.xpose.msk.msra.mxu0 %vm206_vm5, %v2258_v37  ;;  %2174 = vrot.lane.b32.xlu2 %v2038_v58, %s5311_s5 }
0x1741   :  { %2491 = vmatpush.msra.mxu3 %v3701_v16  ;;  %v3707_v16 = vld [vmem:[%s5233_s13 + $0x48] sm:$0xff] }
0x1743   :  { %3690 = vmatmul.msk.f32.vlgmr.msra.gmra.mxu0 %vm206_vm5, %v2256_v47  ;;  %3693 = vmatmul.msk.f32.vlgmr.msrb.gmra.mxu3 %vm206_vm5, %v2322_v56 }
0x1744   :  { %3695 = vmatpush.xpose.msk.msrb.mxu0 %vm206_vm5, %v2390_v40  ;;  %2492 = vmatpush.msra.mxu3 %v3700_v18  ;;  %v3706_v18 = vld [vmem:[%s5233_s13 + $0x40] sm:$0xff] }
0x1746   :  { %2493 = vmatpush.msra.mxu3 %v3699_v44 }
0x1747   :  { %v2388_v60 = vpop.permute.xlu1 %2387 }
0x1748   :  { %2494 = vmatpush.msra.mxu3 %v3698_v62 }
0x174b   :  { %3696 = vmatmul.msk.f32.vlgmr.msrb.gmra.mxu0 %vm206_vm5, %v2388_v60 }
0x179a   :  { %v2175_v1 = vpop.permute.xlu2 %2174 }
0x179b   :  { %v2185_v19 = vsel %vm206_vm5, %v4770_v17, %v2175_v1 }
0x17a6   :  { %v2170_v41 = vpop.f32.mrf.mxu1 }
0x17a7   :  { %2182 = vrot.lane.b32.xlu1 %v2170_v41, %s5315_s22 }
0x17ad   :  { %v2104_v39 = vpop.f32.mrf.mxu2 }
0x17ae   :  { %2178 = vrot.lane.b32.xlu0 %v2104_v39, %s5304_s26 }
0x17be   :  { %v2214_v63 = vpop.f32.mrf.mxu3 }
0x17bf   :  { %v2217_v0 = vsel %vm4297_vm12, %v2214_v63, -1e+09 }
0x17c0   :  { %v2280_v2 = vpop.f32.mrf.mxu0  ;;  %v2218_v3 = vsel %vm206_vm5, %v2217_v0, -inf }
0x17c1   :  { %2219 = vmax.xlane.f32.xlu2 %v2218_v3  ;;  %v2283_v12 = vsel %vm4297_vm12, %v2280_v2, -1e+09 }
0x17c2   :  { %v2284_v14 = vsel %vm206_vm5, %v2283_v12, -inf }
0x17c6   :  { %v2346_v8 = vpop.f32.mrf.mxu3 }
0x17c7   :  { %v2349_v9 = vsel %vm4297_vm12, %v2346_v8, -1e+09 }
0x17c8   :  { %v2412_v6 = vpop.f32.mrf.mxu0  ;;  %v2350_v10 = vsel %vm206_vm5, %v2349_v9, -inf }
0x17c9   :  { %v2415_v59 = vsel %vm4297_vm12, %v2412_v6, -1e+09 }
0x17ca   :  { %v2416_v46 = vsel %vm206_vm5, %v2415_v59, -inf }
0x17cb   :  { %2417 = vmax.xlane.f32.xlu2 %v2416_v46 }
0x17d1   :  { %2351 = vmax.xlane.f32.xlu1 %v2350_v10 }
0x17d8   :  { %2285 = vmax.xlane.f32.xlu0 %v2284_v14  ;;  %v3708_v14 = vld [vmem:[%s5233_s13 + $0x50] sm:$0xff] }
0x1819   :  { %v2183_v22 = vpop.permute.xlu1 %2182 }
0x1820   :  { %v2179_v20 = vpop.permute.xlu0 %2178 }
0x1821   :  { %v2186_v23 = vsel %vm485_vm13, %v2185_v19, %v2179_v20 }
0x1822   :  { %v2187_v24 = vsel %vm487_vm14, %v2186_v23, %v2183_v22 }
0x1823   :  { %3702 = vmatmul.msk.f32.vlgmr.msra.gmra.mxu3 %vm75_vm0, %v2187_v24 }
0x1834   :  { %v2220_v55 = vpop.xlane.xlu2 %2219 }
0x1835   :  { %v2221_v50 = vsub.f32 %v2217_v0, %v2220_v55 }
0x1837   :  { %v2222_v25 = vmul.f32 1.442695, %v2221_v50  ;;  %v4883_v50 = vld [vmem:[%s5319_s6 + $0x2] ss:$0 sm:$0xff] }
0x1839   :  { %3937 = vpow2.f32 %v2222_v25 }
0x183e   :  { %v2418_v17 = vpop.xlane.xlu2 %2417 }
0x183f   :  { %v3938_v48 = vpop.eup %3937  ;;  %v2419_v4 = vsub.f32 %v2415_v59, %v2418_v17  ;;  %v3719_v17 = vld [vmem:[%s5235_s15 + $0xb0] sm:$0xff] }
0x1840   :  { %v2224_v26 = vsel %vm206_vm5, %v3938_v48, 0.0 }
0x1841   :  { %2225 = vadd.xlane.f32.xlu0 %v2224_v26  ;;  %v2420_v31 = vmul.f32 1.442695, %v2419_v4  ;;  %v4888_v26 = vld [vmem:[%s5320_s21 + $0x2] ss:$0 sm:$0xff]  ;;  %v3716_v4 = vld [vmem:[%s5235_s15 + $0x98] sm:$0xff] }
0x1844   :  { %v2352_v27 = vpop.xlane.xlu1 %2351 }
0x1845   :  { %v2353_v28 = vsub.f32 %v2349_v9, %v2352_v27 }
0x1847   :  { %v2354_v57 = vmul.f32 1.442695, %v2353_v28 }
0x1849   :  { %3939 = vpow2.f32 %v2354_v57  ;;  %v3720_v57 = vld [vmem:[%s5235_s15 + $0xb8] sm:$0xff] }
0x184a   :  { %2629 = vmatpush.msra.mxu0 %v3720_v57 }
0x184b   :  { %v2286_v7 = vpop.xlane.xlu0 %2285 }
0x184c   :  { %v2287_v61 = vsub.f32 %v2283_v12, %v2286_v7  ;;  %v3709_v12 = vld [vmem:[%s5233_s13 + $0x58] sm:$0xff]  ;;  %v3718_v7 = vld [vmem:[%s5235_s15 + $0xa8] sm:$0xff]  ;;  %2630 = vmatpush.msra.mxu0 %v3719_v17  ;;  %v4961_v17 = vld [vmem:[%s5237_s17 + $0x2] ss:$0 sm:$0xff] }
0x184e   :  { %v2288_v29 = vmul.f32 1.442695, %v2287_v61  ;;  %v3717_v61 = vld [vmem:[%s5235_s15 + $0xa0] sm:$0xff]  ;;  %2631 = vmatpush.msra.mxu0 %v3718_v7 }
0x184f   :  { %v3940_v30 = vpop.eup %3939 }
0x1850   :  { %3941 = vpow2.f32 %v2288_v29  ;;  %v2356_v36 = vsel %vm206_vm5, %v3940_v30, 0.0  ;;  %2632 = vmatpush.msra.mxu0 %v3717_v61 }
0x1851   :  { %2357 = vadd.xlane.f32.xlu2 %v2356_v36  ;;  %3943 = vpow2.f32 %v2420_v31 }
0x1852   :  { %2633 = vmatpush.msra.mxu0 %v3716_v4  ;;  %v3828_v4 = vld [vmem:[%s5238_s18 + $0x2] ss:$0 sm:$0xff] }
0x1855   :  { %2229 = vrot.lane.b32.xlu0 %v4785_v54, %s5316_s8 }
0x1856   :  { %v3942_v32 = vpop.eup %3941 }
0x1857   :  { %v2290_v33 = vsel %vm206_vm5, %v3942_v32, 0.0  ;;  %v3944_v35 = vpop.eup %3943 }
0x1858   :  { %2291 = vadd.xlane.f32.xlu1 %v2290_v33  ;;  %v2422_v42 = vsel %vm206_vm5, %v3944_v35, 0.0 }
0x185d   :  { %2427 = vrot.lane.b32.xlu0 %v4785_v54, %s5314_s29 }
0x1860   :  { %2423 = vadd.xlane.f32.xlu1 %v2422_v42  ;;  %v3714_v42 = vld [vmem:[%s5235_s15 + $0x88] sm:$0xff] }
0x1869   :  { %2295 = vrot.lane.b32.xlu2 %v4785_v54, %s5313_s30 }
0x1879   :  { %2361 = vrot.lane.b32.xlu1 %v4785_v54, %s5312_s20 }
0x18a6   :  { %v2496_v38 = vpop.f32.mrf.mxu3 }
0x18a7   :  { %v2497_v45 = vadd.f32 %v2496_v38, %v4712_v5  ;;  %v3713_v38 = vld [vmem:[%s5235_s15 + $0x80] sm:$0xff] }
0x18a9   :  { %v2506_v13 = vsel %vm75_vm0, %v2497_v45, 0.0 }
0x18aa   :  { %2507 = vadd.xlane.f32.xlu2 %v2506_v13 }
0x18b4   :  { %v2226_v43 = vpop.xlane.xlu0 %2225 }
0x18b5   :  { %3945 = vrcp.f32 %v2226_v43 }
0x18bb   :  { %v3946_v49 = vpop.eup %3945 }
0x18bc   :  { %v2228_v53 = vmul.f32 %v3946_v49, %v3938_v48 }
0x18c4   :  { %v2358_v52 = vpop.xlane.xlu2 %2357 }
0x18c7   :  { %v2230_v56 = vpop.permute.xlu0 %2229 }
0x18c8   :  { %2250 = vmatpush.msra.mxu2 %v2230_v56 }
0x18c9   :  { %3688 = vmatmul.msk.f32.vlgmr.msra.gmra.mxu2 %vm206_vm5, %v2228_v53 }
0x18cb   :  { %v2292_v34 = vpop.xlane.xlu1 %2291 }
0x18cc   :  { %3947 = vrcp.f32 %v2292_v34  ;;  %v2296_v37 = vpop.permute.xlu2 %2295  ;;  %v4933_v34 = vld [vmem:[%s5321_s12 + $0x2] ss:$0 sm:$0xff] }
0x18cd   :  { %2316 = vmatpush.msrb.mxu1 %v2296_v37 }
0x18cf   :  { %v2428_v54 = vpop.permute.xlu0 %2427 }
0x18d0   :  { %2448 = vmatpush.msra.mxu1 %v2428_v54 }
0x18d2   :  { %v3948_v58 = vpop.eup %3947 }
0x18d3   :  { %v2294_v5 = vmul.f32 %v3948_v58, %v3942_v32  ;;  %v2424_v40 = vpop.xlane.xlu1 %2423 }
0x18d4   :  { %3949 = vrcp.f32 %v2424_v40 }
0x18d5   :  { %3691 = vmatmul.msk.f32.vlgmr.msrb.gmra.mxu1 %vm206_vm5, %v2294_v5  ;;  %3951 = vrcp.f32 %v2358_v52 }
0x18da   :  { %v3950_v47 = vpop.eup %3949 }
0x18db   :  { %v2426_v60 = vmul.f32 %v3950_v47, %v3944_v35  ;;  %v3952_v41 = vpop.eup %3951  ;;  %v3715_v35 = vld [vmem:[%s5235_s15 + $0x90] sm:$0xff] }
0x18dc   :  { %v2360_v39 = vmul.f32 %v3952_v41, %v3940_v30  ;;  %2634 = vmatpush.msra.mxu0 %v3715_v35 }
0x18dd   :  { %3697 = vmatmul.msk.f32.vlgmr.msra.gmra.mxu1 %vm206_vm5, %v2426_v60 }
0x18de   :  { %2635 = vmatpush.msra.mxu0 %v3714_v42 }
0x18e0   :  { %2636 = vmatpush.msra.mxu0 %v3713_v38 }
0x18eb   :  { %v2362_v63 = vpop.permute.xlu1 %2361 }
0x18ec   :  { %2382 = vmatpush.msrb.mxu2 %v2362_v63 }
0x18ed   :  { %3694 = vmatmul.msk.f32.vlgmr.msrb.gmra.mxu2 %vm206_vm5, %v2360_v39 }
0x18ee   :  { %2588 = vmatpush.msra.mxu2 %v3709_v12 }
0x18f0   :  { %2589 = vmatpush.msra.mxu2 %v3708_v14 }
0x18f2   :  { %2590 = vmatpush.msra.mxu2 %v3707_v16 }
0x18f4   :  { %2591 = vmatpush.msra.mxu2 %v3706_v18 }
0x191d   :  { %v2508_v0 = vpop.xlane.xlu2 %2507 }
0x191e   :  { %v2512_v2 = vmul.f32 %v2508_v0, %v4145_v15 }
0x1920   :  { %v2514_v3 = vsub.f32 %v2497_v45, %v2512_v2  ;;  %v4924_v45 = vld [vmem:[%s5234_s14 + $0x2] ss:$0 sm:$0xff] }
0x1922   :  { %v2516_v6 = vmul.f32 %v2514_v3, %v2514_v3 }
0x1924   :  { %v2518_v59 = vsel %vm75_vm0, %v2516_v6, 0.0 }
0x1925   :  { %2519 = vadd.xlane.f32.xlu0 %v2518_v59 }
0x194c   :  { %v2252_v46 = vpop.f32.mrf.mxu2 }
0x1952   :  { %v2318_v8 = vpop.f32.mrf.mxu1 }
0x1953   :  { %2454 = vrot.lane.b32.xlu1 %v2318_v8, %s5311_s5 }
0x195a   :  { %v2450_v10 = vpop.f32.mrf.mxu1 }
0x1970   :  { %v2384_v9 = vpop.f32.mrf.mxu2 }
0x1971   :  { %2458 = vrot.lane.b32.xlu1 %v2384_v9, %s5304_s26 }
0x1979   :  { %2462 = vrot.lane.b32.xlu1 %v2450_v10, %s5315_s22 }
0x1998   :  { %v2520_v44 = vpop.xlane.xlu0 %2519 }
0x1999   :  { %v2524_v62 = vmul.f32 %v2520_v44, %v4145_v15 }
0x199b   :  { %v2526_v1 = vadd.f32 1e-06, %v2524_v62 }
0x199d   :  { %3953 = vrsqrt.f32 %v2526_v1  ;;  %vm2534_vm10 = vweird.f32 %v2526_v1 }
0x19a3   :  { %v3954_v19 = vpop.eup %3953 }
0x19a4   :  { %v2529_v20 = vmul.f32 %v3954_v19, %v2526_v1  ;;  %vm2535_vm9 = vweird.f32 %v3954_v19 }
0x19a5   :  { %vm2536_vm11 = vmor %vm2534_vm10, %vm2535_vm9 }
0x19a6   :  { %v2530_v22 = vmul.f32 %v3954_v19, %v2529_v20  ;;  %v3728_v20 = vld [vmem:[%s5228_s9 + $0x70] sm:$0xff] }
0x19a8   :  { %v2531_v23 = vmul.f32 0.5, %v2530_v22  ;;  %v3727_v22 = vld [vmem:[%s5228_s9 + $0x68] sm:$0xff] }
0x19aa   :  { %v2532_v24 = vsub.f32 1.5, %v2531_v23  ;;  %v3726_v23 = vld [vmem:[%s5228_s9 + $0x60] sm:$0xff] }
0x19ac   :  { %v2533_v55 = vmul.f32 %v3954_v19, %v2532_v24 }
0x19ae   :  { %v2537_v25 = vsel %vm2536_vm11, %v3954_v19, %v2533_v55  ;;  %v3729_v19 = vld [vmem:[%s5228_s9 + $0x78] sm:$0xff] }
0x19af   :  { %v2548_v48 = vmul.f32 %v2537_v25, %v2514_v3  ;;  %2727 = vmatpush.msrb.mxu1 %v3729_v19 }
0x19b1   :  { %v2553_v27 = vmul.f32 %v4883_v50, %v2548_v48  ;;  %2728 = vmatpush.msrb.mxu1 %v3728_v20 }
0x19b3   :  { %v2558_v28 = vadd.f32 %v4888_v26, %v2553_v27  ;;  %2729 = vmatpush.msrb.mxu1 %v3727_v22 }
0x19b5   :  { %3711 = vmatmul.msk.f32.vlgmr.msra.gmra.mxu2 %vm75_vm0, %v2558_v28  ;;  %2730 = vmatpush.msrb.mxu1 %v3726_v23 }
0x19c5   :  { %v2455_v29 = vpop.permute.xlu1 %2454 }
0x19c6   :  { %v2465_v36 = vsel %vm206_vm5, %v2252_v46, %v2455_v29 }
0x19e3   :  { %v2459_v30 = vpop.permute.xlu1 %2458 }
0x19e4   :  { %v2466_v31 = vsel %vm485_vm13, %v2465_v36, %v2459_v30 }
0x19eb   :  { %v2463_v32 = vpop.permute.xlu1 %2462 }
0x19ec   :  { %v2467_v33 = vsel %vm487_vm14, %v2466_v31, %v2463_v32 }
0x19ed   :  { %3703 = vmatmul.msk.f32.gmra.mxu3 %vm75_vm0, %v2467_v33 }
0x1a38   :  { %v2593_v13 = vpop.f32.mrf.mxu2 }
0x1a39   :  { %v2594_v43 = vadd.f32 %v4924_v45, %v2593_v13 }
0x1a3b   :  { %v2599_v49 = vmax.f32 %v2594_v43, 0.0 }
0x1a3d   :  { %3722 = vmatmul.msk.f32.vlgmr.msra.gmra.mxu0 %vm915_vm3, %v2599_v49 }
0x1a70   :  { %v2499_v52 = vpop.f32.mrf.mxu3 }
0x1a71   :  { %v2500_v53 = vadd.f32 %v2499_v52, %v4763_v11 }
0x1a73   :  { %v2509_v56 = vsel %vm75_vm0, %v2500_v53, 0.0 }
0x1a74   :  { %2510 = vadd.xlane.f32.xlu1 %v2509_v56 }
0x1aba   :  { %v2638_v37 = vpop.f32.mrf.mxu0 }
0x1abb   :  { %v2639_v54 = vadd.f32 %v4933_v34, %v2638_v37 }
0x1abd   :  { %v2644_v58 = vadd.f32 %v2639_v54, %v2558_v28 }
0x1abf   :  { %v2650_v5 = vsel %vm75_vm0, %v2644_v58, 0.0 }
0x1ac0   :  { %2651 = vadd.xlane.f32.xlu0 %v2650_v5 }
0x1ae7   :  { %v2511_v40 = vpop.xlane.xlu1 %2510 }
0x1ae8   :  { %v2513_v47 = vmul.f32 %v2511_v40, %v4145_v15 }
0x1aea   :  { %v2515_v60 = vsub.f32 %v2500_v53, %v2513_v47 }
0x1aec   :  { %v2517_v11 = vmul.f32 %v2515_v60, %v2515_v60 }
0x1aee   :  { %v2521_v41 = vsel %vm75_vm0, %v2517_v11, 0.0 }
0x1aef   :  { %2522 = vadd.xlane.f32.xlu2 %v2521_v41 }
0x1b33   :  { %v2652_v39 = vpop.xlane.xlu0 %2651 }
0x1b34   :  { %v2656_v63 = vmul.f32 %v2652_v39, %v4145_v15 }
0x1b36   :  { %v2658_v0 = vsub.f32 %v2644_v58, %v2656_v63 }
0x1b38   :  { %v2660_v2 = vmul.f32 %v2658_v0, %v2658_v0 }
0x1b3a   :  { %v2662_v3 = vsel %vm75_vm0, %v2660_v2, 0.0 }
0x1b3b   :  { %2663 = vadd.xlane.f32.xlu2 %v2662_v3 }
0x1b62   :  { %v2523_v6 = vpop.xlane.xlu2 %2522 }
0x1b63   :  { %v2525_v59 = vmul.f32 %v2523_v6, %v4145_v15 }
0x1b65   :  { %v2527_v8 = vadd.f32 1e-06, %v2525_v59 }
0x1b67   :  { %3955 = vrsqrt.f32 %v2527_v8  ;;  %vm2544_vm1 = vweird.f32 %v2527_v8 }
0x1b6d   :  { %v3956_v46 = vpop.eup %3955 }
0x1b6e   :  { %v2539_v9 = vmul.f32 %v3956_v46, %v2527_v8  ;;  %vm2545_vm15 = vweird.f32 %v3956_v46 }
0x1b6f   :  { %vm2546_vm2 = vmor %vm2544_vm1, %vm2545_vm15 }
0x1b70   :  { %v2540_v10 = vmul.f32 %v3956_v46, %v2539_v9 }
0x1b72   :  { %v2541_v12 = vmul.f32 0.5, %v2540_v10 }
0x1b74   :  { %v2542_v14 = vsub.f32 1.5, %v2541_v12 }
0x1b76   :  { %v2543_v16 = vmul.f32 %v3956_v46, %v2542_v14 }
0x1b78   :  { %v2547_v18 = vsel %vm2546_vm2, %v3956_v46, %v2543_v16 }
0x1b79   :  { %v2549_v44 = vmul.f32 %v2547_v18, %v2515_v60 }
0x1b7b   :  { %v2554_v62 = vmul.f32 %v4883_v50, %v2549_v44 }
0x1b7d   :  { %v2559_v1 = vadd.f32 %v4888_v26, %v2554_v62 }
0x1b7f   :  { %3712 = vmatmul.msk.f32.gmra.mxu2 %vm75_vm0, %v2559_v1 }
0x1bae   :  { %v2664_v24 = vpop.xlane.xlu2 %2663 }
0x1baf   :  { %v2668_v55 = vmul.f32 %v2664_v24, %v4145_v15 }
0x1bb1   :  { %v2670_v50 = vadd.f32 1e-06, %v2668_v55 }
0x1bb3   :  { %3957 = vrsqrt.f32 %v2670_v50  ;;  %vm2678_vm6 = vweird.f32 %v2670_v50 }
0x1bb9   :  { %v3958_v25 = vpop.eup %3957 }
0x1bba   :  { %v2673_v48 = vmul.f32 %v3958_v25, %v2670_v50  ;;  %vm2679_vm4 = vweird.f32 %v3958_v25 }
0x1bbb   :  { %vm2680_vm8 = vmor %vm2678_vm6, %vm2679_vm4 }
0x1bbc   :  { %v2674_v26 = vmul.f32 %v3958_v25, %v2673_v48 }
0x1bbe   :  { %v2675_v27 = vmul.f32 0.5, %v2674_v26 }
0x1bc0   :  { %v2676_v28 = vsub.f32 1.5, %v2675_v27 }
0x1bc2   :  { %v2677_v57 = vmul.f32 %v3958_v25, %v2676_v28 }
0x1bc4   :  { %v2681_v7 = vsel %vm2680_vm8, %v3958_v25, %v2677_v57 }
0x1bc5   :  { %v2692_v61 = vmul.f32 %v2681_v7, %v2658_v0 }
0x1bc7   :  { %v2697_v29 = vmul.f32 %v4961_v17, %v2692_v61 }
0x1bc9   :  { %v4967_v30 = vadd.f32 %v3828_v4, %v2697_v29 }
0x1bcb   :  { %3730 = vmatmul.msk.f32.vlgmr.msrb.gmra.mxu1 %vm75_vm0, %v4967_v30 }
0x1c02   :  { %v2596_v36 = vpop.f32.mrf.mxu2 }
0x1c03   :  { %v2597_v31 = vadd.f32 %v4924_v45, %v2596_v36 }
0x1c05   :  { %v2600_v32 = vmax.f32 %v2597_v31, 0.0 }
0x1c07   :  { %3723 = vmatmul.msk.f32.gmra.mxu0 %vm915_vm3, %v2600_v32 }
0x1c48   :  { %v4973_v33 = vpop.f32.mrf.mxu1 }
0x1c49   :  { %2807 = vrot.lane.b32.xlu1 %v4973_v33, %s5308_s23  ;;  %2740 = vrot.lane.b32.xlu0 %v4973_v33, %s5305_s2  ;;  %v2738_v35 = vmul.f32 0.35355338, %v4973_v33 }
0x1c51   :  { %2805 = vrot.lane.b32.xlu1 %v2738_v35, %s5310_s25 }
0x1c59   :  { %2939 = vrot.lane.b32.xlu1 %v4973_v33, %s5307_s4 }
0x1c84   :  { %v2641_v42 = vpop.f32.mrf.mxu0 }
0x1c85   :  { %v2642_v38 = vadd.f32 %v4933_v34, %v2641_v42 }
0x1c87   :  { %v2645_v45 = vadd.f32 %v2642_v38, %v2559_v1 }
0x1c89   :  { %v2653_v13 = vsel %vm75_vm0, %v2645_v45, 0.0 }
0x1c8a   :  { %2654 = vadd.xlane.f32.xlu2 %v2653_v13 }
0x1cbb   :  { %v2808_v43 = vpop.permute.xlu1 %2807  ;;  %v2741_v49 = vpop.permute.xlu0 %2740 }
0x1cbc   :  { %3732 = vmatpush.xpose.msk.msrb.mxu3 %vm206_vm5, %v2741_v49  ;;  %3735 = vmatpush.xpose.msk.msra.mxu1 %vm206_vm5, %v2808_v43 }
0x1cbf   :  { %3733 = vmatmul.msk.f32.vlgmr.msrb.gmra.mxu3 %vm206_vm5, %v2738_v35 }
0x1cc3   :  { %v2806_v52 = vpop.permute.xlu1 %2805 }
0x1ccb   :  { %v2940_v53 = vpop.permute.xlu1 %2939 }
0x1ccc   :  { %3741 = vmatpush.xpose.msk.msrb.mxu1 %vm206_vm5, %v2940_v53 }
0x1cfd   :  { %v2655_v56 = vpop.xlane.xlu2 %2654 }
0x1cfe   :  { %v2657_v37 = vmul.f32 %v2655_v56, %v4145_v15 }
0x1d00   :  { %v2659_v34 = vsub.f32 %v2645_v45, %v2657_v37 }
0x1d02   :  { %v2661_v54 = vmul.f32 %v2659_v34, %v2659_v34 }
0x1d04   :  { %v2665_v58 = vsel %vm75_vm0, %v2661_v54, 0.0 }
0x1d05   :  { %2666 = vadd.xlane.f32.xlu2 %v2665_v58 }
0x1d1d   :  { %2779 = vrot.lane.b32.xlu2 %v4973_v33, %s5316_s8 }
0x1d25   :  { %2873 = vrot.lane.b32.xlu2 %v4973_v33, %s5306_s0 }
0x1d2d   :  { %2871 = vrot.lane.b32.xlu2 %v2738_v35, %s5309_s24 }
0x1d42   :  { %v2764_v5 = vpop.f32.mrf.mxu3 }
0x1d43   :  { %v2767_v40 = vsel %vm4201_vm7, %v2764_v5, -1e+09 }
0x1d44   :  { %v2768_v47 = vsel %vm206_vm5, %v2767_v40, -inf }
0x1d45   :  { %2769 = vmax.xlane.f32.xlu0 %v2768_v47 }
0x1d59   :  { %2937 = vrot.lane.b32.xlu0 %v2738_v35, %s5317_s27 }
0x1d78   :  { %v2667_v60 = vpop.xlane.xlu2 %2666 }
0x1d79   :  { %v2669_v11 = vmul.f32 %v2667_v60, %v4145_v15 }
0x1d7b   :  { %v2671_v41 = vadd.f32 1e-06, %v2669_v11 }
0x1d7d   :  { %3959 = vrsqrt.f32 %v2671_v41  ;;  %vm2688_vm10 = vweird.f32 %v2671_v41 }
0x1d80   :  { %v2780_v39 = vpop.permute.xlu2 %2779 }
0x1d81   :  { %2800 = vmatpush.msrb.mxu2 %v2780_v39 }
0x1d83   :  { %v3960_v63 = vpop.eup %3959 }
0x1d84   :  { %v2683_v0 = vmul.f32 %v3960_v63, %v2671_v41  ;;  %vm2689_vm9 = vweird.f32 %v3960_v63 }
0x1d85   :  { %vm2690_vm11 = vmor %vm2688_vm10, %vm2689_vm9 }
0x1d86   :  { %v2684_v2 = vmul.f32 %v3960_v63, %v2683_v0 }
0x1d88   :  { %v2685_v3 = vmul.f32 0.5, %v2684_v2  ;;  %v2874_v6 = vpop.permute.xlu2 %2873 }
0x1d89   :  { %3738 = vmatpush.xpose.msk.msra.mxu2 %vm206_vm5, %v2874_v6 }
0x1d8a   :  { %v2686_v59 = vsub.f32 1.5, %v2685_v3 }
0x1d8c   :  { %v2687_v8 = vmul.f32 %v3960_v63, %v2686_v59 }
0x1d8e   :  { %v2691_v46 = vsel %vm2690_vm11, %v3960_v63, %v2687_v8 }
0x1d8f   :  { %v2693_v9 = vmul.f32 %v2691_v46, %v2659_v34 }
0x1d90   :  { %v2872_v48 = vpop.permute.xlu2 %2871 }
0x1d91   :  { %v2698_v10 = vmul.f32 %v4961_v17, %v2693_v9 }
0x1d93   :  { %v5003_v12 = vadd.f32 %v3828_v4, %v2698_v10 }
0x1d95   :  { %3731 = vmatmul.msk.f32.gmra.mxu1 %vm75_vm0, %v5003_v12 }
0x1d9d   :  { %3736 = vmatmul.msk.f32.vlgmr.msra.gmra.mxu1 %vm206_vm5, %v2806_v52 }
0x1db8   :  { %v2770_v14 = vpop.xlane.xlu0 %2769 }
0x1db9   :  { %v2771_v62 = vsub.f32 %v2767_v40, %v2770_v14 }
0x1dbb   :  { %v2772_v1 = vmul.f32 1.442695, %v2771_v62 }
0x1dbd   :  { %3961 = vpow2.f32 %v2772_v1 }
0x1dc3   :  { %v3962_v19 = vpop.eup %3961 }
0x1dc4   :  { %v2774_v22 = vsel %vm206_vm5, %v3962_v19, 0.0 }
0x1dcb   :  { %v2938_v16 = vpop.permute.xlu0 %2937 }
0x1dcc   :  { %3742 = vmatmul.msk.f32.vlgmr.msrb.gmra.mxu1 %vm206_vm5, %v2938_v16 }
0x1e12   :  { %v5009_v18 = vpop.f32.mrf.mxu1 }
0x1e13   :  { %3087 = vrot.lane.b32.xlu2 %v5009_v18, %s5308_s23  ;;  %3020 = vrot.lane.b32.xlu1 %v5009_v18, %s5305_s2  ;;  %v3018_v44 = vmul.f32 0.35355338, %v5009_v18  ;;  %v3802_v51 = vpack.i.bf16 %v5009_v18, %v4973_v33  ;;  %s5325_s2 = sld [smem:[#allocation12_spill]] }
0x1e15   :  { %3151 = vrot.lane.b32.xlu0 %v3018_v44, %s5309_s24 }
0x1e1a   :  { %v2830_v20 = vpop.f32.mrf.mxu1 }
0x1e1b   :  { %3153 = vrot.lane.b32.xlu2 %v5009_v18, %s5306_s0  ;;  %3085 = vrot.lane.b32.xlu1 %v3018_v44, %s5310_s25  ;;  %v2833_v23 = vsel %vm4201_vm7, %v2830_v20, -1e+09  ;;  %s5323_s0 = sld [smem:[#allocation9_spill]] }
0x1e1c   :  { %v2834_v25 = vsel %vm206_vm5, %v2833_v23, -inf }
0x1e23   :  { %3219 = vrot.lane.b32.xlu1 %v5009_v18, %s5307_s4 }
0x1e44   :  { %2775 = vadd.xlane.f32.xlu2 %v2774_v22 }
0x1e49   :  { %v2962_v24 = vpop.f32.mrf.mxu1 }
0x1e4a   :  { %v2965_v55 = vsel %vm4201_vm7, %v2962_v24, -1e+09 }
0x1e4b   :  { %v2966_v50 = vsel %vm206_vm5, %v2965_v55, -inf }
0x1e4c   :  { %2967 = vmax.xlane.f32.xlu0 %v2966_v50 }
0x1e4d   :  { %2835 = vmax.xlane.f32.xlu1 %v2834_v25 }
0x1e5c   :  { %3217 = vrot.lane.b32.xlu2 %v3018_v44, %s5317_s27 }
0x1e6d   :  { %v3088_v26 = vpop.permute.xlu2 %3087 }
0x1e6e   :  { %3747 = vmatpush.xpose.msk.msra.mxu1 %vm206_vm5, %v3088_v26 }
0x1e75   :  { %v3154_v17 = vpop.permute.xlu2 %3153 }
0x1e85   :  { %v3021_v27 = vpop.permute.xlu1 %3020 }
0x1e87   :  { %v3152_v38 = vpop.permute.xlu0 %3151 }
0x1e8d   :  { %v3086_v28 = vpop.permute.xlu1 %3085 }
0x1e8e   :  { %3748 = vmatmul.msk.f32.vlgmr.msra.gmra.mxu1 %vm206_vm5, %v3086_v28 }
0x1e95   :  { %v3220_v57 = vpop.permute.xlu1 %3219 }
0x1e96   :  { %3753 = vmatpush.xpose.msk.msrb.mxu1 %vm206_vm5, %v3220_v57 }
0x1eb7   :  { %v2776_v7 = vpop.xlane.xlu2 %2775 }
0x1eb8   :  { %3963 = vrcp.f32 %v2776_v7 }
0x1ebe   :  { %v3964_v61 = vpop.eup %3963 }
0x1ebf   :  { %v2778_v4 = vmul.f32 %v3964_v61, %v3962_v19  ;;  %v3218_v29 = vpop.permute.xlu2 %3217  ;;  %v2968_v49 = vpop.xlane.xlu0 %2967 }
0x1ec0   :  { %v2836_v36 = vpop.xlane.xlu1 %2835  ;;  %3754 = vmatmul.msk.f32.vlgmr.msrb.gmra.mxu1 %vm206_vm5, %v3218_v29  ;;  %v2969_v52 = vsub.f32 %v2965_v55, %v2968_v49 }
0x1ec1   :  { %v2837_v31 = vsub.f32 %v2833_v23, %v2836_v36  ;;  %3734 = vmatmul.msk.f32.vlgmr.msrb.gmra.mxu2 %vm206_vm5, %v2778_v4 }
0x1ec2   :  { %3744 = vmatpush.xpose.msk.msrb.mxu2 %vm206_vm5, %v3021_v27  ;;  %v2970_v53 = vmul.f32 1.442695, %v2969_v52 }
0x1ec3   :  { %v2838_v32 = vmul.f32 1.442695, %v2837_v31 }
0x1ec5   :  { %3965 = vpow2.f32 %v2838_v32 }
0x1ec6   :  { %3967 = vpow2.f32 %v2970_v53 }
0x1ec9   :  { %3739 = vmatmul.msk.f32.vlgmr.msra.gmra.mxu2 %vm206_vm5, %v2872_v48 }
0x1eca   :  { %3750 = vmatpush.xpose.msk.msra.mxu2 %vm206_vm5, %v3154_v17 }
0x1ecb   :  { %v5038_v35 = vpop.eup %3965 }
0x1ecc   :  { %v2840_v42 = vsel %vm206_vm5, %v5038_v35, 0.0  ;;  %v5050_v54 = vpop.eup %3967 }
0x1ecd   :  { %2841 = vadd.xlane.f32.xlu0 %v2840_v42  ;;  %v2972_v5 = vsel %vm206_vm5, %v5050_v54, 0.0 }
0x1ed1   :  { %3745 = vmatmul.msk.f32.vlgmr.msrb.gmra.mxu2 %vm206_vm5, %v3018_v44 }
0x1ed9   :  { %3751 = vmatmul.msk.f32.vlgmr.msra.gmra.mxu2 %vm206_vm5, %v3152_v38 }
0x1f0b   :  { %v3110_v45 = vpop.f32.mrf.mxu1 }
0x1f0c   :  { %v3113_v13 = vsel %vm4297_vm12, %v3110_v45, -1e+09 }
0x1f0d   :  { %v3114_v43 = vsel %vm206_vm5, %v3113_v13, -inf }
0x1f0e   :  { %3115 = vmax.xlane.f32.xlu1 %v3114_v43 }
0x1f3d   :  { %v3242_v56 = vpop.f32.mrf.mxu1 }
0x1f3e   :  { %v3245_v37 = vsel %vm4297_vm12, %v3242_v56, -1e+09 }
0x1f3f   :  { %v3246_v34 = vsel %vm206_vm5, %v3245_v37, -inf }
0x1f40   :  { %3247 = vmax.xlane.f32.xlu2 %v3246_v34  ;;  %v2842_v62 = vpop.xlane.xlu0 %2841 }
0x1f44   :  { %v5052_v58 = vpop.f32.mrf.mxu2 }
0x1f48   :  { %2973 = vadd.xlane.f32.xlu2 %v2972_v5 }
0x1f4c   :  { %v2896_v40 = vpop.f32.mrf.mxu2 }
0x1f4d   :  { %v2899_v47 = vsel %vm4201_vm7, %v2896_v40, -1e+09 }
0x1f4e   :  { %v2900_v60 = vsel %vm206_vm5, %v2899_v47, -inf }
0x1f50   :  { %2901 = vmax.xlane.f32.xlu2 %v2900_v60 }
0x1f54   :  { %v3044_v11 = vpop.f32.mrf.mxu2 }
0x1f55   :  { %v3047_v41 = vsel %vm4297_vm12, %v3044_v11, -1e+09 }
0x1f56   :  { %v3048_v39 = vsel %vm206_vm5, %v3047_v41, -inf }
0x1f57   :  { %3049 = vmax.xlane.f32.xlu0 %v3048_v39 }
0x1f5c   :  { %v3176_v63 = vpop.f32.mrf.mxu2 }
0x1f5d   :  { %v3179_v0 = vsel %vm4297_vm12, %v3176_v63, -1e+09 }
0x1f5e   :  { %v3180_v2 = vsel %vm206_vm5, %v3179_v0, -inf }
0x1f5f   :  { %3181 = vmax.xlane.f32.xlu1 %v3180_v2 }
0x1f78   :  { %3803 = vrot.lane.b32.xlu1 %v3802_v51, %s5313_s30 }
0x1f81   :  { %v3116_v3 = vpop.xlane.xlu1 %3115 }
0x1f82   :  { %v3117_v6 = vsub.f32 %v3113_v13, %v3116_v3 }
0x1f84   :  { %v3118_v59 = vmul.f32 1.442695, %v3117_v6  ;;  %v3759_v6 = vld [vmem:[%s5318_s11 + $0x78] sm:$0xff] }
0x1f85   :  { %3321 = vmatpush.msrb.mxu2 %v3759_v6 }
0x1f86   :  { %3969 = vpow2.f32 %v3118_v59  ;;  %v3758_v59 = vld [vmem:[%s5318_s11 + $0x70] sm:$0xff] }
0x1f87   :  { %3322 = vmatpush.msrb.mxu2 %v3758_v59 }
0x1f8c   :  { %v5068_v8 = vpop.eup %3969 }
0x1f8d   :  { %v3120_v46 = vsel %vm206_vm5, %v5068_v8, 0.0 }
0x1f8e   :  { %3121 = vadd.xlane.f32.xlu2 %v3120_v46  ;;  %v3756_v46 = vld [vmem:[%s5318_s11 + $0x60] sm:$0xff] }
0x1fa6   :  { %2911 = vrot.lane.b32.xlu2 %v4973_v33, %s5312_s20 }
0x1fb3   :  { %v3248_v21 = vpop.xlane.xlu2 %3247 }
0x1fb4   :  { %v3249_v9 = vsub.f32 %v3245_v37, %v3248_v21 }
0x1fb6   :  { %v3250_v10 = vmul.f32 1.442695, %v3249_v9 }
0x1fb8   :  { %3971 = vpow2.f32 %v3250_v10 }
0x1fbb   :  { %v2974_v14 = vpop.xlane.xlu2 %2973 }
0x1fbe   :  { %v5074_v16 = vpop.eup %3971 }
0x1fbf   :  { %v3252_v44 = vsel %vm206_vm5, %v5074_v16, 0.0 }
0x1fc0   :  { %3253 = vadd.xlane.f32.xlu1 %v3252_v44 }
0x1fc3   :  { %v2902_v1 = vpop.xlane.xlu2 %2901 }
0x1fc4   :  { %v2903_v19 = vsub.f32 %v2899_v47, %v2902_v1 }
0x1fc6   :  { %v2904_v20 = vmul.f32 1.442695, %v2903_v19 }
0x1fc8   :  { %3973 = vpow2.f32 %v2904_v20 }
0x1fca   :  { %v3050_v22 = vpop.xlane.xlu0 %3049 }
0x1fcb   :  { %v3051_v23 = vsub.f32 %v3047_v41, %v3050_v22 }
0x1fcd   :  { %v3052_v24 = vmul.f32 1.442695, %v3051_v23 }
0x1fce   :  { %v3974_v55 = vpop.eup %3973 }
0x1fcf   :  { %3975 = vpow2.f32 %v3052_v24  ;;  %v2906_v50 = vsel %vm206_vm5, %v3974_v55, 0.0 }
0x1fd0   :  { %2907 = vadd.xlane.f32.xlu0 %v2906_v50  ;;  %3977 = vrcp.f32 %v2842_v62 }
0x1fd2   :  { %v3182_v26 = vpop.xlane.xlu1 %3181 }
0x1fd3   :  { %v3183_v7 = vsub.f32 %v3179_v0, %v3182_v26 }
0x1fd5   :  { %v3976_v25 = vpop.eup %3975  ;;  %v3184_v61 = vmul.f32 1.442695, %v3183_v7 }
0x1fd6   :  { %v3054_v48 = vsel %vm206_vm5, %v3976_v25, 0.0  ;;  %v3978_v27 = vpop.eup %3977 }
0x1fd7   :  { %3055 = vadd.xlane.f32.xlu2 %v3054_v48  ;;  %v2844_v17 = vmul.f32 %v3978_v27, %v5038_v35  ;;  %3979 = vpow2.f32 %v3184_v61 }
0x1fdd   :  { %v3980_v29 = vpop.eup %3979 }
0x1fde   :  { %v3186_v36 = vsel %vm206_vm5, %v3980_v29, 0.0 }
0x1fe4   :  { %2977 = vrot.lane.b32.xlu0 %v4973_v33, %s5314_s29 }
0x1fea   :  { %v3804_v28 = vpop.permute.xlu1 %3803 }
0x1feb   :  { %v3805_v57 = vunpack.i.l.bf16 %v3804_v28  ;;  %v3806_v52 = vunpack.i.h.bf16 %v3804_v28 }
0x1fed   :  { %2866 = vmatpush.msra.mxu3 %v3805_v57 }
0x1fee   :  { %3737 = vmatmul.msk.f32.vlgmr.msra.gmra.mxu3 %vm206_vm5, %v2844_v17 }
0x1fef   :  { %3059 = vrot.lane.b32.xlu2 %v5009_v18, %s5316_s8 }
0x1ff7   :  { %3257 = vrot.lane.b32.xlu2 %v5009_v18, %s5314_s29 }
0x1fff   :  { %3191 = vrot.lane.b32.xlu2 %v5009_v18, %s5312_s20 }
0x2001   :  { %v3122_v33 = vpop.xlane.xlu2 %3121 }
0x2009   :  { %v2912_v4 = vpop.permute.xlu2 %2911 }
0x200a   :  { %2932 = vmatpush.msrb.mxu0 %v2912_v4 }
0x200e   :  { %3187 = vadd.xlane.f32.xlu0 %v3186_v36  ;;  %v3765_v36 = vld [vmem:[%s5233_s13 + $0x68] sm:$0xff] }
0x2033   :  { %v3254_v53 = vpop.xlane.xlu1 %3253 }
0x2043   :  { %v2908_v31 = vpop.xlane.xlu0 %2907 }
0x2044   :  { %3981 = vrcp.f32 %v2908_v31  ;;  %v3764_v31 = vld [vmem:[%s5233_s13 + $0x60] sm:$0xff] }
0x204a   :  { %v3982_v32 = vpop.eup %3981  ;;  %v3056_v35 = vpop.xlane.xlu2 %3055 }
0x204b   :  { %v2910_v42 = vmul.f32 %v3982_v32, %v3974_v55  ;;  %3983 = vrcp.f32 %v3056_v35 }
0x204c   :  { %3985 = vrcp.f32 %v2974_v14 }
0x204d   :  { %3740 = vmatmul.msk.f32.vlgmr.msrb.gmra.mxu0 %vm206_vm5, %v2910_v42  ;;  %3987 = vrcp.f32 %v3122_v33 }
0x204e   :  { %3989 = vrcp.f32 %v3254_v53 }
0x2051   :  { %v3984_v38 = vpop.eup %3983 }
0x2052   :  { %v3058_v18 = vmul.f32 %v3984_v38, %v3976_v25  ;;  %v3060_v45 = vpop.permute.xlu2 %3059  ;;  %v3986_v13 = vpop.eup %3985 }
0x2053   :  { %3080 = vmatpush.msra.mxu0 %v3060_v45  ;;  %v2976_v43 = vmul.f32 %v3986_v13, %v5050_v54  ;;  %v3988_v37 = vpop.eup %3987 }
0x2054   :  { %v3124_v34 = vmul.f32 %v3988_v37, %v5068_v8  ;;  %v3990_v40 = vpop.eup %3989  ;;  %v3757_v8 = vld [vmem:[%s5318_s11 + $0x68] sm:$0xff] }
0x2055   :  { %3746 = vmatmul.msk.f32.vlgmr.msra.gmra.mxu0 %vm206_vm5, %v3058_v18  ;;  %v3256_v54 = vmul.f32 %v3990_v40, %v5074_v16  ;;  %3323 = vmatpush.msrb.mxu2 %v3757_v8  ;;  %v3776_v37 = vld [vmem:[%s5235_s15 + $0xe8] sm:$0xff] }
0x2056   :  { %v2978_v49 = vpop.permute.xlu0 %2977 }
0x2057   :  { %2998 = vmatpush.msrb.mxu3 %v2978_v49  ;;  %3324 = vmatpush.msrb.mxu2 %v3756_v46  ;;  %v3778_v49 = vld [vmem:[%s5235_s15 + $0xf8] sm:$0xff] }
0x2058   :  { %3743 = vmatmul.msk.f32.vlgmr.msrb.gmra.mxu3 %vm206_vm5, %v2976_v43  ;;  %3459 = vmatpush.msra.mxu1 %v3778_v49 }
0x2059   :  { %3146 = vmatpush.msra.mxu3 %v3806_v52  ;;  %v3777_v52 = vld [vmem:[%s5235_s15 + $0xf0] sm:$0xff] }
0x205a   :  { %v3258_v56 = vpop.permute.xlu2 %3257  ;;  %3460 = vmatpush.msra.mxu1 %v3777_v52 }
0x205b   :  { %3278 = vmatpush.msrb.mxu3 %v3258_v56  ;;  %v3829_v56 = vld [vmem:[%s5322_s1 + $0x3] ss:$0 sm:$0xff] }
0x205c   :  { %3461 = vmatpush.msra.mxu1 %v3776_v37  ;;  %v3833_v37 = vld [vmem:[%s5237_s17 + $0x3] ss:$0 sm:$0xff] }
0x2060   :  { %3749 = vmatmul.msk.f32.vlgmr.msra.gmra.mxu3 %vm206_vm5, %v3124_v34 }
0x2062   :  { %v3192_v5 = vpop.permute.xlu2 %3191 }
0x2063   :  { %3212 = vmatpush.msrb.mxu0 %v3192_v5 }
0x2068   :  { %3755 = vmatmul.msk.f32.vlgmr.msrb.gmra.mxu3 %vm206_vm5, %v3256_v54 }
0x2071   :  { %v2868_v47 = vpop.f32.mrf.mxu3 }
0x2072   :  { %3004 = vrot.lane.b32.xlu1 %v2868_v47, %s5311_s5  ;;  %v3830_v47 = vld [vmem:[%s5323_s0 + $0x3] ss:$0 sm:$0xff] }
0x2081   :  { %v3188_v60 = vpop.xlane.xlu0 %3187 }
0x2082   :  { %3991 = vrcp.f32 %v3188_v60  ;;  %v3775_v60 = vld [vmem:[%s5235_s15 + $0xe0] sm:$0xff] }
0x2083   :  { %3462 = vmatpush.msra.mxu1 %v3775_v60 }
0x2088   :  { %v3992_v11 = vpop.eup %3991 }
0x2089   :  { %v3190_v41 = vmul.f32 %v3992_v11, %v3980_v29  ;;  %v3766_v29 = vld [vmem:[%s5233_s13 + $0x70] sm:$0xff] }
0x208b   :  { %3752 = vmatmul.msk.f32.vlgmr.msrb.gmra.mxu0 %vm206_vm5, %v3190_v41 }
0x20ca   :  { %v2934_v0 = vpop.f32.mrf.mxu0 }
0x20d2   :  { %v3082_v51 = vpop.f32.mrf.mxu0 }
0x20db   :  { %v3000_v39 = vpop.f32.mrf.mxu3 }
0x20dc   :  { %3012 = vrot.lane.b32.xlu0 %v3000_v39, %s5315_s22  ;;  %v3774_v39 = vld [vmem:[%s5235_s15 + $0xd8] sm:$0xff] }
0x20dd   :  { %3463 = vmatpush.msra.mxu1 %v3774_v39 }
0x20e3   :  { %v3148_v63 = vpop.f32.mrf.mxu3 }
0x20e4   :  { %3284 = vrot.lane.b32.xlu2 %v3148_v63, %s5311_s5  ;;  %v3005_v9 = vpop.permute.xlu1 %3004 }
0x20e5   :  { %v3015_v14 = vsel %vm206_vm5, %v5052_v58, %v3005_v9 }
0x20eb   :  { %v3280_v2 = vpop.f32.mrf.mxu3 }
0x20ec   :  { %3008 = vrot.lane.b32.xlu2 %v2934_v0, %s5304_s26  ;;  %3292 = vrot.lane.b32.xlu1 %v3280_v2, %s5315_s22 }
0x2108   :  { %v3214_v3 = vpop.f32.mrf.mxu0 }
0x2109   :  { %3288 = vrot.lane.b32.xlu2 %v3214_v3, %s5304_s26 }
0x213e   :  { %v3285_v21 = vpop.permute.xlu2 %3284 }
0x213f   :  { %v3295_v1 = vsel %vm206_vm5, %v3082_v51, %v3285_v21 }
0x2146   :  { %v3009_v10 = vpop.permute.xlu2 %3008 }
0x2147   :  { %v3016_v16 = vsel %vm485_vm13, %v3015_v14, %v3009_v10  ;;  %v3773_v10 = vld [vmem:[%s5235_s15 + $0xd0] sm:$0xff]  ;;  %v3772_v14 = vld [vmem:[%s5235_s15 + $0xc8] sm:$0xff] }
0x2148   :  { %3464 = vmatpush.msra.mxu1 %v3773_v10 }
0x214a   :  { %3465 = vmatpush.msra.mxu1 %v3772_v14 }
0x214e   :  { %v3013_v44 = vpop.permute.xlu0 %3012 }
0x214f   :  { %v3017_v62 = vsel %vm487_vm14, %v3016_v16, %v3013_v44  ;;  %v3771_v16 = vld [vmem:[%s5235_s15 + $0xc0] sm:$0xff] }
0x2150   :  { %3760 = vmatmul.msk.f32.vlgmr.msrb.gmra.mxu2 %vm75_vm0, %v3017_v62  ;;  %3466 = vmatpush.msra.mxu1 %v3771_v16  ;;  %v3831_v44 = vld [vmem:[%s5234_s14 + $0x3] ss:$0 sm:$0xff] }
0x215e   :  { %v3293_v20 = vpop.permute.xlu1 %3292 }
0x2163   :  { %v3289_v19 = vpop.permute.xlu2 %3288 }
0x2164   :  { %v3296_v22 = vsel %vm485_vm13, %v3295_v1, %v3289_v19 }
0x2165   :  { %v3297_v23 = vsel %vm487_vm14, %v3296_v22, %v3293_v20 }
0x2166   :  { %3761 = vmatmul.msk.f32.gmra.mxu2 %vm75_vm0, %v3297_v23 }
0x21d3   :  { %v3326_v24 = vpop.f32.mrf.mxu2 }
0x21d4   :  { %v3327_v58 = vadd.f32 %v3326_v24, %v4967_v30  ;;  %v3832_v24 = vld [vmem:[%s5321_s12 + $0x3] ss:$0 sm:$0xff]  ;;  %s5324_s12 = sld [smem:[#allocation11_spill]] }
0x21d6   :  { %v3336_v55 = vsel %vm75_vm0, %v3327_v58, 0.0 }
0x21d7   :  { %3337 = vadd.xlane.f32.xlu0 %v3336_v55 }
0x21e9   :  { %v3329_v50 = vpop.f32.mrf.mxu2 }
0x21ea   :  { %v3330_v25 = vadd.f32 %v3329_v50, %v5003_v12  ;;  %v3767_v12 = vld [vmem:[%s5233_s13 + $0x78] sm:$0xff] }
0x21eb   :  { %3418 = vmatpush.msra.mxu0 %v3767_v12 }
0x21ec   :  { %v3339_v48 = vsel %vm75_vm0, %v3330_v25, 0.0 }
0x21ed   :  { %3340 = vadd.xlane.f32.xlu2 %v3339_v48  ;;  %3419 = vmatpush.msra.mxu0 %v3766_v29 }
0x21ef   :  { %3420 = vmatpush.msra.mxu0 %v3765_v36 }
0x21f1   :  { %3421 = vmatpush.msra.mxu0 %v3764_v31  ;;  %v3537_v31 = vld [vmem:[%s5324_s12 + $0x18] sm:$0xff] }
0x21f2   :  { %3556 = vmatpush.msra.mxu3 %v3537_v31 }
0x224a   :  { %v3338_v26 = vpop.xlane.xlu0 %3337 }
0x224b   :  { %v3342_v27 = vmul.f32 %v3338_v26, %v4145_v15 }
0x224d   :  { %v3344_v28 = vsub.f32 %v3327_v58, %v3342_v27 }
0x224f   :  { %v3346_v57 = vmul.f32 %v3344_v28, %v3344_v28 }
0x2251   :  { %v3348_v17 = vsel %vm75_vm0, %v3346_v57, 0.0 }
0x2252   :  { %3349 = vadd.xlane.f32.xlu1 %v3348_v17 }
0x2260   :  { %v3341_v7 = vpop.xlane.xlu2 %3340 }
0x2261   :  { %v3343_v30 = vmul.f32 %v3341_v7, %v4145_v15 }
0x2263   :  { %v3345_v61 = vsub.f32 %v3330_v25, %v3343_v30 }
0x2265   :  { %v3347_v33 = vmul.f32 %v3345_v61, %v3345_v61 }
0x2267   :  { %v3351_v4 = vsel %vm75_vm0, %v3347_v33, 0.0 }
0x2268   :  { %3352 = vadd.xlane.f32.xlu2 %v3351_v4 }
0x22c5   :  { %v3350_v32 = vpop.xlane.xlu1 %3349 }
0x22c6   :  { %v3354_v35 = vmul.f32 %v3350_v32, %v4145_v15  ;;  %v3536_v32 = vld [vmem:[%s5324_s12 + $0x10] sm:$0xff] }
0x22c7   :  { %3557 = vmatpush.msra.mxu3 %v3536_v32 }
0x22c8   :  { %v3356_v42 = vadd.f32 1e-06, %v3354_v35  ;;  %v3535_v35 = vld [vmem:[%s5324_s12 + $0x8] sm:$0xff] }
0x22c9   :  { %3558 = vmatpush.msra.mxu3 %v3535_v35 }
0x22ca   :  { %3993 = vrsqrt.f32 %v3356_v42  ;;  %vm3364_vm7 = vweird.f32 %v3356_v42 }
0x22d0   :  { %v3994_v38 = vpop.eup %3993 }
0x22d1   :  { %v3359_v18 = vmul.f32 %v3994_v38, %v3356_v42  ;;  %vm3365_vm5 = vweird.f32 %v3994_v38  ;;  %v3534_v42 = vld [vmem:[%s5324_s12] sm:$0xff] }
0x22d2   :  { %vm3366_vm12 = vmor %vm3364_vm7, %vm3365_vm5  ;;  %3559 = vmatpush.msra.mxu3 %v3534_v42 }
0x22d3   :  { %v3360_v45 = vmul.f32 %v3994_v38, %v3359_v18 }
0x22d5   :  { %v3361_v13 = vmul.f32 0.5, %v3360_v45 }
0x22d7   :  { %v3362_v43 = vsub.f32 1.5, %v3361_v13 }
0x22d9   :  { %v3363_v53 = vmul.f32 %v3994_v38, %v3362_v43 }
0x22db   :  { %v3367_v34 = vsel %vm3366_vm12, %v3994_v38, %v3363_v53  ;;  %v3353_v5 = vpop.xlane.xlu2 %3352 }
0x22dc   :  { %v3378_v40 = vmul.f32 %v3367_v34, %v3344_v28  ;;  %v3355_v54 = vmul.f32 %v3353_v5, %v4145_v15 }
0x22de   :  { %v3383_v11 = vmul.f32 %v3829_v56, %v3378_v40  ;;  %v3357_v41 = vadd.f32 1e-06, %v3355_v54  ;;  %v3834_v40 = vld [vmem:[%s5238_s18 + $0x3] ss:$0 sm:$0xff] }
0x22e0   :  { %3995 = vrsqrt.f32 %v3357_v41  ;;  %v3388_v63 = vadd.f32 %v3830_v47, %v3383_v11  ;;  %vm3374_vm14 = vweird.f32 %v3357_v41 }
0x22e2   :  { %3769 = vmatmul.msk.f32.vlgmr.msra.gmra.mxu0 %vm75_vm0, %v3388_v63 }
0x22e6   :  { %v3996_v0 = vpop.eup %3995 }
0x22e7   :  { %v3369_v2 = vmul.f32 %v3996_v0, %v3357_v41  ;;  %vm3375_vm13 = vweird.f32 %v3996_v0 }
0x22e8   :  { %vm3376_vm15 = vmor %vm3374_vm14, %vm3375_vm13 }
0x22e9   :  { %v3370_v51 = vmul.f32 %v3996_v0, %v3369_v2 }
0x22eb   :  { %v3371_v3 = vmul.f32 0.5, %v3370_v51 }
0x22ed   :  { %v3372_v6 = vsub.f32 1.5, %v3371_v3 }
0x22ef   :  { %v3373_v59 = vmul.f32 %v3996_v0, %v3372_v6 }
0x22f1   :  { %v3377_v8 = vsel %vm3376_vm15, %v3996_v0, %v3373_v59 }
0x22f2   :  { %v3379_v46 = vmul.f32 %v3377_v8, %v3345_v61 }
0x22f4   :  { %v3384_v21 = vmul.f32 %v3829_v56, %v3379_v46 }
0x22f6   :  { %v3389_v9 = vadd.f32 %v3830_v47, %v3384_v21 }
0x22f8   :  { %3770 = vmatmul.msk.f32.gmra.mxu0 %vm75_vm0, %v3389_v9 }
0x235f   :  { %v3423_v62 = vpop.f32.mrf.mxu0 }
0x2360   :  { %v3424_v1 = vadd.f32 %v3831_v44, %v3423_v62 }
0x2362   :  { %v3429_v19 = vmax.f32 %v3424_v1, 0.0 }
0x2364   :  { %3780 = vmatmul.msk.f32.vlgmr.msra.gmra.mxu1 %vm915_vm3, %v3429_v19 }
0x2375   :  { %v3426_v20 = vpop.f32.mrf.mxu0 }
0x2376   :  { %v3427_v22 = vadd.f32 %v3831_v44, %v3426_v20 }
0x2378   :  { %v3430_v23 = vmax.f32 %v3427_v22, 0.0 }
0x237a   :  { %3781 = vmatmul.msk.f32.gmra.mxu1 %vm915_vm3, %v3430_v23 }
0x23e1   :  { %v3468_v58 = vpop.f32.mrf.mxu1 }
0x23e2   :  { %v3469_v55 = vadd.f32 %v3832_v24, %v3468_v58 }
0x23e4   :  { %v3474_v50 = vadd.f32 %v3469_v55, %v3388_v63 }
0x23e6   :  { %v3480_v25 = vsel %vm75_vm0, %v3474_v50, 0.0 }
0x23e7   :  { %3481 = vadd.xlane.f32.xlu0 %v3480_v25 }
0x23f7   :  { %v3471_v48 = vpop.f32.mrf.mxu1 }
0x23f8   :  { %v3472_v26 = vadd.f32 %v3832_v24, %v3471_v48 }
0x23fa   :  { %v3475_v27 = vadd.f32 %v3472_v26, %v3389_v9 }
0x23fc   :  { %v3483_v28 = vsel %vm75_vm0, %v3475_v27, 0.0 }
0x23fd   :  { %3484 = vadd.xlane.f32.xlu1 %v3483_v28 }
0x245a   :  { %v3482_v57 = vpop.xlane.xlu0 %3481 }
0x245b   :  { %v3486_v17 = vmul.f32 %v3482_v57, %v4145_v15 }
0x245d   :  { %v3488_v7 = vsub.f32 %v3474_v50, %v3486_v17 }
0x245f   :  { %v3490_v30 = vmul.f32 %v3488_v7, %v3488_v7 }
0x2461   :  { %v3492_v61 = vsel %vm75_vm0, %v3490_v30, 0.0 }
0x2462   :  { %3493 = vadd.xlane.f32.xlu2 %v3492_v61 }
0x2470   :  { %v3485_v33 = vpop.xlane.xlu1 %3484 }
0x2471   :  { %v3487_v4 = vmul.f32 %v3485_v33, %v4145_v15 }
0x2473   :  { %v3489_v12 = vsub.f32 %v3475_v27, %v3487_v4 }
0x2475   :  { %v3491_v29 = vmul.f32 %v3489_v12, %v3489_v12 }
0x2477   :  { %v3495_v36 = vsel %vm75_vm0, %v3491_v29, 0.0 }
0x2478   :  { %3496 = vadd.xlane.f32.xlu0 %v3495_v36 }
0x24d5   :  { %v3494_v38 = vpop.xlane.xlu2 %3493 }
0x24d6   :  { %v3498_v18 = vmul.f32 %v3494_v38, %v4145_v15 }
0x24d8   :  { %v3500_v45 = vadd.f32 1e-06, %v3498_v18 }
0x24da   :  { %3997 = vrsqrt.f32 %v3500_v45  ;;  %vm3508_vm1 = vweird.f32 %v3500_v45 }
0x24e0   :  { %v3998_v13 = vpop.eup %3997 }
0x24e1   :  { %v3503_v43 = vmul.f32 %v3998_v13, %v3500_v45  ;;  %vm3509_vm3 = vweird.f32 %v3998_v13 }
0x24e2   :  { %vm3510_vm2 = vmor %vm3508_vm1, %vm3509_vm3 }
0x24e3   :  { %v3504_v49 = vmul.f32 %v3998_v13, %v3503_v43 }
0x24e5   :  { %v3505_v52 = vmul.f32 0.5, %v3504_v49 }
0x24e7   :  { %v3506_v53 = vsub.f32 1.5, %v3505_v52 }
0x24e9   :  { %v3507_v56 = vmul.f32 %v3998_v13, %v3506_v53 }
0x24eb   :  { %v3511_v34 = vsel %vm3510_vm2, %v3998_v13, %v3507_v56  ;;  %v3497_v5 = vpop.xlane.xlu0 %3496 }
0x24ec   :  { %v3522_v54 = vmul.f32 %v3511_v34, %v3488_v7  ;;  %v3499_v47 = vmul.f32 %v3497_v5, %v4145_v15 }
0x24ee   :  { %v3527_v60 = vmul.f32 %v3833_v37, %v3522_v54  ;;  %v3501_v11 = vadd.f32 1e-06, %v3499_v47 }
0x24f0   :  { %v3532_v41 = vadd.f32 %v3834_v40, %v3527_v60  ;;  %3999 = vrsqrt.f32 %v3501_v11  ;;  %vm3518_vm6 = vweird.f32 %v3501_v11 }
0x24f2   :  { %3784 = vmatmul.msk.f32.vlgmr.msra.gmra.mxu3 %vm75_vm0, %v3532_v41 }
0x24f6   :  { %v4000_v39 = vpop.eup %3999 }
0x24f7   :  { %v3513_v63 = vmul.f32 %v4000_v39, %v3501_v11  ;;  %vm3519_vm4 = vweird.f32 %v4000_v39 }
0x24f8   :  { %vm3520_vm8 = vmor %vm3518_vm6, %vm3519_vm4 }
0x24f9   :  { %v3514_v0 = vmul.f32 %v4000_v39, %v3513_v63 }
0x24fb   :  { %v3515_v2 = vmul.f32 0.5, %v3514_v0 }
0x24fd   :  { %v3516_v51 = vsub.f32 1.5, %v3515_v2 }
0x24ff   :  { %v3517_v3 = vmul.f32 %v4000_v39, %v3516_v51 }
0x2501   :  { %v3521_v6 = vsel %vm3520_vm8, %v4000_v39, %v3517_v3 }
0x2502   :  { %v3523_v59 = vmul.f32 %v3521_v6, %v3489_v12 }
0x2504   :  { %v3528_v8 = vmul.f32 %v3833_v37, %v3523_v59 }
0x2506   :  { %v3533_v46 = vadd.f32 %v3834_v40, %v3528_v8 }
0x2508   :  { %3785 = vmatmul.msk.f32.gmra.mxu3 %vm75_vm0, %v3533_v46 }
0x2575   :  { %v3561_v15 = vpop.f32.mrf.mxu3 }
0x2576   :  { %3567 = vst [vmem:[%s5325_s2] sm:$0xff] %v3561_v15 }
0x258b   :  { %v3564_v21 = vpop.f32.mrf.mxu3 }
0x258c   :  { %3568 = vst [vmem:[%s5325_s2 + $0x8] sm:$0xff] %v3564_v21 }

</bundles_post_ra>
